<compile_context>
chip_gen: v5e
topology: v5e:2x2
jax: 0.10.0
libtpu: 0.0.40
codegen_flags: <defaults>
</compile_context>

<pallas_src>
import functools

import jax
import jax.numpy as jnp
from jax import lax
from jax.experimental import pallas as pl
from jax.experimental.pallas import tpu as pltpu

# ---------------------------------------------------------------------------
# Problem sizes (small, deterministic).
# ---------------------------------------------------------------------------
B = 16           # batch (single tile, single grid step)
D = 32           # state dim of the CNF
H = 64           # hidden dim of the odefunc MLP
D_PAD = 128      # state dim padded to a full lane tile (lane-dense layout)
N_STEPS = 8      # fixed RK4 steps (solver='rk4', step_size = T / N_STEPS)
T_END = 1.0      # CNF T; sqrt_end_time = sqrt(T), integrate to sqrt_end_time**2


# ---------------------------------------------------------------------------
# Pallas kernel: full RK4 integration of (z, logpz) for the whole batch.
# ---------------------------------------------------------------------------
def _cnf_rk4_kernel(times_ref,                        # SMEM scalar prefetch (2,)
                    z_ref, logp_ref,                  # (B, D_PAD) f32, (B, 1) f32
                    w1_ref, b1_ref, u1_ref,           # (D_PAD, H) bf16, (1, H) f32, (1, H) f32
                    w2_ref, b2_ref, s_ref,            # (H, D_PAD) bf16, (1, D_PAD) f32, (1, H) f32
                    zo_ref, lpo_ref):                 # outputs (B, D_PAD) f32, (B, 1) f32
    bt = z_ref.shape[0]
    hdim = w1_ref.shape[1]
    dpad = w2_ref.shape[1]

    t0 = times_ref[0]
    t1 = times_ref[1]
    dt = (t1 - t0) / jnp.float32(N_STEPS)

    # bf16 weights: single-pass MXU matmuls, only ~8 pinned weight vregs total.
    w1 = w1_ref[...]                                     # (D_PAD, H) bf16
    w2 = w2_ref[...]                                     # (H, D_PAD) bf16
    b1 = b1_ref[...]                                     # (1, H) f32
    u1 = u1_ref[...]                                     # (1, H) f32
    # Hoisted broadcasts (JAX does not CSE broadcast_in_dim, and the RK4 loop
    # below is fully unrolled).
    b2_b = jnp.broadcast_to(b2_ref[...], (bt, dpad))     # (B, D_PAD) f32
    s_b = jnp.broadcast_to(s_ref[...], (bt, hdim))       # (B, H) f32

    def time_bias(t):
        # (1, H) affine time conditioning, broadcast once per unique stage time.
        return jnp.broadcast_to(b1 + t * u1, (bt, hdim))

    def odefunc(tbias, z):
        # bf16 only at the MXU inputs; f32 accumulation and f32 elementwise.
        pre = jnp.dot(z.astype(jnp.bfloat16), w1,
                      preferred_element_type=jnp.float32) + tbias
        h = jnp.tanh(pre)                                                  # (B, H) f32
        dz = jnp.dot(h.astype(jnp.bfloat16), w2,
                     preferred_element_type=jnp.float32) + b2_b            # (B, D_PAD) f32
        # exact divergence kept OFF the MXU: VPU multiply + XLU lane reduction
        # (off the z dependency chain -> free filler under the next stage).
        div = jnp.sum((1.0 - h * h) * s_b, axis=-1, keepdims=True)         # (B, 1)
        return dz, -div

    z0 = z_ref[...].astype(jnp.float32)
    lp0 = logp_ref[...].astype(jnp.float32)

    def rk4_step(i, carry):
        z, lp = carry
        t = t0 + dt * i.astype(jnp.float32)
        tb0 = time_bias(t)
        tbh = time_bias(t + 0.5 * dt)      # shared by k2 and k3 (same time)
        tb1 = time_bias(t + dt)
        k1z, k1l = odefunc(tb0, z)
        k2z, k2l = odefunc(tbh, z + 0.5 * dt * k1z)
        k3z, k3l = odefunc(tbh, z + 0.5 * dt * k2z)
        k4z, k4l = odefunc(tb1, z + dt * k3z)
        z = z + (dt / 6.0) * (k1z + 2.0 * k2z + 2.0 * k3z + k4z)
        lp = lp + (dt / 6.0) * (k1l + 2.0 * k2l + 2.0 * k3l + k4l)
        return z, lp

    # N_STEPS is static -> full unroll gives the scheduler cross-stage visibility.
    z_t, lp_t = lax.fori_loop(0, N_STEPS, rk4_step, (z0, lp0), unroll=True)

    # z: full 128-lane unmasked store (padded lanes stay exactly zero).
    # logp: plain (B, 1) store, once per call -> no 128-lane slab needed.
    zo_ref[...] = z_t
    lpo_ref[...] = lp_t


# ---------------------------------------------------------------------------
# One-time parameter preparation (hoisted out of the per-call forward).
# ---------------------------------------------------------------------------
def prepare_params(raw_params):
    """Pad/cast odefunc params once.  Only z changes per forward call.

    Zero-padding W1 rows / W2 cols / b2 entries keeps the padded state lanes
    exactly zero through the whole integration, so the math is unchanged.
    The exact-trace vector s is recomputed here from W1/W2 (never trusted
    from the caller), so stale s cannot silently corrupt logpz.
    """
    w1, b1, u1, w2, b2 = raw_params
    f32, bf16 = jnp.float32, jnp.bfloat16
    s_row = jnp.sum(w1.astype(f32).T * w2.astype(f32), axis=1)[None, :]     # (1, H)
    w1p = jnp.zeros((D_PAD, H), bf16).at[:D, :].set(w1.astype(bf16))        # (D_PAD, H)
    w2p = jnp.zeros((H, D_PAD), bf16).at[:, :D].set(w2.astype(bf16))        # (H, D_PAD)
    b2p = jnp.zeros((1, D_PAD), f32).at[:, :D].set(b2.astype(f32))          # (1, D_PAD)
    return (w1p, b1.astype(f32), u1.astype(f32), w2p, b2p, s_row)


# ---------------------------------------------------------------------------
# Wrapper mimicking CNF.forward semantics.
# ---------------------------------------------------------------------------
@functools.partial(jax.jit, static_argnames=("reverse",))
def cnf_forward(prepared_params, z, logpz=None, integration_times=None,
                reverse=False):
    """Returns (z_t, logpz_t, reg_states) exactly like CNF.forward."""
    w1p, b1f, u1f, w2p, b2p, s_row = prepared_params
    bsz = z.shape[0]

    if logpz is None:
        _logpz = jnp.zeros((bsz, 1), dtype=jnp.float32)
    else:
        _logpz = logpz.astype(jnp.float32)
    if integration_times is None:
        sqrt_end_time = jnp.sqrt(jnp.float32(T_END))
        integration_times = jnp.array(
            [0.0, sqrt_end_time * sqrt_end_time], dtype=jnp.float32)
    integration_times = integration_times.astype(jnp.float32)
    if reverse:
        integration_times = jnp.flip(integration_times, axis=0)

    # Only the state needs per-call padding to a full 128-lane tile.
    z_pad = jnp.zeros((bsz, D_PAD), jnp.float32).at[:, :D].set(
        z.astype(jnp.float32))

    full_block = lambda shp: pl.BlockSpec(shp, lambda i, times: (0, 0))

    z_slab, lp_out = pl.pallas_call(
        _cnf_rk4_kernel,
        out_shape=(
            jax.ShapeDtypeStruct((bsz, D_PAD), jnp.float32),
            jax.ShapeDtypeStruct((bsz, 1), jnp.float32),
        ),
        grid_spec=pltpu.PrefetchScalarGridSpec(
            num_scalar_prefetch=1,
            grid=(1,),                                    # whole batch in one step
            in_specs=[
                full_block((bsz, D_PAD)),                 # z (padded)
                full_block((bsz, 1)),                     # logpz
                full_block((D_PAD, H)),                   # W1 (bf16, padded rows)
                full_block((1, H)),                       # b1
                full_block((1, H)),                       # u1 (time conditioning)
                full_block((H, D_PAD)),                   # W2 (bf16, padded cols)
                full_block((1, D_PAD)),                   # b2 (padded)
                full_block((1, H)),                       # s  (exact-trace row)
            ],
            out_specs=[
                full_block((bsz, D_PAD)),
                full_block((bsz, 1)),
            ],
        ),
        compiler_params=pltpu.CompilerParams(
            dimension_semantics=("arbitrary",)),
    )(integration_times, z_pad, _logpz, w1p, b1f, u1f, w2p, b2p, s_row)

    # len(integration_times) == 2, so only the final state is returned,
    # matching `state_t = tuple(s[1] for s in state_t)`.
    z_t = z_slab[:, :D].astype(z.dtype)
    logpz_t = lp_out.astype(z.dtype)
    reg_states = tuple()   # TODO(synk): regularization_fns / RegularizedODEfunc
                           # (training-time reg states) are not modeled.
    return z_t, logpz_t, reg_states


# ---------------------------------------------------------------------------
# Pure-JAX reference (same RK4 / odefunc, same bf16-at-the-MXU contraction).
# ---------------------------------------------------------------------------
def _reference(raw_params, z, times):
    w1, b1, u1, w2, b2 = raw_params
    s = jnp.sum(w1.T * w2, axis=1)[None, :]
    bf16 = jnp.bfloat16
    t0, t1 = times[0], times[1]
    dt = (t1 - t0) / N_STEPS

    def f(t, z_):
        pre = jnp.dot(z_.astype(bf16), w1.astype(bf16),
                      preferred_element_type=jnp.float32) + (b1 + t * u1)
        h = jnp.tanh(pre)
        dz = jnp.dot(h.astype(bf16), w2.astype(bf16),
                     preferred_element_type=jnp.float32) + b2
        div = jnp.sum((1.0 - h * h) * s, axis=-1, keepdims=True)
        return dz, -div

    zc = z.astype(jnp.float32)
    lpc = jnp.zeros((z.shape[0], 1), jnp.float32)
    for i in range(N_STEPS):
        t = t0 + dt * i
        k1z, k1l = f(t, zc)
        k2z, k2l = f(t + 0.5 * dt, zc + 0.5 * dt * k1z)
        k3z, k3l = f(t + 0.5 * dt, zc + 0.5 * dt * k2z)
        k4z, k4l = f(t + dt, zc + dt * k3z)
        zc = zc + (dt / 6.0) * (k1z + 2 * k2z + 2 * k3z + k4z)
        lpc = lpc + (dt / 6.0) * (k1l + 2 * k2l + 2 * k3l + k4l)
    return zc, lpc


def _init_params(key):
    k1, k2, k3, k4, k5 = jax.random.split(key, 5)
    w1 = jax.random.normal(k1, (D, H), jnp.float32) * 0.1
    b1 = jax.random.normal(k2, (1, H), jnp.float32) * 0.01
    u1 = jax.random.normal(k3, (1, H), jnp.float32) * 0.01
    w2 = jax.random.normal(k4, (H, D), jnp.float32) * 0.1
    b2 = jax.random.normal(k5, (1, D), jnp.float32) * 0.01
    return (w1, b1, u1, w2, b2)


if __name__ == "__main__":
    key = jax.random.PRNGKey(0)
    kp, kz = jax.random.split(key)
    raw_params = _init_params(kp)
    z = jax.random.normal(kz, (B, D), jnp.float32)

    # One-time preparation (padding / bf16 cast / exact-trace vector).
    params = prepare_params(raw_params)
    jax.block_until_ready(params)

    z_t, logpz_t, reg_states = cnf_forward(params, z)
    jax.block_until_ready((z_t, logpz_t))

    # sanity check against pure-JAX RK4 (bf16 MXU contraction in both paths)
    times = jnp.array([0.0, T_END], jnp.float32)
    z_ref, lp_ref = _reference(raw_params, z, times)
    assert jnp.allclose(z_t, z_ref, atol=1e-3, rtol=1e-3)
    assert jnp.allclose(logpz_t, lp_ref, atol=1e-3, rtol=1e-3)
    assert z_t.shape == (B, D) and logpz_t.shape == (B, 1)
    assert reg_states == tuple()

    print("KERNEL_OK")
</pallas_src>

<mosaic_0001>
module attributes {stable_mosaic.version = 11 : i64} {
  func.func @_cnf_rk4_kernel(%arg0: i32, %arg1: memref<2xf32, #tpu.memory_space<smem>>, %arg2: memref<16x128xf32, #tpu.memory_space<vmem>>, %arg3: memref<16x1xf32, #tpu.memory_space<vmem>>, %arg4: memref<128x64xbf16, #tpu.memory_space<vmem>>, %arg5: memref<1x64xf32, #tpu.memory_space<vmem>>, %arg6: memref<1x64xf32, #tpu.memory_space<vmem>>, %arg7: memref<64x128xbf16, #tpu.memory_space<vmem>>, %arg8: memref<1x128xf32, #tpu.memory_space<vmem>>, %arg9: memref<1x64xf32, #tpu.memory_space<vmem>>, %arg10: memref<16x128xf32, #tpu.memory_space<vmem>>, %arg11: memref<16x1xf32, #tpu.memory_space<vmem>>) attributes {dimension_semantics = [#tpu.dimension_semantics<arbitrary>], iteration_bounds = array<i64: 1>, scalar_prefetch = 1 : i64, scratch_operands = 0 : i64, tpu.core_type = #tpu.core_type<tc>, window_params = [{pipeline_mode = #tpu.pipeline_mode<synchronous>, transform_indices = @transform_0, window_bounds = array<i64: 16, 128>}, {pipeline_mode = #tpu.pipeline_mode<synchronous>, transform_indices = @transform_1, window_bounds = array<i64: 16, 1>}, {pipeline_mode = #tpu.pipeline_mode<synchronous>, transform_indices = @transform_2, window_bounds = array<i64: 128, 64>}, {pipeline_mode = #tpu.pipeline_mode<synchronous>, transform_indices = @transform_3, window_bounds = array<i64: 1, 64>}, {pipeline_mode = #tpu.pipeline_mode<synchronous>, transform_indices = @transform_4, window_bounds = array<i64: 1, 64>}, {pipeline_mode = #tpu.pipeline_mode<synchronous>, transform_indices = @transform_5, window_bounds = array<i64: 64, 128>}, {pipeline_mode = #tpu.pipeline_mode<synchronous>, transform_indices = @transform_6, window_bounds = array<i64: 1, 128>}, {pipeline_mode = #tpu.pipeline_mode<synchronous>, transform_indices = @transform_7, window_bounds = array<i64: 1, 64>}, {pipeline_mode = #tpu.pipeline_mode<synchronous>, transform_indices = @transform_8, window_bounds = array<i64: 16, 128>}, {pipeline_mode = #tpu.pipeline_mode<synchronous>, transform_indices = @transform_9, window_bounds = array<i64: 16, 1>}]} {
    %c0 = arith.constant 0 : index
    %0 = memref.load %arg1[%c0] : memref<2xf32, #tpu.memory_space<smem>>
    %c1 = arith.constant 1 : index
    %1 = memref.load %arg1[%c1] : memref<2xf32, #tpu.memory_space<smem>>
    %2 = arith.subf %1, %0 : f32
    %cst = arith.constant 8.000000e+00 : f32
    %3 = arith.divf %2, %cst : f32
    %c0_0 = arith.constant 0 : index
    %c0_1 = arith.constant 0 : index
    %4 = vector.load %arg4[%c0_0, %c0_1] : memref<128x64xbf16, #tpu.memory_space<vmem>>, vector<128x64xbf16>
    %c0_2 = arith.constant 0 : index
    %c0_3 = arith.constant 0 : index
    %5 = vector.load %arg7[%c0_2, %c0_3] : memref<64x128xbf16, #tpu.memory_space<vmem>>, vector<64x128xbf16>
    %c0_4 = arith.constant 0 : index
    %c0_5 = arith.constant 0 : index
    %6 = vector.load %arg5[%c0_4, %c0_5] : memref<1x64xf32, #tpu.memory_space<vmem>>, vector<1x64xf32>
    %c0_6 = arith.constant 0 : index
    %c0_7 = arith.constant 0 : index
    %7 = vector.load %arg6[%c0_6, %c0_7] : memref<1x64xf32, #tpu.memory_space<vmem>>, vector<1x64xf32>
    %c0_8 = arith.constant 0 : index
    %c0_9 = arith.constant 0 : index
    %8 = vector.load %arg8[%c0_8, %c0_9] : memref<1x128xf32, #tpu.memory_space<vmem>>, vector<1x128xf32>
    %9 = vector.shape_cast %8 : vector<1x128xf32> to vector<1x128xf32>
    %10 = vector.broadcast %9 : vector<1x128xf32> to vector<16x128xf32>
    %c0_10 = arith.constant 0 : index
    %c0_11 = arith.constant 0 : index
    %11 = vector.load %arg9[%c0_10, %c0_11] : memref<1x64xf32, #tpu.memory_space<vmem>>, vector<1x64xf32>
    %12 = vector.shape_cast %11 : vector<1x64xf32> to vector<1x64xf32>
    %13 = vector.broadcast %12 : vector<1x64xf32> to vector<16x64xf32>
    %c0_12 = arith.constant 0 : index
    %c0_13 = arith.constant 0 : index
    %14 = vector.load %arg2[%c0_12, %c0_13] : memref<16x128xf32, #tpu.memory_space<vmem>>, vector<16x128xf32>
    %c0_14 = arith.constant 0 : index
    %c0_15 = arith.constant 0 : index
    %15 = vector.load %arg3[%c0_14, %c0_15] : memref<16x1xf32, #tpu.memory_space<vmem>>, vector<16x1xf32>
    %c0_i32 = arith.constant 0 : i32
    %16 = arith.sitofp %c0_i32 : i32 to f32
    %17 = arith.mulf %3, %16 : f32
    %18 = arith.addf %0, %17 : f32
    %19 = vector.broadcast %18 : f32 to vector<1x64xf32>
    %20 = arith.mulf %19, %7 : vector<1x64xf32>
    %21 = arith.addf %6, %20 : vector<1x64xf32>
    %22 = vector.shape_cast %21 : vector<1x64xf32> to vector<1x64xf32>
    %23 = vector.broadcast %22 : vector<1x64xf32> to vector<16x64xf32>
    %cst_16 = arith.constant 5.000000e-01 : f32
    %24 = arith.mulf %cst_16, %3 : f32
    %25 = arith.addf %18, %24 : f32
    %26 = vector.broadcast %25 : f32 to vector<1x64xf32>
    %27 = arith.mulf %26, %7 : vector<1x64xf32>
    %28 = arith.addf %6, %27 : vector<1x64xf32>
    %29 = vector.shape_cast %28 : vector<1x64xf32> to vector<1x64xf32>
    %30 = vector.broadcast %29 : vector<1x64xf32> to vector<16x64xf32>
    %31 = arith.addf %18, %3 : f32
    %32 = vector.broadcast %31 : f32 to vector<1x64xf32>
    %33 = arith.mulf %32, %7 : vector<1x64xf32>
    %34 = arith.addf %6, %33 : vector<1x64xf32>
    %35 = vector.shape_cast %34 : vector<1x64xf32> to vector<1x64xf32>
    %36 = vector.broadcast %35 : vector<1x64xf32> to vector<16x64xf32>
    %37 = arith.truncf %14 : vector<16x128xf32> to vector<16x128xbf16>
    %cst_17 = arith.constant dense<0.000000e+00> : vector<16x64xf32>
    %38 = tpu.matmul %37, %4, %cst_17 {dimension_numbers = #tpu.dot_dimension_numbers<[1], [0], [0], [1], [0, 0, 1, 1], [], []>} : vector<16x128xbf16>, vector<128x64xbf16>, vector<16x64xf32> -> vector<16x64xf32>
    %39 = arith.addf %38, %23 : vector<16x64xf32>
    %40 = math.tanh %39 : vector<16x64xf32>
    %41 = arith.truncf %40 : vector<16x64xf32> to vector<16x64xbf16>
    %cst_18 = arith.constant dense<0.000000e+00> : vector<16x128xf32>
    %42 = tpu.matmul %41, %5, %cst_18 {dimension_numbers = #tpu.dot_dimension_numbers<[1], [0], [0], [1], [0, 0, 1, 1], [], []>} : vector<16x64xbf16>, vector<64x128xbf16>, vector<16x128xf32> -> vector<16x128xf32>
    %43 = arith.addf %42, %10 : vector<16x128xf32>
    %44 = arith.mulf %40, %40 : vector<16x64xf32>
    %cst_19 = arith.constant 1.000000e+00 : f32
    %45 = vector.broadcast %cst_19 : f32 to vector<16x64xf32>
    %46 = arith.subf %45, %44 : vector<16x64xf32>
    %47 = arith.mulf %46, %13 : vector<16x64xf32>
    %cst_20 = arith.constant dense<0.000000e+00> : vector<16xf32>
    %48 = vector.multi_reduction <add>, %47, %cst_20 [1] : vector<16x64xf32> to vector<16xf32>
    %49 = vector.shape_cast %48 : vector<16xf32> to vector<16x1xf32>
    %cst_21 = arith.constant 0.000000e+00 : f32
    %50 = vector.broadcast %cst_21 : f32 to vector<16x1xf32>
    %51 = arith.subf %50, %49 : vector<16x1xf32>
    %cst_22 = arith.constant 5.000000e-01 : f32
    %52 = arith.mulf %cst_22, %3 : f32
    %53 = vector.broadcast %52 : f32 to vector<16x128xf32>
    %54 = arith.mulf %53, %43 : vector<16x128xf32>
    %55 = arith.addf %14, %54 : vector<16x128xf32>
    %56 = arith.truncf %55 : vector<16x128xf32> to vector<16x128xbf16>
    %cst_23 = arith.constant dense<0.000000e+00> : vector<16x64xf32>
    %57 = tpu.matmul %56, %4, %cst_23 {dimension_numbers = #tpu.dot_dimension_numbers<[1], [0], [0], [1], [0, 0, 1, 1], [], []>} : vector<16x128xbf16>, vector<128x64xbf16>, vector<16x64xf32> -> vector<16x64xf32>
    %58 = arith.addf %57, %30 : vector<16x64xf32>
    %59 = math.tanh %58 : vector<16x64xf32>
    %60 = arith.truncf %59 : vector<16x64xf32> to vector<16x64xbf16>
    %cst_24 = arith.constant dense<0.000000e+00> : vector<16x128xf32>
    %61 = tpu.matmul %60, %5, %cst_24 {dimension_numbers = #tpu.dot_dimension_numbers<[1], [0], [0], [1], [0, 0, 1, 1], [], []>} : vector<16x64xbf16>, vector<64x128xbf16>, vector<16x128xf32> -> vector<16x128xf32>
    %62 = arith.addf %61, %10 : vector<16x128xf32>
    %63 = arith.mulf %59, %59 : vector<16x64xf32>
    %cst_25 = arith.constant 1.000000e+00 : f32
    %64 = vector.broadcast %cst_25 : f32 to vector<16x64xf32>
    %65 = arith.subf %64, %63 : vector<16x64xf32>
    %66 = arith.mulf %65, %13 : vector<16x64xf32>
    %cst_26 = arith.constant dense<0.000000e+00> : vector<16xf32>
    %67 = vector.multi_reduction <add>, %66, %cst_26 [1] : vector<16x64xf32> to vector<16xf32>
    %68 = vector.shape_cast %67 : vector<16xf32> to vector<16x1xf32>
    %cst_27 = arith.constant 0.000000e+00 : f32
    %69 = vector.broadcast %cst_27 : f32 to vector<16x1xf32>
    %70 = arith.subf %69, %68 : vector<16x1xf32>
    %cst_28 = arith.constant 5.000000e-01 : f32
    %71 = arith.mulf %cst_28, %3 : f32
    %72 = vector.broadcast %71 : f32 to vector<16x128xf32>
    %73 = arith.mulf %72, %62 : vector<16x128xf32>
    %74 = arith.addf %14, %73 : vector<16x128xf32>
    %75 = arith.truncf %74 : vector<16x128xf32> to vector<16x128xbf16>
    %cst_29 = arith.constant dense<0.000000e+00> : vector<16x64xf32>
    %76 = tpu.matmul %75, %4, %cst_29 {dimension_numbers = #tpu.dot_dimension_numbers<[1], [0], [0], [1], [0, 0, 1, 1], [], []>} : vector<16x128xbf16>, vector<128x64xbf16>, vector<16x64xf32> -> vector<16x64xf32>
    %77 = arith.addf %76, %30 : vector<16x64xf32>
    %78 = math.tanh %77 : vector<16x64xf32>
    %79 = arith.truncf %78 : vector<16x64xf32> to vector<16x64xbf16>
    %cst_30 = arith.constant dense<0.000000e+00> : vector<16x128xf32>
    %80 = tpu.matmul %79, %5, %cst_30 {dimension_numbers = #tpu.dot_dimension_numbers<[1], [0], [0], [1], [0, 0, 1, 1], [], []>} : vector<16x64xbf16>, vector<64x128xbf16>, vector<16x128xf32> -> vector<16x128xf32>
    %81 = arith.addf %80, %10 : vector<16x128xf32>
    %82 = arith.mulf %78, %78 : vector<16x64xf32>
    %cst_31 = arith.constant 1.000000e+00 : f32
    %83 = vector.broadcast %cst_31 : f32 to vector<16x64xf32>
    %84 = arith.subf %83, %82 : vector<16x64xf32>
    %85 = arith.mulf %84, %13 : vector<16x64xf32>
    %cst_32 = arith.constant dense<0.000000e+00> : vector<16xf32>
    %86 = vector.multi_reduction <add>, %85, %cst_32 [1] : vector<16x64xf32> to vector<16xf32>
    %87 = vector.shape_cast %86 : vector<16xf32> to vector<16x1xf32>
    %cst_33 = arith.constant 0.000000e+00 : f32
    %88 = vector.broadcast %cst_33 : f32 to vector<16x1xf32>
    %89 = arith.subf %88, %87 : vector<16x1xf32>
    %90 = vector.broadcast %3 : f32 to vector<16x128xf32>
    %91 = arith.mulf %90, %81 : vector<16x128xf32>
    %92 = arith.addf %14, %91 : vector<16x128xf32>
    %93 = arith.truncf %92 : vector<16x128xf32> to vector<16x128xbf16>
    %cst_34 = arith.constant dense<0.000000e+00> : vector<16x64xf32>
    %94 = tpu.matmul %93, %4, %cst_34 {dimension_numbers = #tpu.dot_dimension_numbers<[1], [0], [0], [1], [0, 0, 1, 1], [], []>} : vector<16x128xbf16>, vector<128x64xbf16>, vector<16x64xf32> -> vector<16x64xf32>
    %95 = arith.addf %94, %36 : vector<16x64xf32>
    %96 = math.tanh %95 : vector<16x64xf32>
    %97 = arith.truncf %96 : vector<16x64xf32> to vector<16x64xbf16>
    %cst_35 = arith.constant dense<0.000000e+00> : vector<16x128xf32>
    %98 = tpu.matmul %97, %5, %cst_35 {dimension_numbers = #tpu.dot_dimension_numbers<[1], [0], [0], [1], [0, 0, 1, 1], [], []>} : vector<16x64xbf16>, vector<64x128xbf16>, vector<16x128xf32> -> vector<16x128xf32>
    %99 = arith.addf %98, %10 : vector<16x128xf32>
    %100 = arith.mulf %96, %96 : vector<16x64xf32>
    %cst_36 = arith.constant 1.000000e+00 : f32
    %101 = vector.broadcast %cst_36 : f32 to vector<16x64xf32>
    %102 = arith.subf %101, %100 : vector<16x64xf32>
    %103 = arith.mulf %102, %13 : vector<16x64xf32>
    %cst_37 = arith.constant dense<0.000000e+00> : vector<16xf32>
    %104 = vector.multi_reduction <add>, %103, %cst_37 [1] : vector<16x64xf32> to vector<16xf32>
    %105 = vector.shape_cast %104 : vector<16xf32> to vector<16x1xf32>
    %cst_38 = arith.constant 0.000000e+00 : f32
    %106 = vector.broadcast %cst_38 : f32 to vector<16x1xf32>
    %107 = arith.subf %106, %105 : vector<16x1xf32>
    %cst_39 = arith.constant 6.000000e+00 : f32
    %108 = arith.divf %3, %cst_39 : f32
    %cst_40 = arith.constant 2.000000e+00 : f32
    %109 = vector.broadcast %cst_40 : f32 to vector<16x128xf32>
    %110 = arith.mulf %109, %62 : vector<16x128xf32>
    %111 = arith.addf %43, %110 : vector<16x128xf32>
    %cst_41 = arith.constant 2.000000e+00 : f32
    %112 = vector.broadcast %cst_41 : f32 to vector<16x128xf32>
    %113 = arith.mulf %112, %81 : vector<16x128xf32>
    %114 = arith.addf %111, %113 : vector<16x128xf32>
    %115 = arith.addf %114, %99 : vector<16x128xf32>
    %116 = vector.broadcast %108 : f32 to vector<16x128xf32>
    %117 = arith.mulf %116, %115 : vector<16x128xf32>
    %118 = arith.addf %14, %117 : vector<16x128xf32>
    %cst_42 = arith.constant 6.000000e+00 : f32
    %119 = arith.divf %3, %cst_42 : f32
    %cst_43 = arith.constant 2.000000e+00 : f32
    %120 = vector.broadcast %cst_43 : f32 to vector<16x1xf32>
    %121 = arith.mulf %120, %70 : vector<16x1xf32>
    %122 = arith.addf %51, %121 : vector<16x1xf32>
    %cst_44 = arith.constant 2.000000e+00 : f32
    %123 = vector.broadcast %cst_44 : f32 to vector<16x1xf32>
    %124 = arith.mulf %123, %89 : vector<16x1xf32>
    %125 = arith.addf %122, %124 : vector<16x1xf32>
    %126 = arith.addf %125, %107 : vector<16x1xf32>
    %127 = vector.broadcast %119 : f32 to vector<16x1xf32>
    %128 = arith.mulf %127, %126 : vector<16x1xf32>
    %129 = arith.addf %15, %128 : vector<16x1xf32>
    %c1_i32 = arith.constant 1 : i32
    %130 = arith.sitofp %c1_i32 : i32 to f32
    %131 = arith.mulf %3, %130 : f32
    %132 = arith.addf %0, %131 : f32
    %133 = vector.broadcast %132 : f32 to vector<1x64xf32>
    %134 = arith.mulf %133, %7 : vector<1x64xf32>
    %135 = arith.addf %6, %134 : vector<1x64xf32>
    %136 = vector.shape_cast %135 : vector<1x64xf32> to vector<1x64xf32>
    %137 = vector.broadcast %136 : vector<1x64xf32> to vector<16x64xf32>
    %cst_45 = arith.constant 5.000000e-01 : f32
    %138 = arith.mulf %cst_45, %3 : f32
    %139 = arith.addf %132, %138 : f32
    %140 = vector.broadcast %139 : f32 to vector<1x64xf32>
    %141 = arith.mulf %140, %7 : vector<1x64xf32>
    %142 = arith.addf %6, %141 : vector<1x64xf32>
    %143 = vector.shape_cast %142 : vector<1x64xf32> to vector<1x64xf32>
    %144 = vector.broadcast %143 : vector<1x64xf32> to vector<16x64xf32>
    %145 = arith.addf %132, %3 : f32
    %146 = vector.broadcast %145 : f32 to vector<1x64xf32>
    %147 = arith.mulf %146, %7 : vector<1x64xf32>
    %148 = arith.addf %6, %147 : vector<1x64xf32>
    %149 = vector.shape_cast %148 : vector<1x64xf32> to vector<1x64xf32>
    %150 = vector.broadcast %149 : vector<1x64xf32> to vector<16x64xf32>
    %151 = arith.truncf %118 : vector<16x128xf32> to vector<16x128xbf16>
    %cst_46 = arith.constant dense<0.000000e+00> : vector<16x64xf32>
    %152 = tpu.matmul %151, %4, %cst_46 {dimension_numbers = #tpu.dot_dimension_numbers<[1], [0], [0], [1], [0, 0, 1, 1], [], []>} : vector<16x128xbf16>, vector<128x64xbf16>, vector<16x64xf32> -> vector<16x64xf32>
    %153 = arith.addf %152, %137 : vector<16x64xf32>
    %154 = math.tanh %153 : vector<16x64xf32>
    %155 = arith.truncf %154 : vector<16x64xf32> to vector<16x64xbf16>
    %cst_47 = arith.constant dense<0.000000e+00> : vector<16x128xf32>
    %156 = tpu.matmul %155, %5, %cst_47 {dimension_numbers = #tpu.dot_dimension_numbers<[1], [0], [0], [1], [0, 0, 1, 1], [], []>} : vector<16x64xbf16>, vector<64x128xbf16>, vector<16x128xf32> -> vector<16x128xf32>
    %157 = arith.addf %156, %10 : vector<16x128xf32>
    %158 = arith.mulf %154, %154 : vector<16x64xf32>
    %cst_48 = arith.constant 1.000000e+00 : f32
    %159 = vector.broadcast %cst_48 : f32 to vector<16x64xf32>
    %160 = arith.subf %159, %158 : vector<16x64xf32>
    %161 = arith.mulf %160, %13 : vector<16x64xf32>
    %cst_49 = arith.constant dense<0.000000e+00> : vector<16xf32>
    %162 = vector.multi_reduction <add>, %161, %cst_49 [1] : vector<16x64xf32> to vector<16xf32>
    %163 = vector.shape_cast %162 : vector<16xf32> to vector<16x1xf32>
    %cst_50 = arith.constant 0.000000e+00 : f32
    %164 = vector.broadcast %cst_50 : f32 to vector<16x1xf32>
    %165 = arith.subf %164, %163 : vector<16x1xf32>
    %cst_51 = arith.constant 5.000000e-01 : f32
    %166 = arith.mulf %cst_51, %3 : f32
    %167 = vector.broadcast %166 : f32 to vector<16x128xf32>
    %168 = arith.mulf %167, %157 : vector<16x128xf32>
    %169 = arith.addf %118, %168 : vector<16x128xf32>
    %170 = arith.truncf %169 : vector<16x128xf32> to vector<16x128xbf16>
    %cst_52 = arith.constant dense<0.000000e+00> : vector<16x64xf32>
    %171 = tpu.matmul %170, %4, %cst_52 {dimension_numbers = #tpu.dot_dimension_numbers<[1], [0], [0], [1], [0, 0, 1, 1], [], []>} : vector<16x128xbf16>, vector<128x64xbf16>, vector<16x64xf32> -> vector<16x64xf32>
    %172 = arith.addf %171, %144 : vector<16x64xf32>
    %173 = math.tanh %172 : vector<16x64xf32>
    %174 = arith.truncf %173 : vector<16x64xf32> to vector<16x64xbf16>
    %cst_53 = arith.constant dense<0.000000e+00> : vector<16x128xf32>
    %175 = tpu.matmul %174, %5, %cst_53 {dimension_numbers = #tpu.dot_dimension_numbers<[1], [0], [0], [1], [0, 0, 1, 1], [], []>} : vector<16x64xbf16>, vector<64x128xbf16>, vector<16x128xf32> -> vector<16x128xf32>
    %176 = arith.addf %175, %10 : vector<16x128xf32>
    %177 = arith.mulf %173, %173 : vector<16x64xf32>
    %cst_54 = arith.constant 1.000000e+00 : f32
    %178 = vector.broadcast %cst_54 : f32 to vector<16x64xf32>
    %179 = arith.subf %178, %177 : vector<16x64xf32>
    %180 = arith.mulf %179, %13 : vector<16x64xf32>
    %cst_55 = arith.constant dense<0.000000e+00> : vector<16xf32>
    %181 = vector.multi_reduction <add>, %180, %cst_55 [1] : vector<16x64xf32> to vector<16xf32>
    %182 = vector.shape_cast %181 : vector<16xf32> to vector<16x1xf32>
    %cst_56 = arith.constant 0.000000e+00 : f32
    %183 = vector.broadcast %cst_56 : f32 to vector<16x1xf32>
    %184 = arith.subf %183, %182 : vector<16x1xf32>
    %cst_57 = arith.constant 5.000000e-01 : f32
    %185 = arith.mulf %cst_57, %3 : f32
    %186 = vector.broadcast %185 : f32 to vector<16x128xf32>
    %187 = arith.mulf %186, %176 : vector<16x128xf32>
    %188 = arith.addf %118, %187 : vector<16x128xf32>
    %189 = arith.truncf %188 : vector<16x128xf32> to vector<16x128xbf16>
    %cst_58 = arith.constant dense<0.000000e+00> : vector<16x64xf32>
    %190 = tpu.matmul %189, %4, %cst_58 {dimension_numbers = #tpu.dot_dimension_numbers<[1], [0], [0], [1], [0, 0, 1, 1], [], []>} : vector<16x128xbf16>, vector<128x64xbf16>, vector<16x64xf32> -> vector<16x64xf32>
    %191 = arith.addf %190, %144 : vector<16x64xf32>
    %192 = math.tanh %191 : vector<16x64xf32>
    %193 = arith.truncf %192 : vector<16x64xf32> to vector<16x64xbf16>
    %cst_59 = arith.constant dense<0.000000e+00> : vector<16x128xf32>
    %194 = tpu.matmul %193, %5, %cst_59 {dimension_numbers = #tpu.dot_dimension_numbers<[1], [0], [0], [1], [0, 0, 1, 1], [], []>} : vector<16x64xbf16>, vector<64x128xbf16>, vector<16x128xf32> -> vector<16x128xf32>
    %195 = arith.addf %194, %10 : vector<16x128xf32>
    %196 = arith.mulf %192, %192 : vector<16x64xf32>
    %cst_60 = arith.constant 1.000000e+00 : f32
    %197 = vector.broadcast %cst_60 : f32 to vector<16x64xf32>
    %198 = arith.subf %197, %196 : vector<16x64xf32>
    %199 = arith.mulf %198, %13 : vector<16x64xf32>
    %cst_61 = arith.constant dense<0.000000e+00> : vector<16xf32>
    %200 = vector.multi_reduction <add>, %199, %cst_61 [1] : vector<16x64xf32> to vector<16xf32>
    %201 = vector.shape_cast %200 : vector<16xf32> to vector<16x1xf32>
    %cst_62 = arith.constant 0.000000e+00 : f32
    %202 = vector.broadcast %cst_62 : f32 to vector<16x1xf32>
    %203 = arith.subf %202, %201 : vector<16x1xf32>
    %204 = vector.broadcast %3 : f32 to vector<16x128xf32>
    %205 = arith.mulf %204, %195 : vector<16x128xf32>
    %206 = arith.addf %118, %205 : vector<16x128xf32>
    %207 = arith.truncf %206 : vector<16x128xf32> to vector<16x128xbf16>
    %cst_63 = arith.constant dense<0.000000e+00> : vector<16x64xf32>
    %208 = tpu.matmul %207, %4, %cst_63 {dimension_numbers = #tpu.dot_dimension_numbers<[1], [0], [0], [1], [0, 0, 1, 1], [], []>} : vector<16x128xbf16>, vector<128x64xbf16>, vector<16x64xf32> -> vector<16x64xf32>
    %209 = arith.addf %208, %150 : vector<16x64xf32>
    %210 = math.tanh %209 : vector<16x64xf32>
    %211 = arith.truncf %210 : vector<16x64xf32> to vector<16x64xbf16>
    %cst_64 = arith.constant dense<0.000000e+00> : vector<16x128xf32>
    %212 = tpu.matmul %211, %5, %cst_64 {dimension_numbers = #tpu.dot_dimension_numbers<[1], [0], [0], [1], [0, 0, 1, 1], [], []>} : vector<16x64xbf16>, vector<64x128xbf16>, vector<16x128xf32> -> vector<16x128xf32>
    %213 = arith.addf %212, %10 : vector<16x128xf32>
    %214 = arith.mulf %210, %210 : vector<16x64xf32>
    %cst_65 = arith.constant 1.000000e+00 : f32
    %215 = vector.broadcast %cst_65 : f32 to vector<16x64xf32>
    %216 = arith.subf %215, %214 : vector<16x64xf32>
    %217 = arith.mulf %216, %13 : vector<16x64xf32>
    %cst_66 = arith.constant dense<0.000000e+00> : vector<16xf32>
    %218 = vector.multi_reduction <add>, %217, %cst_66 [1] : vector<16x64xf32> to vector<16xf32>
    %219 = vector.shape_cast %218 : vector<16xf32> to vector<16x1xf32>
    %cst_67 = arith.constant 0.000000e+00 : f32
    %220 = vector.broadcast %cst_67 : f32 to vector<16x1xf32>
    %221 = arith.subf %220, %219 : vector<16x1xf32>
    %cst_68 = arith.constant 6.000000e+00 : f32
    %222 = arith.divf %3, %cst_68 : f32
    %cst_69 = arith.constant 2.000000e+00 : f32
    %223 = vector.broadcast %cst_69 : f32 to vector<16x128xf32>
    %224 = arith.mulf %223, %176 : vector<16x128xf32>
    %225 = arith.addf %157, %224 : vector<16x128xf32>
    %cst_70 = arith.constant 2.000000e+00 : f32
    %226 = vector.broadcast %cst_70 : f32 to vector<16x128xf32>
    %227 = arith.mulf %226, %195 : vector<16x128xf32>
    %228 = arith.addf %225, %227 : vector<16x128xf32>
    %229 = arith.addf %228, %213 : vector<16x128xf32>
    %230 = vector.broadcast %222 : f32 to vector<16x128xf32>
    %231 = arith.mulf %230, %229 : vector<16x128xf32>
    %232 = arith.addf %118, %231 : vector<16x128xf32>
    %cst_71 = arith.constant 6.000000e+00 : f32
    %233 = arith.divf %3, %cst_71 : f32
    %cst_72 = arith.constant 2.000000e+00 : f32
    %234 = vector.broadcast %cst_72 : f32 to vector<16x1xf32>
    %235 = arith.mulf %234, %184 : vector<16x1xf32>
    %236 = arith.addf %165, %235 : vector<16x1xf32>
    %cst_73 = arith.constant 2.000000e+00 : f32
    %237 = vector.broadcast %cst_73 : f32 to vector<16x1xf32>
    %238 = arith.mulf %237, %203 : vector<16x1xf32>
    %239 = arith.addf %236, %238 : vector<16x1xf32>
    %240 = arith.addf %239, %221 : vector<16x1xf32>
    %241 = vector.broadcast %233 : f32 to vector<16x1xf32>
    %242 = arith.mulf %241, %240 : vector<16x1xf32>
    %243 = arith.addf %129, %242 : vector<16x1xf32>
    %c2_i32 = arith.constant 2 : i32
    %244 = arith.sitofp %c2_i32 : i32 to f32
    %245 = arith.mulf %3, %244 : f32
    %246 = arith.addf %0, %245 : f32
    %247 = vector.broadcast %246 : f32 to vector<1x64xf32>
    %248 = arith.mulf %247, %7 : vector<1x64xf32>
    %249 = arith.addf %6, %248 : vector<1x64xf32>
    %250 = vector.shape_cast %249 : vector<1x64xf32> to vector<1x64xf32>
    %251 = vector.broadcast %250 : vector<1x64xf32> to vector<16x64xf32>
    %cst_74 = arith.constant 5.000000e-01 : f32
    %252 = arith.mulf %cst_74, %3 : f32
    %253 = arith.addf %246, %252 : f32
    %254 = vector.broadcast %253 : f32 to vector<1x64xf32>
    %255 = arith.mulf %254, %7 : vector<1x64xf32>
    %256 = arith.addf %6, %255 : vector<1x64xf32>
    %257 = vector.shape_cast %256 : vector<1x64xf32> to vector<1x64xf32>
    %258 = vector.broadcast %257 : vector<1x64xf32> to vector<16x64xf32>
    %259 = arith.addf %246, %3 : f32
    %260 = vector.broadcast %259 : f32 to vector<1x64xf32>
    %261 = arith.mulf %260, %7 : vector<1x64xf32>
    %262 = arith.addf %6, %261 : vector<1x64xf32>
    %263 = vector.shape_cast %262 : vector<1x64xf32> to vector<1x64xf32>
    %264 = vector.broadcast %263 : vector<1x64xf32> to vector<16x64xf32>
    %265 = arith.truncf %232 : vector<16x128xf32> to vector<16x128xbf16>
    %cst_75 = arith.constant dense<0.000000e+00> : vector<16x64xf32>
    %266 = tpu.matmul %265, %4, %cst_75 {dimension_numbers = #tpu.dot_dimension_numbers<[1], [0], [0], [1], [0, 0, 1, 1], [], []>} : vector<16x128xbf16>, vector<128x64xbf16>, vector<16x64xf32> -> vector<16x64xf32>
    %267 = arith.addf %266, %251 : vector<16x64xf32>
    %268 = math.tanh %267 : vector<16x64xf32>
    %269 = arith.truncf %268 : vector<16x64xf32> to vector<16x64xbf16>
    %cst_76 = arith.constant dense<0.000000e+00> : vector<16x128xf32>
    %270 = tpu.matmul %269, %5, %cst_76 {dimension_numbers = #tpu.dot_dimension_numbers<[1], [0], [0], [1], [0, 0, 1, 1], [], []>} : vector<16x64xbf16>, vector<64x128xbf16>, vector<16x128xf32> -> vector<16x128xf32>
    %271 = arith.addf %270, %10 : vector<16x128xf32>
    %272 = arith.mulf %268, %268 : vector<16x64xf32>
    %cst_77 = arith.constant 1.000000e+00 : f32
    %273 = vector.broadcast %cst_77 : f32 to vector<16x64xf32>
    %274 = arith.subf %273, %272 : vector<16x64xf32>
    %275 = arith.mulf %274, %13 : vector<16x64xf32>
    %cst_78 = arith.constant dense<0.000000e+00> : vector<16xf32>
    %276 = vector.multi_reduction <add>, %275, %cst_78 [1] : vector<16x64xf32> to vector<16xf32>
    %277 = vector.shape_cast %276 : vector<16xf32> to vector<16x1xf32>
    %cst_79 = arith.constant 0.000000e+00 : f32
    %278 = vector.broadcast %cst_79 : f32 to vector<16x1xf32>
    %279 = arith.subf %278, %277 : vector<16x1xf32>
    %cst_80 = arith.constant 5.000000e-01 : f32
    %280 = arith.mulf %cst_80, %3 : f32
    %281 = vector.broadcast %280 : f32 to vector<16x128xf32>
    %282 = arith.mulf %281, %271 : vector<16x128xf32>
    %283 = arith.addf %232, %282 : vector<16x128xf32>
    %284 = arith.truncf %283 : vector<16x128xf32> to vector<16x128xbf16>
    %cst_81 = arith.constant dense<0.000000e+00> : vector<16x64xf32>
    %285 = tpu.matmul %284, %4, %cst_81 {dimension_numbers = #tpu.dot_dimension_numbers<[1], [0], [0], [1], [0, 0, 1, 1], [], []>} : vector<16x128xbf16>, vector<128x64xbf16>, vector<16x64xf32> -> vector<16x64xf32>
    %286 = arith.addf %285, %258 : vector<16x64xf32>
    %287 = math.tanh %286 : vector<16x64xf32>
    %288 = arith.truncf %287 : vector<16x64xf32> to vector<16x64xbf16>
    %cst_82 = arith.constant dense<0.000000e+00> : vector<16x128xf32>
    %289 = tpu.matmul %288, %5, %cst_82 {dimension_numbers = #tpu.dot_dimension_numbers<[1], [0], [0], [1], [0, 0, 1, 1], [], []>} : vector<16x64xbf16>, vector<64x128xbf16>, vector<16x128xf32> -> vector<16x128xf32>
    %290 = arith.addf %289, %10 : vector<16x128xf32>
    %291 = arith.mulf %287, %287 : vector<16x64xf32>
    %cst_83 = arith.constant 1.000000e+00 : f32
    %292 = vector.broadcast %cst_83 : f32 to vector<16x64xf32>
    %293 = arith.subf %292, %291 : vector<16x64xf32>
    %294 = arith.mulf %293, %13 : vector<16x64xf32>
    %cst_84 = arith.constant dense<0.000000e+00> : vector<16xf32>
    %295 = vector.multi_reduction <add>, %294, %cst_84 [1] : vector<16x64xf32> to vector<16xf32>
    %296 = vector.shape_cast %295 : vector<16xf32> to vector<16x1xf32>
    %cst_85 = arith.constant 0.000000e+00 : f32
    %297 = vector.broadcast %cst_85 : f32 to vector<16x1xf32>
    %298 = arith.subf %297, %296 : vector<16x1xf32>
    %cst_86 = arith.constant 5.000000e-01 : f32
    %299 = arith.mulf %cst_86, %3 : f32
    %300 = vector.broadcast %299 : f32 to vector<16x128xf32>
    %301 = arith.mulf %300, %290 : vector<16x128xf32>
    %302 = arith.addf %232, %301 : vector<16x128xf32>
    %303 = arith.truncf %302 : vector<16x128xf32> to vector<16x128xbf16>
    %cst_87 = arith.constant dense<0.000000e+00> : vector<16x64xf32>
    %304 = tpu.matmul %303, %4, %cst_87 {dimension_numbers = #tpu.dot_dimension_numbers<[1], [0], [0], [1], [0, 0, 1, 1], [], []>} : vector<16x128xbf16>, vector<128x64xbf16>, vector<16x64xf32> -> vector<16x64xf32>
    %305 = arith.addf %304, %258 : vector<16x64xf32>
    %306 = math.tanh %305 : vector<16x64xf32>
    %307 = arith.truncf %306 : vector<16x64xf32> to vector<16x64xbf16>
    %cst_88 = arith.constant dense<0.000000e+00> : vector<16x128xf32>
    %308 = tpu.matmul %307, %5, %cst_88 {dimension_numbers = #tpu.dot_dimension_numbers<[1], [0], [0], [1], [0, 0, 1, 1], [], []>} : vector<16x64xbf16>, vector<64x128xbf16>, vector<16x128xf32> -> vector<16x128xf32>
    %309 = arith.addf %308, %10 : vector<16x128xf32>
    %310 = arith.mulf %306, %306 : vector<16x64xf32>
    %cst_89 = arith.constant 1.000000e+00 : f32
    %311 = vector.broadcast %cst_89 : f32 to vector<16x64xf32>
    %312 = arith.subf %311, %310 : vector<16x64xf32>
    %313 = arith.mulf %312, %13 : vector<16x64xf32>
    %cst_90 = arith.constant dense<0.000000e+00> : vector<16xf32>
    %314 = vector.multi_reduction <add>, %313, %cst_90 [1] : vector<16x64xf32> to vector<16xf32>
    %315 = vector.shape_cast %314 : vector<16xf32> to vector<16x1xf32>
    %cst_91 = arith.constant 0.000000e+00 : f32
    %316 = vector.broadcast %cst_91 : f32 to vector<16x1xf32>
    %317 = arith.subf %316, %315 : vector<16x1xf32>
    %318 = vector.broadcast %3 : f32 to vector<16x128xf32>
    %319 = arith.mulf %318, %309 : vector<16x128xf32>
    %320 = arith.addf %232, %319 : vector<16x128xf32>
    %321 = arith.truncf %320 : vector<16x128xf32> to vector<16x128xbf16>
    %cst_92 = arith.constant dense<0.000000e+00> : vector<16x64xf32>
    %322 = tpu.matmul %321, %4, %cst_92 {dimension_numbers = #tpu.dot_dimension_numbers<[1], [0], [0], [1], [0, 0, 1, 1], [], []>} : vector<16x128xbf16>, vector<128x64xbf16>, vector<16x64xf32> -> vector<16x64xf32>
    %323 = arith.addf %322, %264 : vector<16x64xf32>
    %324 = math.tanh %323 : vector<16x64xf32>
    %325 = arith.truncf %324 : vector<16x64xf32> to vector<16x64xbf16>
    %cst_93 = arith.constant dense<0.000000e+00> : vector<16x128xf32>
    %326 = tpu.matmul %325, %5, %cst_93 {dimension_numbers = #tpu.dot_dimension_numbers<[1], [0], [0], [1], [0, 0, 1, 1], [], []>} : vector<16x64xbf16>, vector<64x128xbf16>, vector<16x128xf32> -> vector<16x128xf32>
    %327 = arith.addf %326, %10 : vector<16x128xf32>
    %328 = arith.mulf %324, %324 : vector<16x64xf32>
    %cst_94 = arith.constant 1.000000e+00 : f32
    %329 = vector.broadcast %cst_94 : f32 to vector<16x64xf32>
    %330 = arith.subf %329, %328 : vector<16x64xf32>
    %331 = arith.mulf %330, %13 : vector<16x64xf32>
    %cst_95 = arith.constant dense<0.000000e+00> : vector<16xf32>
    %332 = vector.multi_reduction <add>, %331, %cst_95 [1] : vector<16x64xf32> to vector<16xf32>
    %333 = vector.shape_cast %332 : vector<16xf32> to vector<16x1xf32>
    %cst_96 = arith.constant 0.000000e+00 : f32
    %334 = vector.broadcast %cst_96 : f32 to vector<16x1xf32>
    %335 = arith.subf %334, %333 : vector<16x1xf32>
    %cst_97 = arith.constant 6.000000e+00 : f32
    %336 = arith.divf %3, %cst_97 : f32
    %cst_98 = arith.constant 2.000000e+00 : f32
    %337 = vector.broadcast %cst_98 : f32 to vector<16x128xf32>
    %338 = arith.mulf %337, %290 : vector<16x128xf32>
    %339 = arith.addf %271, %338 : vector<16x128xf32>
    %cst_99 = arith.constant 2.000000e+00 : f32
    %340 = vector.broadcast %cst_99 : f32 to vector<16x128xf32>
    %341 = arith.mulf %340, %309 : vector<16x128xf32>
    %342 = arith.addf %339, %341 : vector<16x128xf32>
    %343 = arith.addf %342, %327 : vector<16x128xf32>
    %344 = vector.broadcast %336 : f32 to vector<16x128xf32>
    %345 = arith.mulf %344, %343 : vector<16x128xf32>
    %346 = arith.addf %232, %345 : vector<16x128xf32>
    %cst_100 = arith.constant 6.000000e+00 : f32
    %347 = arith.divf %3, %cst_100 : f32
    %cst_101 = arith.constant 2.000000e+00 : f32
    %348 = vector.broadcast %cst_101 : f32 to vector<16x1xf32>
    %349 = arith.mulf %348, %298 : vector<16x1xf32>
    %350 = arith.addf %279, %349 : vector<16x1xf32>
    %cst_102 = arith.constant 2.000000e+00 : f32
    %351 = vector.broadcast %cst_102 : f32 to vector<16x1xf32>
    %352 = arith.mulf %351, %317 : vector<16x1xf32>
    %353 = arith.addf %350, %352 : vector<16x1xf32>
    %354 = arith.addf %353, %335 : vector<16x1xf32>
    %355 = vector.broadcast %347 : f32 to vector<16x1xf32>
    %356 = arith.mulf %355, %354 : vector<16x1xf32>
    %357 = arith.addf %243, %356 : vector<16x1xf32>
    %c3_i32 = arith.constant 3 : i32
    %358 = arith.sitofp %c3_i32 : i32 to f32
    %359 = arith.mulf %3, %358 : f32
    %360 = arith.addf %0, %359 : f32
    %361 = vector.broadcast %360 : f32 to vector<1x64xf32>
    %362 = arith.mulf %361, %7 : vector<1x64xf32>
    %363 = arith.addf %6, %362 : vector<1x64xf32>
    %364 = vector.shape_cast %363 : vector<1x64xf32> to vector<1x64xf32>
    %365 = vector.broadcast %364 : vector<1x64xf32> to vector<16x64xf32>
    %cst_103 = arith.constant 5.000000e-01 : f32
    %366 = arith.mulf %cst_103, %3 : f32
    %367 = arith.addf %360, %366 : f32
    %368 = vector.broadcast %367 : f32 to vector<1x64xf32>
    %369 = arith.mulf %368, %7 : vector<1x64xf32>
    %370 = arith.addf %6, %369 : vector<1x64xf32>
    %371 = vector.shape_cast %370 : vector<1x64xf32> to vector<1x64xf32>
    %372 = vector.broadcast %371 : vector<1x64xf32> to vector<16x64xf32>
    %373 = arith.addf %360, %3 : f32
    %374 = vector.broadcast %373 : f32 to vector<1x64xf32>
    %375 = arith.mulf %374, %7 : vector<1x64xf32>
    %376 = arith.addf %6, %375 : vector<1x64xf32>
    %377 = vector.shape_cast %376 : vector<1x64xf32> to vector<1x64xf32>
    %378 = vector.broadcast %377 : vector<1x64xf32> to vector<16x64xf32>
    %379 = arith.truncf %346 : vector<16x128xf32> to vector<16x128xbf16>
    %cst_104 = arith.constant dense<0.000000e+00> : vector<16x64xf32>
    %380 = tpu.matmul %379, %4, %cst_104 {dimension_numbers = #tpu.dot_dimension_numbers<[1], [0], [0], [1], [0, 0, 1, 1], [], []>} : vector<16x128xbf16>, vector<128x64xbf16>, vector<16x64xf32> -> vector<16x64xf32>
    %381 = arith.addf %380, %365 : vector<16x64xf32>
    %382 = math.tanh %381 : vector<16x64xf32>
    %383 = arith.truncf %382 : vector<16x64xf32> to vector<16x64xbf16>
    %cst_105 = arith.constant dense<0.000000e+00> : vector<16x128xf32>
    %384 = tpu.matmul %383, %5, %cst_105 {dimension_numbers = #tpu.dot_dimension_numbers<[1], [0], [0], [1], [0, 0, 1, 1], [], []>} : vector<16x64xbf16>, vector<64x128xbf16>, vector<16x128xf32> -> vector<16x128xf32>
    %385 = arith.addf %384, %10 : vector<16x128xf32>
    %386 = arith.mulf %382, %382 : vector<16x64xf32>
    %cst_106 = arith.constant 1.000000e+00 : f32
    %387 = vector.broadcast %cst_106 : f32 to vector<16x64xf32>
    %388 = arith.subf %387, %386 : vector<16x64xf32>
    %389 = arith.mulf %388, %13 : vector<16x64xf32>
    %cst_107 = arith.constant dense<0.000000e+00> : vector<16xf32>
    %390 = vector.multi_reduction <add>, %389, %cst_107 [1] : vector<16x64xf32> to vector<16xf32>
    %391 = vector.shape_cast %390 : vector<16xf32> to vector<16x1xf32>
    %cst_108 = arith.constant 0.000000e+00 : f32
    %392 = vector.broadcast %cst_108 : f32 to vector<16x1xf32>
    %393 = arith.subf %392, %391 : vector<16x1xf32>
    %cst_109 = arith.constant 5.000000e-01 : f32
    %394 = arith.mulf %cst_109, %3 : f32
    %395 = vector.broadcast %394 : f32 to vector<16x128xf32>
    %396 = arith.mulf %395, %385 : vector<16x128xf32>
    %397 = arith.addf %346, %396 : vector<16x128xf32>
    %398 = arith.truncf %397 : vector<16x128xf32> to vector<16x128xbf16>
    %cst_110 = arith.constant dense<0.000000e+00> : vector<16x64xf32>
    %399 = tpu.matmul %398, %4, %cst_110 {dimension_numbers = #tpu.dot_dimension_numbers<[1], [0], [0], [1], [0, 0, 1, 1], [], []>} : vector<16x128xbf16>, vector<128x64xbf16>, vector<16x64xf32> -> vector<16x64xf32>
    %400 = arith.addf %399, %372 : vector<16x64xf32>
    %401 = math.tanh %400 : vector<16x64xf32>
    %402 = arith.truncf %401 : vector<16x64xf32> to vector<16x64xbf16>
    %cst_111 = arith.constant dense<0.000000e+00> : vector<16x128xf32>
    %403 = tpu.matmul %402, %5, %cst_111 {dimension_numbers = #tpu.dot_dimension_numbers<[1], [0], [0], [1], [0, 0, 1, 1], [], []>} : vector<16x64xbf16>, vector<64x128xbf16>, vector<16x128xf32> -> vector<16x128xf32>
    %404 = arith.addf %403, %10 : vector<16x128xf32>
    %405 = arith.mulf %401, %401 : vector<16x64xf32>
    %cst_112 = arith.constant 1.000000e+00 : f32
    %406 = vector.broadcast %cst_112 : f32 to vector<16x64xf32>
    %407 = arith.subf %406, %405 : vector<16x64xf32>
    %408 = arith.mulf %407, %13 : vector<16x64xf32>
    %cst_113 = arith.constant dense<0.000000e+00> : vector<16xf32>
    %409 = vector.multi_reduction <add>, %408, %cst_113 [1] : vector<16x64xf32> to vector<16xf32>
    %410 = vector.shape_cast %409 : vector<16xf32> to vector<16x1xf32>
    %cst_114 = arith.constant 0.000000e+00 : f32
    %411 = vector.broadcast %cst_114 : f32 to vector<16x1xf32>
    %412 = arith.subf %411, %410 : vector<16x1xf32>
    %cst_115 = arith.constant 5.000000e-01 : f32
    %413 = arith.mulf %cst_115, %3 : f32
    %414 = vector.broadcast %413 : f32 to vector<16x128xf32>
    %415 = arith.mulf %414, %404 : vector<16x128xf32>
    %416 = arith.addf %346, %415 : vector<16x128xf32>
    %417 = arith.truncf %416 : vector<16x128xf32> to vector<16x128xbf16>
    %cst_116 = arith.constant dense<0.000000e+00> : vector<16x64xf32>
    %418 = tpu.matmul %417, %4, %cst_116 {dimension_numbers = #tpu.dot_dimension_numbers<[1], [0], [0], [1], [0, 0, 1, 1], [], []>} : vector<16x128xbf16>, vector<128x64xbf16>, vector<16x64xf32> -> vector<16x64xf32>
    %419 = arith.addf %418, %372 : vector<16x64xf32>
    %420 = math.tanh %419 : vector<16x64xf32>
    %421 = arith.truncf %420 : vector<16x64xf32> to vector<16x64xbf16>
    %cst_117 = arith.constant dense<0.000000e+00> : vector<16x128xf32>
    %422 = tpu.matmul %421, %5, %cst_117 {dimension_numbers = #tpu.dot_dimension_numbers<[1], [0], [0], [1], [0, 0, 1, 1], [], []>} : vector<16x64xbf16>, vector<64x128xbf16>, vector<16x128xf32> -> vector<16x128xf32>
    %423 = arith.addf %422, %10 : vector<16x128xf32>
    %424 = arith.mulf %420, %420 : vector<16x64xf32>
    %cst_118 = arith.constant 1.000000e+00 : f32
    %425 = vector.broadcast %cst_118 : f32 to vector<16x64xf32>
    %426 = arith.subf %425, %424 : vector<16x64xf32>
    %427 = arith.mulf %426, %13 : vector<16x64xf32>
    %cst_119 = arith.constant dense<0.000000e+00> : vector<16xf32>
    %428 = vector.multi_reduction <add>, %427, %cst_119 [1] : vector<16x64xf32> to vector<16xf32>
    %429 = vector.shape_cast %428 : vector<16xf32> to vector<16x1xf32>
    %cst_120 = arith.constant 0.000000e+00 : f32
    %430 = vector.broadcast %cst_120 : f32 to vector<16x1xf32>
    %431 = arith.subf %430, %429 : vector<16x1xf32>
    %432 = vector.broadcast %3 : f32 to vector<16x128xf32>
    %433 = arith.mulf %432, %423 : vector<16x128xf32>
    %434 = arith.addf %346, %433 : vector<16x128xf32>
    %435 = arith.truncf %434 : vector<16x128xf32> to vector<16x128xbf16>
    %cst_121 = arith.constant dense<0.000000e+00> : vector<16x64xf32>
    %436 = tpu.matmul %435, %4, %cst_121 {dimension_numbers = #tpu.dot_dimension_numbers<[1], [0], [0], [1], [0, 0, 1, 1], [], []>} : vector<16x128xbf16>, vector<128x64xbf16>, vector<16x64xf32> -> vector<16x64xf32>
    %437 = arith.addf %436, %378 : vector<16x64xf32>
    %438 = math.tanh %437 : vector<16x64xf32>
    %439 = arith.truncf %438 : vector<16x64xf32> to vector<16x64xbf16>
    %cst_122 = arith.constant dense<0.000000e+00> : vector<16x128xf32>
    %440 = tpu.matmul %439, %5, %cst_122 {dimension_numbers = #tpu.dot_dimension_numbers<[1], [0], [0], [1], [0, 0, 1, 1], [], []>} : vector<16x64xbf16>, vector<64x128xbf16>, vector<16x128xf32> -> vector<16x128xf32>
    %441 = arith.addf %440, %10 : vector<16x128xf32>
    %442 = arith.mulf %438, %438 : vector<16x64xf32>
    %cst_123 = arith.constant 1.000000e+00 : f32
    %443 = vector.broadcast %cst_123 : f32 to vector<16x64xf32>
    %444 = arith.subf %443, %442 : vector<16x64xf32>
    %445 = arith.mulf %444, %13 : vector<16x64xf32>
    %cst_124 = arith.constant dense<0.000000e+00> : vector<16xf32>
    %446 = vector.multi_reduction <add>, %445, %cst_124 [1] : vector<16x64xf32> to vector<16xf32>
    %447 = vector.shape_cast %446 : vector<16xf32> to vector<16x1xf32>
    %cst_125 = arith.constant 0.000000e+00 : f32
    %448 = vector.broadcast %cst_125 : f32 to vector<16x1xf32>
    %449 = arith.subf %448, %447 : vector<16x1xf32>
    %cst_126 = arith.constant 6.000000e+00 : f32
    %450 = arith.divf %3, %cst_126 : f32
    %cst_127 = arith.constant 2.000000e+00 : f32
    %451 = vector.broadcast %cst_127 : f32 to vector<16x128xf32>
    %452 = arith.mulf %451, %404 : vector<16x128xf32>
    %453 = arith.addf %385, %452 : vector<16x128xf32>
    %cst_128 = arith.constant 2.000000e+00 : f32
    %454 = vector.broadcast %cst_128 : f32 to vector<16x128xf32>
    %455 = arith.mulf %454, %423 : vector<16x128xf32>
    %456 = arith.addf %453, %455 : vector<16x128xf32>
    %457 = arith.addf %456, %441 : vector<16x128xf32>
    %458 = vector.broadcast %450 : f32 to vector<16x128xf32>
    %459 = arith.mulf %458, %457 : vector<16x128xf32>
    %460 = arith.addf %346, %459 : vector<16x128xf32>
    %cst_129 = arith.constant 6.000000e+00 : f32
    %461 = arith.divf %3, %cst_129 : f32
    %cst_130 = arith.constant 2.000000e+00 : f32
    %462 = vector.broadcast %cst_130 : f32 to vector<16x1xf32>
    %463 = arith.mulf %462, %412 : vector<16x1xf32>
    %464 = arith.addf %393, %463 : vector<16x1xf32>
    %cst_131 = arith.constant 2.000000e+00 : f32
    %465 = vector.broadcast %cst_131 : f32 to vector<16x1xf32>
    %466 = arith.mulf %465, %431 : vector<16x1xf32>
    %467 = arith.addf %464, %466 : vector<16x1xf32>
    %468 = arith.addf %467, %449 : vector<16x1xf32>
    %469 = vector.broadcast %461 : f32 to vector<16x1xf32>
    %470 = arith.mulf %469, %468 : vector<16x1xf32>
    %471 = arith.addf %357, %470 : vector<16x1xf32>
    %c4_i32 = arith.constant 4 : i32
    %472 = arith.sitofp %c4_i32 : i32 to f32
    %473 = arith.mulf %3, %472 : f32
    %474 = arith.addf %0, %473 : f32
    %475 = vector.broadcast %474 : f32 to vector<1x64xf32>
    %476 = arith.mulf %475, %7 : vector<1x64xf32>
    %477 = arith.addf %6, %476 : vector<1x64xf32>
    %478 = vector.shape_cast %477 : vector<1x64xf32> to vector<1x64xf32>
    %479 = vector.broadcast %478 : vector<1x64xf32> to vector<16x64xf32>
    %cst_132 = arith.constant 5.000000e-01 : f32
    %480 = arith.mulf %cst_132, %3 : f32
    %481 = arith.addf %474, %480 : f32
    %482 = vector.broadcast %481 : f32 to vector<1x64xf32>
    %483 = arith.mulf %482, %7 : vector<1x64xf32>
    %484 = arith.addf %6, %483 : vector<1x64xf32>
    %485 = vector.shape_cast %484 : vector<1x64xf32> to vector<1x64xf32>
    %486 = vector.broadcast %485 : vector<1x64xf32> to vector<16x64xf32>
    %487 = arith.addf %474, %3 : f32
    %488 = vector.broadcast %487 : f32 to vector<1x64xf32>
    %489 = arith.mulf %488, %7 : vector<1x64xf32>
    %490 = arith.addf %6, %489 : vector<1x64xf32>
    %491 = vector.shape_cast %490 : vector<1x64xf32> to vector<1x64xf32>
    %492 = vector.broadcast %491 : vector<1x64xf32> to vector<16x64xf32>
    %493 = arith.truncf %460 : vector<16x128xf32> to vector<16x128xbf16>
    %cst_133 = arith.constant dense<0.000000e+00> : vector<16x64xf32>
    %494 = tpu.matmul %493, %4, %cst_133 {dimension_numbers = #tpu.dot_dimension_numbers<[1], [0], [0], [1], [0, 0, 1, 1], [], []>} : vector<16x128xbf16>, vector<128x64xbf16>, vector<16x64xf32> -> vector<16x64xf32>
    %495 = arith.addf %494, %479 : vector<16x64xf32>
    %496 = math.tanh %495 : vector<16x64xf32>
    %497 = arith.truncf %496 : vector<16x64xf32> to vector<16x64xbf16>
    %cst_134 = arith.constant dense<0.000000e+00> : vector<16x128xf32>
    %498 = tpu.matmul %497, %5, %cst_134 {dimension_numbers = #tpu.dot_dimension_numbers<[1], [0], [0], [1], [0, 0, 1, 1], [], []>} : vector<16x64xbf16>, vector<64x128xbf16>, vector<16x128xf32> -> vector<16x128xf32>
    %499 = arith.addf %498, %10 : vector<16x128xf32>
    %500 = arith.mulf %496, %496 : vector<16x64xf32>
    %cst_135 = arith.constant 1.000000e+00 : f32
    %501 = vector.broadcast %cst_135 : f32 to vector<16x64xf32>
    %502 = arith.subf %501, %500 : vector<16x64xf32>
    %503 = arith.mulf %502, %13 : vector<16x64xf32>
    %cst_136 = arith.constant dense<0.000000e+00> : vector<16xf32>
    %504 = vector.multi_reduction <add>, %503, %cst_136 [1] : vector<16x64xf32> to vector<16xf32>
    %505 = vector.shape_cast %504 : vector<16xf32> to vector<16x1xf32>
    %cst_137 = arith.constant 0.000000e+00 : f32
    %506 = vector.broadcast %cst_137 : f32 to vector<16x1xf32>
    %507 = arith.subf %506, %505 : vector<16x1xf32>
    %cst_138 = arith.constant 5.000000e-01 : f32
    %508 = arith.mulf %cst_138, %3 : f32
    %509 = vector.broadcast %508 : f32 to vector<16x128xf32>
    %510 = arith.mulf %509, %499 : vector<16x128xf32>
    %511 = arith.addf %460, %510 : vector<16x128xf32>
    %512 = arith.truncf %511 : vector<16x128xf32> to vector<16x128xbf16>
    %cst_139 = arith.constant dense<0.000000e+00> : vector<16x64xf32>
    %513 = tpu.matmul %512, %4, %cst_139 {dimension_numbers = #tpu.dot_dimension_numbers<[1], [0], [0], [1], [0, 0, 1, 1], [], []>} : vector<16x128xbf16>, vector<128x64xbf16>, vector<16x64xf32> -> vector<16x64xf32>
    %514 = arith.addf %513, %486 : vector<16x64xf32>
    %515 = math.tanh %514 : vector<16x64xf32>
    %516 = arith.truncf %515 : vector<16x64xf32> to vector<16x64xbf16>
    %cst_140 = arith.constant dense<0.000000e+00> : vector<16x128xf32>
    %517 = tpu.matmul %516, %5, %cst_140 {dimension_numbers = #tpu.dot_dimension_numbers<[1], [0], [0], [1], [0, 0, 1, 1], [], []>} : vector<16x64xbf16>, vector<64x128xbf16>, vector<16x128xf32> -> vector<16x128xf32>
    %518 = arith.addf %517, %10 : vector<16x128xf32>
    %519 = arith.mulf %515, %515 : vector<16x64xf32>
    %cst_141 = arith.constant 1.000000e+00 : f32
    %520 = vector.broadcast %cst_141 : f32 to vector<16x64xf32>
    %521 = arith.subf %520, %519 : vector<16x64xf32>
    %522 = arith.mulf %521, %13 : vector<16x64xf32>
    %cst_142 = arith.constant dense<0.000000e+00> : vector<16xf32>
    %523 = vector.multi_reduction <add>, %522, %cst_142 [1] : vector<16x64xf32> to vector<16xf32>
    %524 = vector.shape_cast %523 : vector<16xf32> to vector<16x1xf32>
    %cst_143 = arith.constant 0.000000e+00 : f32
    %525 = vector.broadcast %cst_143 : f32 to vector<16x1xf32>
    %526 = arith.subf %525, %524 : vector<16x1xf32>
    %cst_144 = arith.constant 5.000000e-01 : f32
    %527 = arith.mulf %cst_144, %3 : f32
    %528 = vector.broadcast %527 : f32 to vector<16x128xf32>
    %529 = arith.mulf %528, %518 : vector<16x128xf32>
    %530 = arith.addf %460, %529 : vector<16x128xf32>
    %531 = arith.truncf %530 : vector<16x128xf32> to vector<16x128xbf16>
    %cst_145 = arith.constant dense<0.000000e+00> : vector<16x64xf32>
    %532 = tpu.matmul %531, %4, %cst_145 {dimension_numbers = #tpu.dot_dimension_numbers<[1], [0], [0], [1], [0, 0, 1, 1], [], []>} : vector<16x128xbf16>, vector<128x64xbf16>, vector<16x64xf32> -> vector<16x64xf32>
    %533 = arith.addf %532, %486 : vector<16x64xf32>
    %534 = math.tanh %533 : vector<16x64xf32>
    %535 = arith.truncf %534 : vector<16x64xf32> to vector<16x64xbf16>
    %cst_146 = arith.constant dense<0.000000e+00> : vector<16x128xf32>
    %536 = tpu.matmul %535, %5, %cst_146 {dimension_numbers = #tpu.dot_dimension_numbers<[1], [0], [0], [1], [0, 0, 1, 1], [], []>} : vector<16x64xbf16>, vector<64x128xbf16>, vector<16x128xf32> -> vector<16x128xf32>
    %537 = arith.addf %536, %10 : vector<16x128xf32>
    %538 = arith.mulf %534, %534 : vector<16x64xf32>
    %cst_147 = arith.constant 1.000000e+00 : f32
    %539 = vector.broadcast %cst_147 : f32 to vector<16x64xf32>
    %540 = arith.subf %539, %538 : vector<16x64xf32>
    %541 = arith.mulf %540, %13 : vector<16x64xf32>
    %cst_148 = arith.constant dense<0.000000e+00> : vector<16xf32>
    %542 = vector.multi_reduction <add>, %541, %cst_148 [1] : vector<16x64xf32> to vector<16xf32>
    %543 = vector.shape_cast %542 : vector<16xf32> to vector<16x1xf32>
    %cst_149 = arith.constant 0.000000e+00 : f32
    %544 = vector.broadcast %cst_149 : f32 to vector<16x1xf32>
    %545 = arith.subf %544, %543 : vector<16x1xf32>
    %546 = vector.broadcast %3 : f32 to vector<16x128xf32>
    %547 = arith.mulf %546, %537 : vector<16x128xf32>
    %548 = arith.addf %460, %547 : vector<16x128xf32>
    %549 = arith.truncf %548 : vector<16x128xf32> to vector<16x128xbf16>
    %cst_150 = arith.constant dense<0.000000e+00> : vector<16x64xf32>
    %550 = tpu.matmul %549, %4, %cst_150 {dimension_numbers = #tpu.dot_dimension_numbers<[1], [0], [0], [1], [0, 0, 1, 1], [], []>} : vector<16x128xbf16>, vector<128x64xbf16>, vector<16x64xf32> -> vector<16x64xf32>
    %551 = arith.addf %550, %492 : vector<16x64xf32>
    %552 = math.tanh %551 : vector<16x64xf32>
    %553 = arith.truncf %552 : vector<16x64xf32> to vector<16x64xbf16>
    %cst_151 = arith.constant dense<0.000000e+00> : vector<16x128xf32>
    %554 = tpu.matmul %553, %5, %cst_151 {dimension_numbers = #tpu.dot_dimension_numbers<[1], [0], [0], [1], [0, 0, 1, 1], [], []>} : vector<16x64xbf16>, vector<64x128xbf16>, vector<16x128xf32> -> vector<16x128xf32>
    %555 = arith.addf %554, %10 : vector<16x128xf32>
    %556 = arith.mulf %552, %552 : vector<16x64xf32>
    %cst_152 = arith.constant 1.000000e+00 : f32
    %557 = vector.broadcast %cst_152 : f32 to vector<16x64xf32>
    %558 = arith.subf %557, %556 : vector<16x64xf32>
    %559 = arith.mulf %558, %13 : vector<16x64xf32>
    %cst_153 = arith.constant dense<0.000000e+00> : vector<16xf32>
    %560 = vector.multi_reduction <add>, %559, %cst_153 [1] : vector<16x64xf32> to vector<16xf32>
    %561 = vector.shape_cast %560 : vector<16xf32> to vector<16x1xf32>
    %cst_154 = arith.constant 0.000000e+00 : f32
    %562 = vector.broadcast %cst_154 : f32 to vector<16x1xf32>
    %563 = arith.subf %562, %561 : vector<16x1xf32>
    %cst_155 = arith.constant 6.000000e+00 : f32
    %564 = arith.divf %3, %cst_155 : f32
    %cst_156 = arith.constant 2.000000e+00 : f32
    %565 = vector.broadcast %cst_156 : f32 to vector<16x128xf32>
    %566 = arith.mulf %565, %518 : vector<16x128xf32>
    %567 = arith.addf %499, %566 : vector<16x128xf32>
    %cst_157 = arith.constant 2.000000e+00 : f32
    %568 = vector.broadcast %cst_157 : f32 to vector<16x128xf32>
    %569 = arith.mulf %568, %537 : vector<16x128xf32>
    %570 = arith.addf %567, %569 : vector<16x128xf32>
    %571 = arith.addf %570, %555 : vector<16x128xf32>
    %572 = vector.broadcast %564 : f32 to vector<16x128xf32>
    %573 = arith.mulf %572, %571 : vector<16x128xf32>
    %574 = arith.addf %460, %573 : vector<16x128xf32>
    %cst_158 = arith.constant 6.000000e+00 : f32
    %575 = arith.divf %3, %cst_158 : f32
    %cst_159 = arith.constant 2.000000e+00 : f32
    %576 = vector.broadcast %cst_159 : f32 to vector<16x1xf32>
    %577 = arith.mulf %576, %526 : vector<16x1xf32>
    %578 = arith.addf %507, %577 : vector<16x1xf32>
    %cst_160 = arith.constant 2.000000e+00 : f32
    %579 = vector.broadcast %cst_160 : f32 to vector<16x1xf32>
    %580 = arith.mulf %579, %545 : vector<16x1xf32>
    %581 = arith.addf %578, %580 : vector<16x1xf32>
    %582 = arith.addf %581, %563 : vector<16x1xf32>
    %583 = vector.broadcast %575 : f32 to vector<16x1xf32>
    %584 = arith.mulf %583, %582 : vector<16x1xf32>
    %585 = arith.addf %471, %584 : vector<16x1xf32>
    %c5_i32 = arith.constant 5 : i32
    %586 = arith.sitofp %c5_i32 : i32 to f32
    %587 = arith.mulf %3, %586 : f32
    %588 = arith.addf %0, %587 : f32
    %589 = vector.broadcast %588 : f32 to vector<1x64xf32>
    %590 = arith.mulf %589, %7 : vector<1x64xf32>
    %591 = arith.addf %6, %590 : vector<1x64xf32>
    %592 = vector.shape_cast %591 : vector<1x64xf32> to vector<1x64xf32>
    %593 = vector.broadcast %592 : vector<1x64xf32> to vector<16x64xf32>
    %cst_161 = arith.constant 5.000000e-01 : f32
    %594 = arith.mulf %cst_161, %3 : f32
    %595 = arith.addf %588, %594 : f32
    %596 = vector.broadcast %595 : f32 to vector<1x64xf32>
    %597 = arith.mulf %596, %7 : vector<1x64xf32>
    %598 = arith.addf %6, %597 : vector<1x64xf32>
    %599 = vector.shape_cast %598 : vector<1x64xf32> to vector<1x64xf32>
    %600 = vector.broadcast %599 : vector<1x64xf32> to vector<16x64xf32>
    %601 = arith.addf %588, %3 : f32
    %602 = vector.broadcast %601 : f32 to vector<1x64xf32>
    %603 = arith.mulf %602, %7 : vector<1x64xf32>
    %604 = arith.addf %6, %603 : vector<1x64xf32>
    %605 = vector.shape_cast %604 : vector<1x64xf32> to vector<1x64xf32>
    %606 = vector.broadcast %605 : vector<1x64xf32> to vector<16x64xf32>
    %607 = arith.truncf %574 : vector<16x128xf32> to vector<16x128xbf16>
    %cst_162 = arith.constant dense<0.000000e+00> : vector<16x64xf32>
    %608 = tpu.matmul %607, %4, %cst_162 {dimension_numbers = #tpu.dot_dimension_numbers<[1], [0], [0], [1], [0, 0, 1, 1], [], []>} : vector<16x128xbf16>, vector<128x64xbf16>, vector<16x64xf32> -> vector<16x64xf32>
    %609 = arith.addf %608, %593 : vector<16x64xf32>
    %610 = math.tanh %609 : vector<16x64xf32>
    %611 = arith.truncf %610 : vector<16x64xf32> to vector<16x64xbf16>
    %cst_163 = arith.constant dense<0.000000e+00> : vector<16x128xf32>
    %612 = tpu.matmul %611, %5, %cst_163 {dimension_numbers = #tpu.dot_dimension_numbers<[1], [0], [0], [1], [0, 0, 1, 1], [], []>} : vector<16x64xbf16>, vector<64x128xbf16>, vector<16x128xf32> -> vector<16x128xf32>
    %613 = arith.addf %612, %10 : vector<16x128xf32>
    %614 = arith.mulf %610, %610 : vector<16x64xf32>
    %cst_164 = arith.constant 1.000000e+00 : f32
    %615 = vector.broadcast %cst_164 : f32 to vector<16x64xf32>
    %616 = arith.subf %615, %614 : vector<16x64xf32>
    %617 = arith.mulf %616, %13 : vector<16x64xf32>
    %cst_165 = arith.constant dense<0.000000e+00> : vector<16xf32>
    %618 = vector.multi_reduction <add>, %617, %cst_165 [1] : vector<16x64xf32> to vector<16xf32>
    %619 = vector.shape_cast %618 : vector<16xf32> to vector<16x1xf32>
    %cst_166 = arith.constant 0.000000e+00 : f32
    %620 = vector.broadcast %cst_166 : f32 to vector<16x1xf32>
    %621 = arith.subf %620, %619 : vector<16x1xf32>
    %cst_167 = arith.constant 5.000000e-01 : f32
    %622 = arith.mulf %cst_167, %3 : f32
    %623 = vector.broadcast %622 : f32 to vector<16x128xf32>
    %624 = arith.mulf %623, %613 : vector<16x128xf32>
    %625 = arith.addf %574, %624 : vector<16x128xf32>
    %626 = arith.truncf %625 : vector<16x128xf32> to vector<16x128xbf16>
    %cst_168 = arith.constant dense<0.000000e+00> : vector<16x64xf32>
    %627 = tpu.matmul %626, %4, %cst_168 {dimension_numbers = #tpu.dot_dimension_numbers<[1], [0], [0], [1], [0, 0, 1, 1], [], []>} : vector<16x128xbf16>, vector<128x64xbf16>, vector<16x64xf32> -> vector<16x64xf32>
    %628 = arith.addf %627, %600 : vector<16x64xf32>
    %629 = math.tanh %628 : vector<16x64xf32>
    %630 = arith.truncf %629 : vector<16x64xf32> to vector<16x64xbf16>
    %cst_169 = arith.constant dense<0.000000e+00> : vector<16x128xf32>
    %631 = tpu.matmul %630, %5, %cst_169 {dimension_numbers = #tpu.dot_dimension_numbers<[1], [0], [0], [1], [0, 0, 1, 1], [], []>} : vector<16x64xbf16>, vector<64x128xbf16>, vector<16x128xf32> -> vector<16x128xf32>
    %632 = arith.addf %631, %10 : vector<16x128xf32>
    %633 = arith.mulf %629, %629 : vector<16x64xf32>
    %cst_170 = arith.constant 1.000000e+00 : f32
    %634 = vector.broadcast %cst_170 : f32 to vector<16x64xf32>
    %635 = arith.subf %634, %633 : vector<16x64xf32>
    %636 = arith.mulf %635, %13 : vector<16x64xf32>
    %cst_171 = arith.constant dense<0.000000e+00> : vector<16xf32>
    %637 = vector.multi_reduction <add>, %636, %cst_171 [1] : vector<16x64xf32> to vector<16xf32>
    %638 = vector.shape_cast %637 : vector<16xf32> to vector<16x1xf32>
    %cst_172 = arith.constant 0.000000e+00 : f32
    %639 = vector.broadcast %cst_172 : f32 to vector<16x1xf32>
    %640 = arith.subf %639, %638 : vector<16x1xf32>
    %cst_173 = arith.constant 5.000000e-01 : f32
    %641 = arith.mulf %cst_173, %3 : f32
    %642 = vector.broadcast %641 : f32 to vector<16x128xf32>
    %643 = arith.mulf %642, %632 : vector<16x128xf32>
    %644 = arith.addf %574, %643 : vector<16x128xf32>
    %645 = arith.truncf %644 : vector<16x128xf32> to vector<16x128xbf16>
    %cst_174 = arith.constant dense<0.000000e+00> : vector<16x64xf32>
    %646 = tpu.matmul %645, %4, %cst_174 {dimension_numbers = #tpu.dot_dimension_numbers<[1], [0], [0], [1], [0, 0, 1, 1], [], []>} : vector<16x128xbf16>, vector<128x64xbf16>, vector<16x64xf32> -> vector<16x64xf32>
    %647 = arith.addf %646, %600 : vector<16x64xf32>
    %648 = math.tanh %647 : vector<16x64xf32>
    %649 = arith.truncf %648 : vector<16x64xf32> to vector<16x64xbf16>
    %cst_175 = arith.constant dense<0.000000e+00> : vector<16x128xf32>
    %650 = tpu.matmul %649, %5, %cst_175 {dimension_numbers = #tpu.dot_dimension_numbers<[1], [0], [0], [1], [0, 0, 1, 1], [], []>} : vector<16x64xbf16>, vector<64x128xbf16>, vector<16x128xf32> -> vector<16x128xf32>
    %651 = arith.addf %650, %10 : vector<16x128xf32>
    %652 = arith.mulf %648, %648 : vector<16x64xf32>
    %cst_176 = arith.constant 1.000000e+00 : f32
    %653 = vector.broadcast %cst_176 : f32 to vector<16x64xf32>
    %654 = arith.subf %653, %652 : vector<16x64xf32>
    %655 = arith.mulf %654, %13 : vector<16x64xf32>
    %cst_177 = arith.constant dense<0.000000e+00> : vector<16xf32>
    %656 = vector.multi_reduction <add>, %655, %cst_177 [1] : vector<16x64xf32> to vector<16xf32>
    %657 = vector.shape_cast %656 : vector<16xf32> to vector<16x1xf32>
    %cst_178 = arith.constant 0.000000e+00 : f32
    %658 = vector.broadcast %cst_178 : f32 to vector<16x1xf32>
    %659 = arith.subf %658, %657 : vector<16x1xf32>
    %660 = vector.broadcast %3 : f32 to vector<16x128xf32>
    %661 = arith.mulf %660, %651 : vector<16x128xf32>
    %662 = arith.addf %574, %661 : vector<16x128xf32>
    %663 = arith.truncf %662 : vector<16x128xf32> to vector<16x128xbf16>
    %cst_179 = arith.constant dense<0.000000e+00> : vector<16x64xf32>
    %664 = tpu.matmul %663, %4, %cst_179 {dimension_numbers = #tpu.dot_dimension_numbers<[1], [0], [0], [1], [0, 0, 1, 1], [], []>} : vector<16x128xbf16>, vector<128x64xbf16>, vector<16x64xf32> -> vector<16x64xf32>
    %665 = arith.addf %664, %606 : vector<16x64xf32>
    %666 = math.tanh %665 : vector<16x64xf32>
    %667 = arith.truncf %666 : vector<16x64xf32> to vector<16x64xbf16>
    %cst_180 = arith.constant dense<0.000000e+00> : vector<16x128xf32>
    %668 = tpu.matmul %667, %5, %cst_180 {dimension_numbers = #tpu.dot_dimension_numbers<[1], [0], [0], [1], [0, 0, 1, 1], [], []>} : vector<16x64xbf16>, vector<64x128xbf16>, vector<16x128xf32> -> vector<16x128xf32>
    %669 = arith.addf %668, %10 : vector<16x128xf32>
    %670 = arith.mulf %666, %666 : vector<16x64xf32>
    %cst_181 = arith.constant 1.000000e+00 : f32
    %671 = vector.broadcast %cst_181 : f32 to vector<16x64xf32>
    %672 = arith.subf %671, %670 : vector<16x64xf32>
    %673 = arith.mulf %672, %13 : vector<16x64xf32>
    %cst_182 = arith.constant dense<0.000000e+00> : vector<16xf32>
    %674 = vector.multi_reduction <add>, %673, %cst_182 [1] : vector<16x64xf32> to vector<16xf32>
    %675 = vector.shape_cast %674 : vector<16xf32> to vector<16x1xf32>
    %cst_183 = arith.constant 0.000000e+00 : f32
    %676 = vector.broadcast %cst_183 : f32 to vector<16x1xf32>
    %677 = arith.subf %676, %675 : vector<16x1xf32>
    %cst_184 = arith.constant 6.000000e+00 : f32
    %678 = arith.divf %3, %cst_184 : f32
    %cst_185 = arith.constant 2.000000e+00 : f32
    %679 = vector.broadcast %cst_185 : f32 to vector<16x128xf32>
    %680 = arith.mulf %679, %632 : vector<16x128xf32>
    %681 = arith.addf %613, %680 : vector<16x128xf32>
    %cst_186 = arith.constant 2.000000e+00 : f32
    %682 = vector.broadcast %cst_186 : f32 to vector<16x128xf32>
    %683 = arith.mulf %682, %651 : vector<16x128xf32>
    %684 = arith.addf %681, %683 : vector<16x128xf32>
    %685 = arith.addf %684, %669 : vector<16x128xf32>
    %686 = vector.broadcast %678 : f32 to vector<16x128xf32>
    %687 = arith.mulf %686, %685 : vector<16x128xf32>
    %688 = arith.addf %574, %687 : vector<16x128xf32>
    %cst_187 = arith.constant 6.000000e+00 : f32
    %689 = arith.divf %3, %cst_187 : f32
    %cst_188 = arith.constant 2.000000e+00 : f32
    %690 = vector.broadcast %cst_188 : f32 to vector<16x1xf32>
    %691 = arith.mulf %690, %640 : vector<16x1xf32>
    %692 = arith.addf %621, %691 : vector<16x1xf32>
    %cst_189 = arith.constant 2.000000e+00 : f32
    %693 = vector.broadcast %cst_189 : f32 to vector<16x1xf32>
    %694 = arith.mulf %693, %659 : vector<16x1xf32>
    %695 = arith.addf %692, %694 : vector<16x1xf32>
    %696 = arith.addf %695, %677 : vector<16x1xf32>
    %697 = vector.broadcast %689 : f32 to vector<16x1xf32>
    %698 = arith.mulf %697, %696 : vector<16x1xf32>
    %699 = arith.addf %585, %698 : vector<16x1xf32>
    %c6_i32 = arith.constant 6 : i32
    %700 = arith.sitofp %c6_i32 : i32 to f32
    %701 = arith.mulf %3, %700 : f32
    %702 = arith.addf %0, %701 : f32
    %703 = vector.broadcast %702 : f32 to vector<1x64xf32>
    %704 = arith.mulf %703, %7 : vector<1x64xf32>
    %705 = arith.addf %6, %704 : vector<1x64xf32>
    %706 = vector.shape_cast %705 : vector<1x64xf32> to vector<1x64xf32>
    %707 = vector.broadcast %706 : vector<1x64xf32> to vector<16x64xf32>
    %cst_190 = arith.constant 5.000000e-01 : f32
    %708 = arith.mulf %cst_190, %3 : f32
    %709 = arith.addf %702, %708 : f32
    %710 = vector.broadcast %709 : f32 to vector<1x64xf32>
    %711 = arith.mulf %710, %7 : vector<1x64xf32>
    %712 = arith.addf %6, %711 : vector<1x64xf32>
    %713 = vector.shape_cast %712 : vector<1x64xf32> to vector<1x64xf32>
    %714 = vector.broadcast %713 : vector<1x64xf32> to vector<16x64xf32>
    %715 = arith.addf %702, %3 : f32
    %716 = vector.broadcast %715 : f32 to vector<1x64xf32>
    %717 = arith.mulf %716, %7 : vector<1x64xf32>
    %718 = arith.addf %6, %717 : vector<1x64xf32>
    %719 = vector.shape_cast %718 : vector<1x64xf32> to vector<1x64xf32>
    %720 = vector.broadcast %719 : vector<1x64xf32> to vector<16x64xf32>
    %721 = arith.truncf %688 : vector<16x128xf32> to vector<16x128xbf16>
    %cst_191 = arith.constant dense<0.000000e+00> : vector<16x64xf32>
    %722 = tpu.matmul %721, %4, %cst_191 {dimension_numbers = #tpu.dot_dimension_numbers<[1], [0], [0], [1], [0, 0, 1, 1], [], []>} : vector<16x128xbf16>, vector<128x64xbf16>, vector<16x64xf32> -> vector<16x64xf32>
    %723 = arith.addf %722, %707 : vector<16x64xf32>
    %724 = math.tanh %723 : vector<16x64xf32>
    %725 = arith.truncf %724 : vector<16x64xf32> to vector<16x64xbf16>
    %cst_192 = arith.constant dense<0.000000e+00> : vector<16x128xf32>
    %726 = tpu.matmul %725, %5, %cst_192 {dimension_numbers = #tpu.dot_dimension_numbers<[1], [0], [0], [1], [0, 0, 1, 1], [], []>} : vector<16x64xbf16>, vector<64x128xbf16>, vector<16x128xf32> -> vector<16x128xf32>
    %727 = arith.addf %726, %10 : vector<16x128xf32>
    %728 = arith.mulf %724, %724 : vector<16x64xf32>
    %cst_193 = arith.constant 1.000000e+00 : f32
    %729 = vector.broadcast %cst_193 : f32 to vector<16x64xf32>
    %730 = arith.subf %729, %728 : vector<16x64xf32>
    %731 = arith.mulf %730, %13 : vector<16x64xf32>
    %cst_194 = arith.constant dense<0.000000e+00> : vector<16xf32>
    %732 = vector.multi_reduction <add>, %731, %cst_194 [1] : vector<16x64xf32> to vector<16xf32>
    %733 = vector.shape_cast %732 : vector<16xf32> to vector<16x1xf32>
    %cst_195 = arith.constant 0.000000e+00 : f32
    %734 = vector.broadcast %cst_195 : f32 to vector<16x1xf32>
    %735 = arith.subf %734, %733 : vector<16x1xf32>
    %cst_196 = arith.constant 5.000000e-01 : f32
    %736 = arith.mulf %cst_196, %3 : f32
    %737 = vector.broadcast %736 : f32 to vector<16x128xf32>
    %738 = arith.mulf %737, %727 : vector<16x128xf32>
    %739 = arith.addf %688, %738 : vector<16x128xf32>
    %740 = arith.truncf %739 : vector<16x128xf32> to vector<16x128xbf16>
    %cst_197 = arith.constant dense<0.000000e+00> : vector<16x64xf32>
    %741 = tpu.matmul %740, %4, %cst_197 {dimension_numbers = #tpu.dot_dimension_numbers<[1], [0], [0], [1], [0, 0, 1, 1], [], []>} : vector<16x128xbf16>, vector<128x64xbf16>, vector<16x64xf32> -> vector<16x64xf32>
    %742 = arith.addf %741, %714 : vector<16x64xf32>
    %743 = math.tanh %742 : vector<16x64xf32>
    %744 = arith.truncf %743 : vector<16x64xf32> to vector<16x64xbf16>
    %cst_198 = arith.constant dense<0.000000e+00> : vector<16x128xf32>
    %745 = tpu.matmul %744, %5, %cst_198 {dimension_numbers = #tpu.dot_dimension_numbers<[1], [0], [0], [1], [0, 0, 1, 1], [], []>} : vector<16x64xbf16>, vector<64x128xbf16>, vector<16x128xf32> -> vector<16x128xf32>
    %746 = arith.addf %745, %10 : vector<16x128xf32>
    %747 = arith.mulf %743, %743 : vector<16x64xf32>
    %cst_199 = arith.constant 1.000000e+00 : f32
    %748 = vector.broadcast %cst_199 : f32 to vector<16x64xf32>
    %749 = arith.subf %748, %747 : vector<16x64xf32>
    %750 = arith.mulf %749, %13 : vector<16x64xf32>
    %cst_200 = arith.constant dense<0.000000e+00> : vector<16xf32>
    %751 = vector.multi_reduction <add>, %750, %cst_200 [1] : vector<16x64xf32> to vector<16xf32>
    %752 = vector.shape_cast %751 : vector<16xf32> to vector<16x1xf32>
    %cst_201 = arith.constant 0.000000e+00 : f32
    %753 = vector.broadcast %cst_201 : f32 to vector<16x1xf32>
    %754 = arith.subf %753, %752 : vector<16x1xf32>
    %cst_202 = arith.constant 5.000000e-01 : f32
    %755 = arith.mulf %cst_202, %3 : f32
    %756 = vector.broadcast %755 : f32 to vector<16x128xf32>
    %757 = arith.mulf %756, %746 : vector<16x128xf32>
    %758 = arith.addf %688, %757 : vector<16x128xf32>
    %759 = arith.truncf %758 : vector<16x128xf32> to vector<16x128xbf16>
    %cst_203 = arith.constant dense<0.000000e+00> : vector<16x64xf32>
    %760 = tpu.matmul %759, %4, %cst_203 {dimension_numbers = #tpu.dot_dimension_numbers<[1], [0], [0], [1], [0, 0, 1, 1], [], []>} : vector<16x128xbf16>, vector<128x64xbf16>, vector<16x64xf32> -> vector<16x64xf32>
    %761 = arith.addf %760, %714 : vector<16x64xf32>
    %762 = math.tanh %761 : vector<16x64xf32>
    %763 = arith.truncf %762 : vector<16x64xf32> to vector<16x64xbf16>
    %cst_204 = arith.constant dense<0.000000e+00> : vector<16x128xf32>
    %764 = tpu.matmul %763, %5, %cst_204 {dimension_numbers = #tpu.dot_dimension_numbers<[1], [0], [0], [1], [0, 0, 1, 1], [], []>} : vector<16x64xbf16>, vector<64x128xbf16>, vector<16x128xf32> -> vector<16x128xf32>
    %765 = arith.addf %764, %10 : vector<16x128xf32>
    %766 = arith.mulf %762, %762 : vector<16x64xf32>
    %cst_205 = arith.constant 1.000000e+00 : f32
    %767 = vector.broadcast %cst_205 : f32 to vector<16x64xf32>
    %768 = arith.subf %767, %766 : vector<16x64xf32>
    %769 = arith.mulf %768, %13 : vector<16x64xf32>
    %cst_206 = arith.constant dense<0.000000e+00> : vector<16xf32>
    %770 = vector.multi_reduction <add>, %769, %cst_206 [1] : vector<16x64xf32> to vector<16xf32>
    %771 = vector.shape_cast %770 : vector<16xf32> to vector<16x1xf32>
    %cst_207 = arith.constant 0.000000e+00 : f32
    %772 = vector.broadcast %cst_207 : f32 to vector<16x1xf32>
    %773 = arith.subf %772, %771 : vector<16x1xf32>
    %774 = vector.broadcast %3 : f32 to vector<16x128xf32>
    %775 = arith.mulf %774, %765 : vector<16x128xf32>
    %776 = arith.addf %688, %775 : vector<16x128xf32>
    %777 = arith.truncf %776 : vector<16x128xf32> to vector<16x128xbf16>
    %cst_208 = arith.constant dense<0.000000e+00> : vector<16x64xf32>
    %778 = tpu.matmul %777, %4, %cst_208 {dimension_numbers = #tpu.dot_dimension_numbers<[1], [0], [0], [1], [0, 0, 1, 1], [], []>} : vector<16x128xbf16>, vector<128x64xbf16>, vector<16x64xf32> -> vector<16x64xf32>
    %779 = arith.addf %778, %720 : vector<16x64xf32>
    %780 = math.tanh %779 : vector<16x64xf32>
    %781 = arith.truncf %780 : vector<16x64xf32> to vector<16x64xbf16>
    %cst_209 = arith.constant dense<0.000000e+00> : vector<16x128xf32>
    %782 = tpu.matmul %781, %5, %cst_209 {dimension_numbers = #tpu.dot_dimension_numbers<[1], [0], [0], [1], [0, 0, 1, 1], [], []>} : vector<16x64xbf16>, vector<64x128xbf16>, vector<16x128xf32> -> vector<16x128xf32>
    %783 = arith.addf %782, %10 : vector<16x128xf32>
    %784 = arith.mulf %780, %780 : vector<16x64xf32>
    %cst_210 = arith.constant 1.000000e+00 : f32
    %785 = vector.broadcast %cst_210 : f32 to vector<16x64xf32>
    %786 = arith.subf %785, %784 : vector<16x64xf32>
    %787 = arith.mulf %786, %13 : vector<16x64xf32>
    %cst_211 = arith.constant dense<0.000000e+00> : vector<16xf32>
    %788 = vector.multi_reduction <add>, %787, %cst_211 [1] : vector<16x64xf32> to vector<16xf32>
    %789 = vector.shape_cast %788 : vector<16xf32> to vector<16x1xf32>
    %cst_212 = arith.constant 0.000000e+00 : f32
    %790 = vector.broadcast %cst_212 : f32 to vector<16x1xf32>
    %791 = arith.subf %790, %789 : vector<16x1xf32>
    %cst_213 = arith.constant 6.000000e+00 : f32
    %792 = arith.divf %3, %cst_213 : f32
    %cst_214 = arith.constant 2.000000e+00 : f32
    %793 = vector.broadcast %cst_214 : f32 to vector<16x128xf32>
    %794 = arith.mulf %793, %746 : vector<16x128xf32>
    %795 = arith.addf %727, %794 : vector<16x128xf32>
    %cst_215 = arith.constant 2.000000e+00 : f32
    %796 = vector.broadcast %cst_215 : f32 to vector<16x128xf32>
    %797 = arith.mulf %796, %765 : vector<16x128xf32>
    %798 = arith.addf %795, %797 : vector<16x128xf32>
    %799 = arith.addf %798, %783 : vector<16x128xf32>
    %800 = vector.broadcast %792 : f32 to vector<16x128xf32>
    %801 = arith.mulf %800, %799 : vector<16x128xf32>
    %802 = arith.addf %688, %801 : vector<16x128xf32>
    %cst_216 = arith.constant 6.000000e+00 : f32
    %803 = arith.divf %3, %cst_216 : f32
    %cst_217 = arith.constant 2.000000e+00 : f32
    %804 = vector.broadcast %cst_217 : f32 to vector<16x1xf32>
    %805 = arith.mulf %804, %754 : vector<16x1xf32>
    %806 = arith.addf %735, %805 : vector<16x1xf32>
    %cst_218 = arith.constant 2.000000e+00 : f32
    %807 = vector.broadcast %cst_218 : f32 to vector<16x1xf32>
    %808 = arith.mulf %807, %773 : vector<16x1xf32>
    %809 = arith.addf %806, %808 : vector<16x1xf32>
    %810 = arith.addf %809, %791 : vector<16x1xf32>
    %811 = vector.broadcast %803 : f32 to vector<16x1xf32>
    %812 = arith.mulf %811, %810 : vector<16x1xf32>
    %813 = arith.addf %699, %812 : vector<16x1xf32>
    %c7_i32 = arith.constant 7 : i32
    %814 = arith.sitofp %c7_i32 : i32 to f32
    %815 = arith.mulf %3, %814 : f32
    %816 = arith.addf %0, %815 : f32
    %817 = vector.broadcast %816 : f32 to vector<1x64xf32>
    %818 = arith.mulf %817, %7 : vector<1x64xf32>
    %819 = arith.addf %6, %818 : vector<1x64xf32>
    %820 = vector.shape_cast %819 : vector<1x64xf32> to vector<1x64xf32>
    %821 = vector.broadcast %820 : vector<1x64xf32> to vector<16x64xf32>
    %cst_219 = arith.constant 5.000000e-01 : f32
    %822 = arith.mulf %cst_219, %3 : f32
    %823 = arith.addf %816, %822 : f32
    %824 = vector.broadcast %823 : f32 to vector<1x64xf32>
    %825 = arith.mulf %824, %7 : vector<1x64xf32>
    %826 = arith.addf %6, %825 : vector<1x64xf32>
    %827 = vector.shape_cast %826 : vector<1x64xf32> to vector<1x64xf32>
    %828 = vector.broadcast %827 : vector<1x64xf32> to vector<16x64xf32>
    %829 = arith.addf %816, %3 : f32
    %830 = vector.broadcast %829 : f32 to vector<1x64xf32>
    %831 = arith.mulf %830, %7 : vector<1x64xf32>
    %832 = arith.addf %6, %831 : vector<1x64xf32>
    %833 = vector.shape_cast %832 : vector<1x64xf32> to vector<1x64xf32>
    %834 = vector.broadcast %833 : vector<1x64xf32> to vector<16x64xf32>
    %835 = arith.truncf %802 : vector<16x128xf32> to vector<16x128xbf16>
    %cst_220 = arith.constant dense<0.000000e+00> : vector<16x64xf32>
    %836 = tpu.matmul %835, %4, %cst_220 {dimension_numbers = #tpu.dot_dimension_numbers<[1], [0], [0], [1], [0, 0, 1, 1], [], []>} : vector<16x128xbf16>, vector<128x64xbf16>, vector<16x64xf32> -> vector<16x64xf32>
    %837 = arith.addf %836, %821 : vector<16x64xf32>
    %838 = math.tanh %837 : vector<16x64xf32>
    %839 = arith.truncf %838 : vector<16x64xf32> to vector<16x64xbf16>
    %cst_221 = arith.constant dense<0.000000e+00> : vector<16x128xf32>
    %840 = tpu.matmul %839, %5, %cst_221 {dimension_numbers = #tpu.dot_dimension_numbers<[1], [0], [0], [1], [0, 0, 1, 1], [], []>} : vector<16x64xbf16>, vector<64x128xbf16>, vector<16x128xf32> -> vector<16x128xf32>
    %841 = arith.addf %840, %10 : vector<16x128xf32>
    %842 = arith.mulf %838, %838 : vector<16x64xf32>
    %cst_222 = arith.constant 1.000000e+00 : f32
    %843 = vector.broadcast %cst_222 : f32 to vector<16x64xf32>
    %844 = arith.subf %843, %842 : vector<16x64xf32>
    %845 = arith.mulf %844, %13 : vector<16x64xf32>
    %cst_223 = arith.constant dense<0.000000e+00> : vector<16xf32>
    %846 = vector.multi_reduction <add>, %845, %cst_223 [1] : vector<16x64xf32> to vector<16xf32>
    %847 = vector.shape_cast %846 : vector<16xf32> to vector<16x1xf32>
    %cst_224 = arith.constant 0.000000e+00 : f32
    %848 = vector.broadcast %cst_224 : f32 to vector<16x1xf32>
    %849 = arith.subf %848, %847 : vector<16x1xf32>
    %cst_225 = arith.constant 5.000000e-01 : f32
    %850 = arith.mulf %cst_225, %3 : f32
    %851 = vector.broadcast %850 : f32 to vector<16x128xf32>
    %852 = arith.mulf %851, %841 : vector<16x128xf32>
    %853 = arith.addf %802, %852 : vector<16x128xf32>
    %854 = arith.truncf %853 : vector<16x128xf32> to vector<16x128xbf16>
    %cst_226 = arith.constant dense<0.000000e+00> : vector<16x64xf32>
    %855 = tpu.matmul %854, %4, %cst_226 {dimension_numbers = #tpu.dot_dimension_numbers<[1], [0], [0], [1], [0, 0, 1, 1], [], []>} : vector<16x128xbf16>, vector<128x64xbf16>, vector<16x64xf32> -> vector<16x64xf32>
    %856 = arith.addf %855, %828 : vector<16x64xf32>
    %857 = math.tanh %856 : vector<16x64xf32>
    %858 = arith.truncf %857 : vector<16x64xf32> to vector<16x64xbf16>
    %cst_227 = arith.constant dense<0.000000e+00> : vector<16x128xf32>
    %859 = tpu.matmul %858, %5, %cst_227 {dimension_numbers = #tpu.dot_dimension_numbers<[1], [0], [0], [1], [0, 0, 1, 1], [], []>} : vector<16x64xbf16>, vector<64x128xbf16>, vector<16x128xf32> -> vector<16x128xf32>
    %860 = arith.addf %859, %10 : vector<16x128xf32>
    %861 = arith.mulf %857, %857 : vector<16x64xf32>
    %cst_228 = arith.constant 1.000000e+00 : f32
    %862 = vector.broadcast %cst_228 : f32 to vector<16x64xf32>
    %863 = arith.subf %862, %861 : vector<16x64xf32>
    %864 = arith.mulf %863, %13 : vector<16x64xf32>
    %cst_229 = arith.constant dense<0.000000e+00> : vector<16xf32>
    %865 = vector.multi_reduction <add>, %864, %cst_229 [1] : vector<16x64xf32> to vector<16xf32>
    %866 = vector.shape_cast %865 : vector<16xf32> to vector<16x1xf32>
    %cst_230 = arith.constant 0.000000e+00 : f32
    %867 = vector.broadcast %cst_230 : f32 to vector<16x1xf32>
    %868 = arith.subf %867, %866 : vector<16x1xf32>
    %cst_231 = arith.constant 5.000000e-01 : f32
    %869 = arith.mulf %cst_231, %3 : f32
    %870 = vector.broadcast %869 : f32 to vector<16x128xf32>
    %871 = arith.mulf %870, %860 : vector<16x128xf32>
    %872 = arith.addf %802, %871 : vector<16x128xf32>
    %873 = arith.truncf %872 : vector<16x128xf32> to vector<16x128xbf16>
    %cst_232 = arith.constant dense<0.000000e+00> : vector<16x64xf32>
    %874 = tpu.matmul %873, %4, %cst_232 {dimension_numbers = #tpu.dot_dimension_numbers<[1], [0], [0], [1], [0, 0, 1, 1], [], []>} : vector<16x128xbf16>, vector<128x64xbf16>, vector<16x64xf32> -> vector<16x64xf32>
    %875 = arith.addf %874, %828 : vector<16x64xf32>
    %876 = math.tanh %875 : vector<16x64xf32>
    %877 = arith.truncf %876 : vector<16x64xf32> to vector<16x64xbf16>
    %cst_233 = arith.constant dense<0.000000e+00> : vector<16x128xf32>
    %878 = tpu.matmul %877, %5, %cst_233 {dimension_numbers = #tpu.dot_dimension_numbers<[1], [0], [0], [1], [0, 0, 1, 1], [], []>} : vector<16x64xbf16>, vector<64x128xbf16>, vector<16x128xf32> -> vector<16x128xf32>
    %879 = arith.addf %878, %10 : vector<16x128xf32>
    %880 = arith.mulf %876, %876 : vector<16x64xf32>
    %cst_234 = arith.constant 1.000000e+00 : f32
    %881 = vector.broadcast %cst_234 : f32 to vector<16x64xf32>
    %882 = arith.subf %881, %880 : vector<16x64xf32>
    %883 = arith.mulf %882, %13 : vector<16x64xf32>
    %cst_235 = arith.constant dense<0.000000e+00> : vector<16xf32>
    %884 = vector.multi_reduction <add>, %883, %cst_235 [1] : vector<16x64xf32> to vector<16xf32>
    %885 = vector.shape_cast %884 : vector<16xf32> to vector<16x1xf32>
    %cst_236 = arith.constant 0.000000e+00 : f32
    %886 = vector.broadcast %cst_236 : f32 to vector<16x1xf32>
    %887 = arith.subf %886, %885 : vector<16x1xf32>
    %888 = vector.broadcast %3 : f32 to vector<16x128xf32>
    %889 = arith.mulf %888, %879 : vector<16x128xf32>
    %890 = arith.addf %802, %889 : vector<16x128xf32>
    %891 = arith.truncf %890 : vector<16x128xf32> to vector<16x128xbf16>
    %cst_237 = arith.constant dense<0.000000e+00> : vector<16x64xf32>
    %892 = tpu.matmul %891, %4, %cst_237 {dimension_numbers = #tpu.dot_dimension_numbers<[1], [0], [0], [1], [0, 0, 1, 1], [], []>} : vector<16x128xbf16>, vector<128x64xbf16>, vector<16x64xf32> -> vector<16x64xf32>
    %893 = arith.addf %892, %834 : vector<16x64xf32>
    %894 = math.tanh %893 : vector<16x64xf32>
    %895 = arith.truncf %894 : vector<16x64xf32> to vector<16x64xbf16>
    %cst_238 = arith.constant dense<0.000000e+00> : vector<16x128xf32>
    %896 = tpu.matmul %895, %5, %cst_238 {dimension_numbers = #tpu.dot_dimension_numbers<[1], [0], [0], [1], [0, 0, 1, 1], [], []>} : vector<16x64xbf16>, vector<64x128xbf16>, vector<16x128xf32> -> vector<16x128xf32>
    %897 = arith.addf %896, %10 : vector<16x128xf32>
    %898 = arith.mulf %894, %894 : vector<16x64xf32>
    %cst_239 = arith.constant 1.000000e+00 : f32
    %899 = vector.broadcast %cst_239 : f32 to vector<16x64xf32>
    %900 = arith.subf %899, %898 : vector<16x64xf32>
    %901 = arith.mulf %900, %13 : vector<16x64xf32>
    %cst_240 = arith.constant dense<0.000000e+00> : vector<16xf32>
    %902 = vector.multi_reduction <add>, %901, %cst_240 [1] : vector<16x64xf32> to vector<16xf32>
    %903 = vector.shape_cast %902 : vector<16xf32> to vector<16x1xf32>
    %cst_241 = arith.constant 0.000000e+00 : f32
    %904 = vector.broadcast %cst_241 : f32 to vector<16x1xf32>
    %905 = arith.subf %904, %903 : vector<16x1xf32>
    %cst_242 = arith.constant 6.000000e+00 : f32
    %906 = arith.divf %3, %cst_242 : f32
    %cst_243 = arith.constant 2.000000e+00 : f32
    %907 = vector.broadcast %cst_243 : f32 to vector<16x128xf32>
    %908 = arith.mulf %907, %860 : vector<16x128xf32>
    %909 = arith.addf %841, %908 : vector<16x128xf32>
    %cst_244 = arith.constant 2.000000e+00 : f32
    %910 = vector.broadcast %cst_244 : f32 to vector<16x128xf32>
    %911 = arith.mulf %910, %879 : vector<16x128xf32>
    %912 = arith.addf %909, %911 : vector<16x128xf32>
    %913 = arith.addf %912, %897 : vector<16x128xf32>
    %914 = vector.broadcast %906 : f32 to vector<16x128xf32>
    %915 = arith.mulf %914, %913 : vector<16x128xf32>
    %916 = arith.addf %802, %915 : vector<16x128xf32>
    %cst_245 = arith.constant 6.000000e+00 : f32
    %917 = arith.divf %3, %cst_245 : f32
    %cst_246 = arith.constant 2.000000e+00 : f32
    %918 = vector.broadcast %cst_246 : f32 to vector<16x1xf32>
    %919 = arith.mulf %918, %868 : vector<16x1xf32>
    %920 = arith.addf %849, %919 : vector<16x1xf32>
    %cst_247 = arith.constant 2.000000e+00 : f32
    %921 = vector.broadcast %cst_247 : f32 to vector<16x1xf32>
    %922 = arith.mulf %921, %887 : vector<16x1xf32>
    %923 = arith.addf %920, %922 : vector<16x1xf32>
    %924 = arith.addf %923, %905 : vector<16x1xf32>
    %925 = vector.broadcast %917 : f32 to vector<16x1xf32>
    %926 = arith.mulf %925, %924 : vector<16x1xf32>
    %927 = arith.addf %813, %926 : vector<16x1xf32>
    %c8_i32 = arith.constant 8 : i32
    %c0_248 = arith.constant 0 : index
    %c0_249 = arith.constant 0 : index
    %928 = vector.load %arg10[%c0_248, %c0_249] : memref<16x128xf32, #tpu.memory_space<vmem>>, vector<16x128xf32>
    tpu.vector_store %arg10[%c0_248, %c0_249], %916 {strides = array<i32>} : memref<16x128xf32, #tpu.memory_space<vmem>>, vector<16x128xf32>,
    %c0_250 = arith.constant 0 : index
    %c0_251 = arith.constant 0 : index
    %929 = vector.load %arg11[%c0_250, %c0_251] : memref<16x1xf32, #tpu.memory_space<vmem>>, vector<16x1xf32>
    tpu.vector_store %arg11[%c0_250, %c0_251], %927 {strides = array<i32>} : memref<16x1xf32, #tpu.memory_space<vmem>>, vector<16x1xf32>,
    return
  }
  func.func @transform_0(%arg0: i32, %arg1: memref<2xf32, #tpu.memory_space<smem>>) -> (i32, i32) {
    %c0_i32 = arith.constant 0 : i32
    %c0_i32_0 = arith.constant 0 : i32
    %c0_i32_1 = arith.constant 0 : i32
    return %c0_i32, %c0_i32_0 : i32, i32
  }
  func.func @transform_1(%arg0: i32, %arg1: memref<2xf32, #tpu.memory_space<smem>>) -> (i32, i32) {
    %c0_i32 = arith.constant 0 : i32
    %c0_i32_0 = arith.constant 0 : i32
    %c0_i32_1 = arith.constant 0 : i32
    return %c0_i32, %c0_i32_0 : i32, i32
  }
  func.func @transform_2(%arg0: i32, %arg1: memref<2xf32, #tpu.memory_space<smem>>) -> (i32, i32) {
    %c0_i32 = arith.constant 0 : i32
    %c0_i32_0 = arith.constant 0 : i32
    %c0_i32_1 = arith.constant 0 : i32
    return %c0_i32, %c0_i32_0 : i32, i32
  }
  func.func @transform_3(%arg0: i32, %arg1: memref<2xf32, #tpu.memory_space<smem>>) -> (i32, i32) {
    %c0_i32 = arith.constant 0 : i32
    %c0_i32_0 = arith.constant 0 : i32
    %c0_i32_1 = arith.constant 0 : i32
    return %c0_i32, %c0_i32_0 : i32, i32
  }
  func.func @transform_4(%arg0: i32, %arg1: memref<2xf32, #tpu.memory_space<smem>>) -> (i32, i32) {
    %c0_i32 = arith.constant 0 : i32
    %c0_i32_0 = arith.constant 0 : i32
    %c0_i32_1 = arith.constant 0 : i32
    return %c0_i32, %c0_i32_0 : i32, i32
  }
  func.func @transform_5(%arg0: i32, %arg1: memref<2xf32, #tpu.memory_space<smem>>) -> (i32, i32) {
    %c0_i32 = arith.constant 0 : i32
    %c0_i32_0 = arith.constant 0 : i32
    %c0_i32_1 = arith.constant 0 : i32
    return %c0_i32, %c0_i32_0 : i32, i32
  }
  func.func @transform_6(%arg0: i32, %arg1: memref<2xf32, #tpu.memory_space<smem>>) -> (i32, i32) {
    %c0_i32 = arith.constant 0 : i32
    %c0_i32_0 = arith.constant 0 : i32
    %c0_i32_1 = arith.constant 0 : i32
    return %c0_i32, %c0_i32_0 : i32, i32
  }
  func.func @transform_7(%arg0: i32, %arg1: memref<2xf32, #tpu.memory_space<smem>>) -> (i32, i32) {
    %c0_i32 = arith.constant 0 : i32
    %c0_i32_0 = arith.constant 0 : i32
    %c0_i32_1 = arith.constant 0 : i32
    return %c0_i32, %c0_i32_0 : i32, i32
  }
  func.func @transform_8(%arg0: i32, %arg1: memref<2xf32, #tpu.memory_space<smem>>) -> (i32, i32) {
    %c0_i32 = arith.constant 0 : i32
    %c0_i32_0 = arith.constant 0 : i32
    %c0_i32_1 = arith.constant 0 : i32
    return %c0_i32, %c0_i32_0 : i32, i32
  }
  func.func @transform_9(%arg0: i32, %arg1: memref<2xf32, #tpu.memory_space<smem>>) -> (i32, i32) {
    %c0_i32 = arith.constant 0 : i32
    %c0_i32_0 = arith.constant 0 : i32
    %c0_i32_1 = arith.constant 0 : i32
    return %c0_i32, %c0_i32_0 : i32, i32
  }
}

</mosaic_0001>

<bundles_post_ra>
// kernel: cnf_forward.1
= control target key start
LH: loop header
LB: loop body
LE: loop exit
PB: predicated region body
PF: predicated region fallthrough
CT: control target
= control target key end

     0   :  { %s2578_s16 = smov [#allocation3]   ;;  %s4101_s0 = inlined_call_operand.vmem [shape: f32[2], index: 0, kind: input, shape index: {}]   ;;  %s4102_s1 = inlined_call_operand.vmem [shape: f32[16,128], index: 1, kind: input, shape index: {}]   ;;  %s4103_s2 = inlined_call_operand.vmem [shape: f32[16,1], index: 2, kind: input, shape index: {}]   ;;  %s4104_s3 = inlined_call_operand.vmem [shape: bf16[128,64], index: 3, kind: input, shape index: {}]   ;;  %s4105_s4 = inlined_call_operand.vmem [shape: f32[1,64], index: 4, kind: input, shape index: {}]   ;;  %s4106_s5 = inlined_call_operand.vmem [shape: f32[1,64], index: 5, kind: input, shape index: {}]   ;;  %s4107_s6 = inlined_call_operand.vmem [shape: bf16[64,128], index: 6, kind: input, shape index: {}]   ;;  %s4108_s7 = inlined_call_operand.vmem [shape: f32[1,128], index: 7, kind: input, shape index: {}]   ;;  %s4109_s8 = inlined_call_operand.vmem [shape: f32[1,64], index: 8, kind: input, shape index: {}]   ;;  %s4110_s9 = inlined_call_operand.hbm [shape: f32[16,128], index: 9, kind: output, shape index: {0}]   ;;  %s4111_s10 = inlined_call_operand.vmem [shape: f32[16,1], index: 10, kind: output, shape index: {1}]  }
   0x1   :  { %s17_s15 = sshll.u32 %s4101_s0, 4  ;;  %s18_s15 = int_to_ptr.vmem [resolvable:$true] %s17_s15 }
   0x2   :  { %20 = dma.vmem_to_smem %s18_s15, 16, %s2578_s16, [#allocation2] }
   0x3   :  { %2574 = dma.done.wait [#allocation2], 16 }
   0x4   :  { %2575 = vsyncadd [#allocation2], 4294967280 }
   0x5   :  { %23 = sfence }
   0x6   :  { %v2645_v0 = vld [vmem:[%s4104_s3 + $0x38] sm:$0xff]  ;;  %v2651_v1 = vld [vmem:[%s4104_s3 + $0x30] sm:$0xff]  ;;  %v2579_v2 = vmov 8.0   ;;  %v2580_v3 = vmov 6.0  }
   0x7   :  { %164 = vmatpush.bf16.msra.mxu0 %v2645_v0  ;;  %2373 = vrcp.f32 %v2579_v2  ;;  %243 = vmatpush.bf16.msra.mxu2 %v2645_v0 }
   0x8   :  { %2375 = vrcp.f32 %v2580_v3 }
   0x9   :  { %24 = vsyncpa [#allocation5], 0  ;;  %v2658_v4 = vld [vmem:[%s4104_s3 + $0x28] sm:$0xff]  ;;  %v2665_v8 = vld [vmem:[%s4104_s3 + $0x20] sm:$0xff]  ;;  %s2268_s16 = sld [smem:[#allocation3 + $0x1]]  ;;  %vm205_vm2 = vcmask 523264  }
   0xa   :  { %v2672_v13 = vld [vmem:[%s4104_s3 + $0x18] sm:$0xff]  ;;  %v2679_v18 = vld [vmem:[%s4104_s3 + $0x10] sm:$0xff]  ;;  %v2686_v20 = vld [vmem:[%s4104_s3 + $0x8] sm:$0xff]  ;;  %vm2243_vm3 = vcmask 7168  }
   0xb   :  { %165 = vmatpush.bf16.msra.mxu0 %v2651_v1  ;;  %244 = vmatpush.bf16.msra.mxu2 %v2651_v1  ;;  %v2693_v21 = vld [vmem:[%s4104_s3] sm:$0xff]  ;;  %v2703_v23 = vld [vmem:[%s4102_s1 + $0x8] sm:$0xff]  ;;  %v2801_v25 = vld [vmem:[%s4107_s6 + $0x18] sm:$0xff] }
   0xc   :  { %v2698_v22 = vld [vmem:[%s4102_s1] sm:$0xff]  ;;  %s2716_s1 = sld [smem:[#allocation3]]  ;;  %213 = vmatpush.bf16.msra.mxu1 %v2801_v25  ;;  %267 = vmatpush.bf16.msra.mxu3 %v2801_v25  ;;  %v2809_v26 = vld [vmem:[%s4107_s6 + $0x10] sm:$0xff]  ;;  %v2817_v27 = vld [vmem:[%s4107_s6 + $0x8] sm:$0xff] }
   0xd   :  { %v2374_v5 = vpop.eup %2373  ;;  %v115_v24 = vpack.c.bf16 %v2703_v23, %v2698_v22  ;;  %v2823_v28 = vld [vmem:[%s4107_s6] sm:$0xff] }
   0xe   :  { %v2376_v6 = vpop.eup %2375  ;;  %v46_v7 = vmul.f32 8.0, %v2374_v5  ;;  %vm50_vm0 = vweird.f32 %v2374_v5  ;;  %v2832_v29 = vld [vmem:[%s4106_s5] sm:$0x1] }
   0xf   :  { %166 = vmatpush.bf16.msra.mxu0 %v2658_v4  ;;  %v399_v9 = vmul.f32 6.0, %v2376_v6  ;;  %245 = vmatpush.bf16.msra.mxu2 %v2658_v4  ;;  %vm403_vm1 = vweird.f32 %v2376_v6  ;;  %v2842_v32 = vld [vmem:[%s4105_s4] sm:$0x1] }
  0x10   :  { %v47_v10 = vsub.f32 1.0, %v46_v7  ;;  %214 = vmatpush.bf16.msra.mxu1 %v2809_v26  ;;  %268 = vmatpush.bf16.msra.mxu3 %v2809_v26  ;;  %v2856_v40 = vld [vmem:[%s4109_s8] ss:$0 sm:$0xff] }
  0x11   :  { %v400_v11 = vsub.f32 1.0, %v399_v9  ;;  %v2872_v52 = vld [vmem:[%s4108_s7] ss:$0 sm:$0xff] }
  0x12   :  { %v48_v12 = vmul.f32 %v2374_v5, %v47_v10  ;;  %s44_s17 = ssub.f32 %s2268_s16, %s2716_s1 }
  0x13   :  { %167 = vmatpush.bf16.msra.mxu0 %v2665_v8  ;;  %v401_v14 = vmul.f32 %v2376_v6, %v400_v11  ;;  %246 = vmatpush.bf16.msra.mxu2 %v2665_v8 }
  0x14   :  { %v49_v15 = vadd.f32 %v2374_v5, %v48_v12  ;;  %215 = vmatpush.bf16.msra.mxu1 %v2817_v27  ;;  %269 = vmatpush.bf16.msra.mxu3 %v2817_v27 }
  0x15   :  { %v402_v16 = vadd.f32 %v2376_v6, %v401_v14 }
  0x16   :  { %v51_v17 = vsel %vm50_vm0, %v2374_v5, %v49_v15 }
  0x17   :  { %168 = vmatpush.bf16.msra.mxu0 %v2672_v13  ;;  %2361 = vpush %v51_v17  ;;  %v404_v19 = vsel %vm403_vm1, %v2376_v6, %v402_v16  ;;  %247 = vmatpush.bf16.msra.mxu2 %v2672_v13 }
  0x18   :  { %2363 = vpush %v404_v19  ;;  %216 = vmatpush.bf16.msra.mxu1 %v2823_v28  ;;  %270 = vmatpush.bf16.msra.mxu3 %v2823_v28 }
  0x1b   :  { %169 = vmatpush.bf16.msra.mxu0 %v2679_v18  ;;  %248 = vmatpush.bf16.msra.mxu2 %v2679_v18 }
  0x1c   :  { %296 = vmatpush.bf16.msrb.mxu1 %v2645_v0  ;;  %320 = vmatpush.bf16.msrb.mxu3 %v2801_v25 }
  0x1f   :  { %170 = vmatpush.bf16.msra.mxu0 %v2686_v20  ;;  %249 = vmatpush.bf16.msra.mxu2 %v2686_v20 }
  0x20   :  { %297 = vmatpush.bf16.msrb.mxu1 %v2651_v1  ;;  %321 = vmatpush.bf16.msrb.mxu3 %v2809_v26 }
  0x23   :  { %171 = vmatpush.bf16.msra.mxu0 %v2693_v21  ;;  %250 = vmatpush.bf16.msra.mxu2 %v2693_v21 }
  0x24   :  { %298 = vmatpush.bf16.msrb.mxu1 %v2658_v4  ;;  %322 = vmatpush.bf16.msrb.mxu3 %v2817_v27 }
  0x26   :  { %172 = vmatmul.bf16.vlgmr.msra.gmra.mxu0 %v115_v24 }
  0x27   :  { %350 = vmatpush.bf16.msrb.mxu0 %v2645_v0  ;;  %374 = vmatpush.bf16.msrb.mxu2 %v2801_v25 }
  0x28   :  { %299 = vmatpush.bf16.msrb.mxu1 %v2665_v8  ;;  %323 = vmatpush.bf16.msrb.mxu3 %v2823_v28 }
  0x2b   :  { %351 = vmatpush.bf16.msrb.mxu0 %v2651_v1  ;;  %375 = vmatpush.bf16.msrb.mxu2 %v2809_v26 }
  0x2c   :  { %300 = vmatpush.bf16.msrb.mxu1 %v2672_v13 }
  0x2f   :  { %352 = vmatpush.bf16.msrb.mxu0 %v2658_v4  ;;  %376 = vmatpush.bf16.msrb.mxu2 %v2817_v27 }
  0x30   :  { %301 = vmatpush.bf16.msrb.mxu1 %v2679_v18 }
  0x33   :  { %353 = vmatpush.bf16.msrb.mxu0 %v2665_v8  ;;  %377 = vmatpush.bf16.msrb.mxu2 %v2823_v28 }
  0x34   :  { %302 = vmatpush.bf16.msrb.mxu1 %v2686_v20 }
  0x37   :  { %354 = vmatpush.bf16.msrb.mxu0 %v2672_v13 }
  0x38   :  { %303 = vmatpush.bf16.msrb.mxu1 %v2693_v21 }
  0x3b   :  { %355 = vmatpush.bf16.msrb.mxu0 %v2679_v18 }
  0x3f   :  { %356 = vmatpush.bf16.msrb.mxu0 %v2686_v20 }
  0x43   :  { %357 = vmatpush.bf16.msrb.mxu0 %v2693_v21 }
  0x47   :  { %617 = vmatpush.bf16.msra.mxu0 %v2645_v0 }
  0x48   :  { %s2362_s18 = spop %2361 }
  0x49   :  { %s2723_s19 = smul.f32 %s2362_s18, %s44_s17 }
  0x4b   :  { %618 = vmatpush.bf16.msra.mxu0 %v2651_v1  ;;  %s2727_s20 = smul.f32 0.5, %s2723_s19  ;;  %s2731_s0 = sadd.f32 %s2723_s19, %s2716_s1 }
  0x4c   :  { %s92_s21 = smul.f32 0.0, %s2723_s19 }
  0x4d   :  { %s693_s24 = smul.f32 2.0, %s2723_s19  ;;  %v2878_v54 = vstv %s2727_s20  ;;  %s4113_s29 = sadd.f32 %s2731_s0, %s2727_s20 }
  0x4e   :  { %s2741_s25 = sadd.f32 %s92_s21, %s2716_s1  ;;  %s951_s28 = smul.f32 3.0, %s2723_s19 }
  0x4f   :  { %619 = vmatpush.bf16.msra.mxu0 %v2658_v4  ;;  %s2744_s26 = sadd.f32 %s693_s24, %s2716_s1  ;;  %s1209_s30 = smul.f32 4.0, %s2723_s19 }
  0x50   :  { %s101_s27 = sadd.f32 %s2727_s20, %s2741_s25  ;;  %s1467_s16 = smul.f32 5.0, %s2723_s19  ;;  %v94_v30 = vstv %s2741_s25 }
  0x51   :  { %s2759_s13 = sadd.f32 %s951_s28, %s2716_s1  ;;  %s1725_s18 = smul.f32 6.0, %s2723_s19  ;;  %v95_v31 = vmul.f32 %v94_v30, %v2832_v29 }
  0x52   :  { %s2762_s14 = sadd.f32 %s1209_s30, %s2716_s1  ;;  %s1983_s15 = smul.f32 7.0, %s2723_s19  ;;  %v102_v62 = vstv %s101_s27 }
  0x53   :  { %620 = vmatpush.bf16.msra.mxu0 %v2665_v8  ;;  %s2776_s28 = sadd.f32 %s1467_s16, %s2716_s1  ;;  %v96_v33 = vadd.f32 %v95_v31, %v2842_v32  ;;  %v103_v63 = vmul.f32 %v102_v62, %v2832_v29 }
  0x54   :  { %s2779_s12 = sadd.f32 %s1725_s18, %s2716_s1 }
  0x55   :  { %s1475_s30 = sadd.f32 %s2776_s28, %s2727_s20  ;;  %v98_v34 = vperm.slane %v96_v33, 0  ;;  %v104_v2 = vadd.f32 %v103_v63, %v2842_v32 }
  0x56   :  { %s1482_s11 = sadd.f32 %s2776_s28, %s2723_s19 }
  0x57   :  { %621 = vmatpush.bf16.msra.mxu0 %v2672_v13  ;;  %s1733_s23 = sadd.f32 %s2779_s12, %s2727_s20  ;;  %v106_v3 = vperm.slane %v104_v2, 0 }
  0x58   :  { %s2792_s22 = sadd.f32 %s1983_s15, %s2716_s1 }
  0x59   :  { %s4112_s27 = sadd.f32 %s2741_s25, %s2723_s19  ;;  %s2364_s25 = spop %2363 }
  0x5a   :  { %s1991_s24 = sadd.f32 %s2792_s22, %s2727_s20  ;;  %s406_s1 = smul.f32 %s2364_s25, %s2723_s19 }
  0x5b   :  { %622 = vmatpush.bf16.msra.mxu0 %v2679_v18  ;;  %s1998_s16 = sadd.f32 %s2792_s22, %s2723_s19  ;;  %s2583_s25 = smov 8  }
  0x5c   :  { %s4114_s15 = sadd.f32 %s2731_s0, %s2723_s19 }
  0x5f   :  { %623 = vmatpush.bf16.msra.mxu0 %v2686_v20 }
  0x63   :  { %624 = vmatpush.bf16.msra.mxu0 %v2693_v21 }
  0xa3   :  { %v173_v35 = vpop.f32.mrf.mxu0 }
  0xa4   :  { %v174_v36 = vadd.f32 %v173_v35, %v98_v34 }
  0xa6   :  { %2377 = vtanh.f32 %v174_v36 }
  0xab   :  { %v175_v37 = vpop.f32.mrf.mxu0 }
  0xac   :  { %v2378_v38 = vpop.eup %2377  ;;  %v176_v39 = vadd.f32 %v175_v37, %v98_v34 }
  0xad   :  { %v223_v41 = vmul.f32 %v2378_v38, %v2378_v38 }
  0xae   :  { %2379 = vtanh.f32 %v176_v39 }
  0xaf   :  { %v225_v42 = vsub.f32 1.0, %v223_v41 }
  0xb1   :  { %v227_v43 = vmul.f32 %v2856_v40, %v225_v42 }
  0xb3   :  { %v229_v44 = vsel %vm205_vm2, %v227_v43, 0.0 }
  0xb4   :  { %v2380_v45 = vpop.eup %2379  ;;  %230 = vadd.xlane.f32.xlu0 %v229_v44 }
  0xb5   :  { %v180_v46 = vpack.c.bf16 %v2380_v45, %v2378_v38  ;;  %v224_v47 = vmul.f32 %v2380_v45, %v2380_v45 }
  0xb7   :  { %2317 = vmatmul.msk.bf16.vlgmr.msra.gmra.mxu1 %vm205_vm2, %v180_v46  ;;  %v226_v48 = vsub.f32 1.0, %v224_v47 }
  0xb8   :  { %482 = vmatpush.bf16.msra.mxu1 %v2801_v25 }
  0xb9   :  { %v228_v49 = vmul.f32 %v2856_v40, %v226_v48 }
  0xbb   :  { %v232_v50 = vsel %vm205_vm2, %v228_v49, 0.0 }
  0xbc   :  { %233 = vadd.xlane.f32.xlu0 %v232_v50  ;;  %483 = vmatpush.bf16.msra.mxu1 %v2809_v26 }
  0xc0   :  { %484 = vmatpush.bf16.msra.mxu1 %v2817_v27 }
  0xc4   :  { %485 = vmatpush.bf16.msra.mxu1 %v2823_v28 }
 0x127   :  { %v231_v33 = vpop.xlane.xlu0 %230 }
 0x128   :  { %v235_v36 = vsub.f32 0.0, %v231_v33 }
 0x134   :  { %v218_v51 = vpop.f32.mrf.mxu1 }
 0x135   :  { %v2875_v53 = vadd.f32 %v2872_v52, %v218_v51 }
 0x137   :  { %v238_v56 = vmul.f32 %v2878_v54, %v2875_v53 }
 0x139   :  { %v240_v59 = vadd.f32 %v238_v56, %v2698_v22 }
 0x13c   :  { %v220_v55 = vpop.f32.mrf.mxu1 }
 0x13d   :  { %v2883_v57 = vadd.f32 %v2872_v52, %v220_v55 }
 0x13f   :  { %v239_v58 = vmul.f32 %v2878_v54, %v2883_v57 }
 0x141   :  { %v241_v60 = vadd.f32 %v239_v58, %v2703_v23 }
 0x143   :  { %v242_v61 = vpack.c.bf16 %v241_v60, %v240_v59 }
 0x145   :  { %251 = vmatmul.bf16.vlgmr.msra.gmra.mxu2 %v242_v61 }
 0x146   :  { %511 = vmatpush.bf16.msra.mxu2 %v2645_v0 }
 0x14a   :  { %512 = vmatpush.bf16.msra.mxu2 %v2651_v1 }
 0x14e   :  { %513 = vmatpush.bf16.msra.mxu2 %v2658_v4 }
 0x152   :  { %514 = vmatpush.bf16.msra.mxu2 %v2665_v8 }
 0x156   :  { %515 = vmatpush.bf16.msra.mxu2 %v2672_v13 }
 0x15a   :  { %516 = vmatpush.bf16.msra.mxu2 %v2679_v18 }
 0x15e   :  { %517 = vmatpush.bf16.msra.mxu2 %v2686_v20 }
 0x162   :  { %518 = vmatpush.bf16.msra.mxu2 %v2693_v21 }
 0x1c8   :  { %v252_v5 = vpop.f32.mrf.mxu2 }
 0x1c9   :  { %v253_v6 = vadd.f32 %v252_v5, %v106_v3 }
 0x1cb   :  { %2381 = vtanh.f32 %v253_v6 }
 0x1d0   :  { %v254_v7 = vpop.f32.mrf.mxu2 }
 0x1d1   :  { %v2382_v9 = vpop.eup %2381  ;;  %v255_v10 = vadd.f32 %v254_v7, %v106_v3 }
 0x1d2   :  { %v277_v11 = vmul.f32 %v2382_v9, %v2382_v9 }
 0x1d3   :  { %2383 = vtanh.f32 %v255_v10 }
 0x1d4   :  { %v279_v12 = vsub.f32 1.0, %v277_v11 }
 0x1d6   :  { %v281_v14 = vmul.f32 %v2856_v40, %v279_v12 }
 0x1d8   :  { %v283_v15 = vsel %vm205_vm2, %v281_v14, 0.0 }
 0x1d9   :  { %v2384_v16 = vpop.eup %2383  ;;  %284 = vadd.xlane.f32.xlu1 %v283_v15 }
 0x1da   :  { %v259_v17 = vpack.c.bf16 %v2384_v16, %v2382_v9  ;;  %v278_v19 = vmul.f32 %v2384_v16, %v2384_v16 }
 0x1dc   :  { %2318 = vmatmul.msk.bf16.vlgmr.msra.gmra.mxu3 %vm205_vm2, %v259_v17  ;;  %v280_v24 = vsub.f32 1.0, %v278_v19 }
 0x1dd   :  { %458 = vmatpush.bf16.msra.mxu3 %v2645_v0 }
 0x1de   :  { %v282_v30 = vmul.f32 %v2856_v40, %v280_v24 }
 0x1e0   :  { %v286_v31 = vsel %vm205_vm2, %v282_v30, 0.0  ;;  %v2943_v30 = vstv %s2723_s19 }
 0x1e1   :  { %287 = vadd.xlane.f32.xlu1 %v286_v31  ;;  %459 = vmatpush.bf16.msra.mxu3 %v2651_v1 }
 0x1e5   :  { %460 = vmatpush.bf16.msra.mxu3 %v2658_v4 }
 0x1e9   :  { %461 = vmatpush.bf16.msra.mxu3 %v2665_v8 }
 0x1ed   :  { %462 = vmatpush.bf16.msra.mxu3 %v2672_v13 }
 0x1f1   :  { %463 = vmatpush.bf16.msra.mxu3 %v2679_v18 }
 0x1f5   :  { %464 = vmatpush.bf16.msra.mxu3 %v2686_v20 }
 0x1f9   :  { %465 = vmatpush.bf16.msra.mxu3 %v2693_v21 }
 0x24c   :  { %v285_v34 = vpop.xlane.xlu1 %284 }
 0x24d   :  { %v289_v35 = vsub.f32 0.0, %v285_v34 }
 0x24f   :  { %v422_v37 = vmul.f32 2.0, %v289_v35 }
 0x251   :  { %v424_v38 = vadd.f32 %v422_v37, %v235_v36 }
 0x25f   :  { %v272_v39 = vpop.f32.mrf.mxu3 }
 0x260   :  { %v273_v41 = vadd.f32 %v2872_v52, %v272_v39 }
 0x262   :  { %v291_v43 = vmul.f32 %v273_v41, %v2878_v54  ;;  %v407_v12 = vmul.f32 2.0, %v273_v41 }
 0x264   :  { %v293_v46 = vadd.f32 %v291_v43, %v2698_v22  ;;  %v409_v16 = vadd.f32 %v407_v12, %v2875_v53 }
 0x267   :  { %v274_v42 = vpop.f32.mrf.mxu3 }
 0x268   :  { %v275_v44 = vadd.f32 %v2872_v52, %v274_v42 }
 0x26a   :  { %v292_v45 = vmul.f32 %v275_v44, %v2878_v54  ;;  %v408_v24 = vmul.f32 2.0, %v275_v44 }
 0x26c   :  { %v294_v47 = vadd.f32 %v292_v45, %v2703_v23  ;;  %v410_v35 = vadd.f32 %v408_v24, %v2883_v57  ;;  %v109_v57 = vstv %s4112_s27  ;;  %s4120_s27 = sadd.f32 %s2762_s14, %s2723_s19 }
 0x26d   :  { %v110_v42 = vmul.f32 %v109_v57, %v2832_v29 }
 0x26e   :  { %v295_v48 = vpack.c.bf16 %v294_v47, %v293_v46 }
 0x26f   :  { %v111_v43 = vadd.f32 %v110_v42, %v2842_v32 }
 0x270   :  { %304 = vmatmul.bf16.vlgmr.msrb.gmra.mxu1 %v295_v48 }
 0x271   :  { %564 = vmatpush.bf16.msrb.mxu1 %v2645_v0  ;;  %v113_v44 = vperm.slane %v111_v43, 0 }
 0x275   :  { %565 = vmatpush.bf16.msrb.mxu1 %v2651_v1 }
 0x279   :  { %566 = vmatpush.bf16.msrb.mxu1 %v2658_v4 }
 0x27d   :  { %567 = vmatpush.bf16.msrb.mxu1 %v2665_v8 }
 0x281   :  { %568 = vmatpush.bf16.msrb.mxu1 %v2672_v13 }
 0x285   :  { %569 = vmatpush.bf16.msrb.mxu1 %v2679_v18 }
 0x289   :  { %570 = vmatpush.bf16.msrb.mxu1 %v2686_v20 }
 0x28d   :  { %571 = vmatpush.bf16.msrb.mxu1 %v2693_v21 }
 0x2ed   :  { %v305_v49 = vpop.f32.mrf.mxu1 }
 0x2ee   :  { %v306_v50 = vadd.f32 %v305_v49, %v106_v3 }
 0x2f0   :  { %2385 = vtanh.f32 %v306_v50 }
 0x2f5   :  { %v307_v51 = vpop.f32.mrf.mxu1 }
 0x2f6   :  { %v2386_v55 = vpop.eup %2385  ;;  %v308_v56 = vadd.f32 %v307_v51, %v106_v3 }
 0x2f7   :  { %v330_v58 = vmul.f32 %v2386_v55, %v2386_v55 }
 0x2f8   :  { %2387 = vtanh.f32 %v308_v56 }
 0x2f9   :  { %v332_v59 = vsub.f32 1.0, %v330_v58 }
 0x2fb   :  { %v334_v60 = vmul.f32 %v2856_v40, %v332_v59 }
 0x2fd   :  { %v336_v61 = vsel %vm205_vm2, %v334_v60, 0.0 }
 0x2fe   :  { %v2388_v62 = vpop.eup %2387  ;;  %337 = vadd.xlane.f32.xlu2 %v336_v61 }
 0x2ff   :  { %v312_v63 = vpack.c.bf16 %v2388_v62, %v2386_v55  ;;  %v331_v2 = vmul.f32 %v2388_v62, %v2388_v62 }
 0x301   :  { %2319 = vmatmul.msk.bf16.vlgmr.msrb.gmra.mxu3 %vm205_vm2, %v312_v63  ;;  %v333_v5 = vsub.f32 1.0, %v331_v2 }
 0x302   :  { %535 = vmatpush.bf16.msrb.mxu3 %v2801_v25 }
 0x303   :  { %v335_v6 = vmul.f32 %v2856_v40, %v333_v5 }
 0x305   :  { %v339_v3 = vsel %vm205_vm2, %v335_v6, 0.0 }
 0x306   :  { %340 = vadd.xlane.f32.xlu2 %v339_v3  ;;  %536 = vmatpush.bf16.msrb.mxu3 %v2809_v26 }
 0x30a   :  { %537 = vmatpush.bf16.msrb.mxu3 %v2817_v27 }
 0x30e   :  { %538 = vmatpush.bf16.msrb.mxu3 %v2823_v28 }
 0x371   :  { %v338_v7 = vpop.xlane.xlu2 %337 }
 0x372   :  { %v342_v9 = vsub.f32 0.0, %v338_v7 }
 0x374   :  { %v426_v10 = vmul.f32 2.0, %v342_v9  ;;  %v2972_v9 = vstv %s406_s1  ;;  %s4117_s1 = sadd.f32 %s2759_s13, %s2727_s20 }
 0x376   :  { %v2938_v11 = vadd.f32 %v426_v10, %v424_v38 }
 0x384   :  { %v325_v14 = vpop.f32.mrf.mxu3 }
 0x385   :  { %v326_v15 = vadd.f32 %v2872_v52, %v325_v14 }
 0x387   :  { %v411_v17 = vmul.f32 2.0, %v326_v15  ;;  %v345_v33 = vmul.f32 %v2943_v30, %v326_v15 }
 0x389   :  { %v413_v19 = vadd.f32 %v411_v17, %v409_v16  ;;  %v347_v38 = vadd.f32 %v345_v33, %v2698_v22 }
 0x38c   :  { %v327_v31 = vpop.f32.mrf.mxu3 }
 0x38d   :  { %v328_v34 = vadd.f32 %v2872_v52, %v327_v31 }
 0x38f   :  { %v346_v36 = vmul.f32 %v2943_v30, %v328_v34  ;;  %v412_v37 = vmul.f32 2.0, %v328_v34 }
 0x391   :  { %v348_v53 = vadd.f32 %v346_v36, %v2703_v23  ;;  %v414_v39 = vadd.f32 %v412_v37, %v410_v35 }
 0x393   :  { %v349_v41 = vpack.c.bf16 %v348_v53, %v347_v38 }
 0x395   :  { %358 = vmatmul.bf16.vlgmr.msrb.gmra.mxu0 %v349_v41 }
 0x396   :  { %793 = vmatpush.bf16.msrb.mxu0 %v2801_v25 }
 0x39a   :  { %794 = vmatpush.bf16.msrb.mxu0 %v2809_v26 }
 0x39e   :  { %795 = vmatpush.bf16.msrb.mxu0 %v2817_v27 }
 0x3a2   :  { %796 = vmatpush.bf16.msrb.mxu0 %v2823_v28 }
 0x412   :  { %v359_v45 = vpop.f32.mrf.mxu0 }
 0x413   :  { %v360_v46 = vadd.f32 %v359_v45, %v113_v44 }
 0x415   :  { %2389 = vtanh.f32 %v360_v46 }
 0x41a   :  { %v361_v47 = vpop.f32.mrf.mxu0 }
 0x41b   :  { %v2390_v48 = vpop.eup %2389  ;;  %v362_v49 = vadd.f32 %v361_v47, %v113_v44 }
 0x41c   :  { %v384_v50 = vmul.f32 %v2390_v48, %v2390_v48 }
 0x41d   :  { %2391 = vtanh.f32 %v362_v49 }
 0x41e   :  { %v386_v51 = vsub.f32 1.0, %v384_v50 }
 0x420   :  { %v388_v55 = vmul.f32 %v2856_v40, %v386_v51 }
 0x422   :  { %v390_v56 = vsel %vm205_vm2, %v388_v55, 0.0 }
 0x423   :  { %v2392_v58 = vpop.eup %2391  ;;  %391 = vadd.xlane.f32.xlu0 %v390_v56 }
 0x424   :  { %v366_v59 = vpack.c.bf16 %v2392_v58, %v2390_v48  ;;  %v385_v60 = vmul.f32 %v2392_v58, %v2392_v58 }
 0x426   :  { %2320 = vmatmul.msk.bf16.vlgmr.msrb.gmra.mxu2 %vm205_vm2, %v366_v59  ;;  %v387_v61 = vsub.f32 1.0, %v385_v60  ;;  %v444_v59 = vstv %s4113_s29  ;;  %s4115_s29 = sadd.f32 %s2744_s26, %s2727_s20 }
 0x427   :  { %641 = vmatpush.bf16.msrb.mxu2 %v2801_v25  ;;  %v445_v60 = vmul.f32 %v444_v59, %v2832_v29 }
 0x428   :  { %v389_v62 = vmul.f32 %v2856_v40, %v387_v61 }
 0x429   :  { %v446_v61 = vadd.f32 %v445_v60, %v2842_v32 }
 0x42a   :  { %v393_v63 = vsel %vm205_vm2, %v389_v62, 0.0 }
 0x42b   :  { %394 = vadd.xlane.f32.xlu1 %v393_v63  ;;  %642 = vmatpush.bf16.msrb.mxu2 %v2809_v26  ;;  %v448_v62 = vperm.slane %v446_v61, 0 }
 0x42f   :  { %643 = vmatpush.bf16.msrb.mxu2 %v2817_v27 }
 0x433   :  { %644 = vmatpush.bf16.msrb.mxu2 %v2823_v28 }
 0x4a9   :  { %v379_v2 = vpop.f32.mrf.mxu2 }
 0x4aa   :  { %v380_v5 = vadd.f32 %v2872_v52, %v379_v2 }
 0x4ac   :  { %v415_v6 = vadd.f32 %v413_v19, %v380_v5  ;;  %v437_v19 = vstv %s2731_s0 }
 0x4ad   :  { %v438_v24 = vmul.f32 %v437_v19, %v2832_v29 }
 0x4ae   :  { %v418_v10 = vmul.f32 %v2972_v9, %v415_v6 }
 0x4b0   :  { %v2977_v15 = vadd.f32 %v418_v10, %v2698_v22  ;;  %v439_v22 = vadd.f32 %v438_v24, %v2842_v32 }
 0x4b1   :  { %v381_v3 = vpop.f32.mrf.mxu2 }
 0x4b2   :  { %v382_v7 = vadd.f32 %v2872_v52, %v381_v3  ;;  %v441_v31 = vperm.slane %v439_v22, 0 }
 0x4b4   :  { %v416_v12 = vadd.f32 %v414_v39, %v382_v7 }
 0x4b6   :  { %v419_v14 = vmul.f32 %v2972_v9, %v416_v12 }
 0x4b8   :  { %v2980_v16 = vadd.f32 %v419_v14, %v2703_v23 }
 0x4ba   :  { %v457_v17 = vpack.c.bf16 %v2980_v16, %v2977_v15 }
 0x4bc   :  { %466 = vmatmul.bf16.vlgmr.msra.gmra.mxu3 %v457_v17 }
 0x4bd   :  { %588 = vmatpush.bf16.msra.mxu3 %v2801_v25 }
 0x4c1   :  { %589 = vmatpush.bf16.msra.mxu3 %v2809_v26 }
 0x4c5   :  { %590 = vmatpush.bf16.msra.mxu3 %v2817_v27 }
 0x4c9   :  { %591 = vmatpush.bf16.msra.mxu3 %v2823_v28 }
 0x53f   :  { %v467_v23 = vpop.f32.mrf.mxu3 }
 0x540   :  { %v468_v33 = vadd.f32 %v467_v23, %v441_v31 }
 0x542   :  { %2393 = vtanh.f32 %v468_v33 }
 0x547   :  { %v469_v34 = vpop.f32.mrf.mxu3 }
 0x548   :  { %v2394_v35 = vpop.eup %2393  ;;  %v470_v36 = vadd.f32 %v469_v34, %v441_v31 }
 0x549   :  { %v492_v37 = vmul.f32 %v2394_v35, %v2394_v35 }
 0x54a   :  { %2395 = vtanh.f32 %v470_v36 }
 0x54b   :  { %v494_v38 = vsub.f32 1.0, %v492_v37 }
 0x54d   :  { %v496_v53 = vmul.f32 %v2856_v40, %v494_v38 }
 0x54f   :  { %v498_v39 = vsel %vm205_vm2, %v496_v53, 0.0 }
 0x550   :  { %v2396_v41 = vpop.eup %2395  ;;  %499 = vadd.xlane.f32.xlu2 %v498_v39 }
 0x551   :  { %v474_v57 = vpack.c.bf16 %v2396_v41, %v2394_v35  ;;  %v493_v42 = vmul.f32 %v2396_v41, %v2396_v41 }
 0x553   :  { %2321 = vmatmul.msk.bf16.vlgmr.msra.gmra.mxu1 %vm205_vm2, %v474_v57  ;;  %v495_v43 = vsub.f32 1.0, %v493_v42 }
 0x554   :  { %740 = vmatpush.bf16.msra.mxu1 %v2801_v25 }
 0x555   :  { %v497_v44 = vmul.f32 %v2856_v40, %v495_v43 }
 0x557   :  { %v501_v45 = vsel %vm205_vm2, %v497_v44, 0.0 }
 0x558   :  { %502 = vadd.xlane.f32.xlu0 %v501_v45  ;;  %741 = vmatpush.bf16.msra.mxu1 %v2809_v26 }
 0x55c   :  { %742 = vmatpush.bf16.msra.mxu1 %v2817_v27 }
 0x560   :  { %743 = vmatpush.bf16.msra.mxu1 %v2823_v28 }
 0x5d0   :  { %v487_v46 = vpop.f32.mrf.mxu1 }
 0x5d1   :  { %v3001_v47 = vadd.f32 %v2872_v52, %v487_v46 }
 0x5d3   :  { %v506_v49 = vmul.f32 %v3001_v47, %v2878_v54 }
 0x5d5   :  { %v508_v55 = vadd.f32 %v506_v49, %v2977_v15 }
 0x5d8   :  { %v489_v48 = vpop.f32.mrf.mxu1 }
 0x5d9   :  { %v3006_v50 = vadd.f32 %v2872_v52, %v489_v48 }
 0x5db   :  { %v507_v51 = vmul.f32 %v3006_v50, %v2878_v54 }
 0x5dd   :  { %v509_v56 = vadd.f32 %v507_v51, %v2980_v16 }
 0x5df   :  { %v510_v58 = vpack.c.bf16 %v509_v56, %v508_v55 }
 0x5e1   :  { %519 = vmatmul.bf16.vlgmr.msra.gmra.mxu2 %v510_v58 }
 0x5e2   :  { %769 = vmatpush.bf16.msra.mxu2 %v2645_v0 }
 0x5e6   :  { %770 = vmatpush.bf16.msra.mxu2 %v2651_v1 }
 0x5ea   :  { %771 = vmatpush.bf16.msra.mxu2 %v2658_v4 }
 0x5ee   :  { %772 = vmatpush.bf16.msra.mxu2 %v2665_v8 }
 0x5f2   :  { %773 = vmatpush.bf16.msra.mxu2 %v2672_v13 }
 0x5f6   :  { %774 = vmatpush.bf16.msra.mxu2 %v2679_v18 }
 0x5fa   :  { %775 = vmatpush.bf16.msra.mxu2 %v2686_v20 }
 0x5fe   :  { %776 = vmatpush.bf16.msra.mxu2 %v2693_v21 }
 0x664   :  { %v520_v63 = vpop.f32.mrf.mxu2 }
 0x665   :  { %v521_v2 = vadd.f32 %v520_v63, %v448_v62 }
 0x667   :  { %2397 = vtanh.f32 %v521_v2 }
 0x66c   :  { %v522_v5 = vpop.f32.mrf.mxu2 }
 0x66d   :  { %v2398_v6 = vpop.eup %2397  ;;  %v523_v3 = vadd.f32 %v522_v5, %v448_v62 }
 0x66e   :  { %v545_v7 = vmul.f32 %v2398_v6, %v2398_v6 }
 0x66f   :  { %2399 = vtanh.f32 %v523_v3 }
 0x670   :  { %v547_v10 = vsub.f32 1.0, %v545_v7 }
 0x672   :  { %v549_v12 = vmul.f32 %v2856_v40, %v547_v10 }
 0x674   :  { %v551_v14 = vsel %vm205_vm2, %v549_v12, 0.0 }
 0x675   :  { %v2400_v17 = vpop.eup %2399  ;;  %552 = vadd.xlane.f32.xlu1 %v551_v14 }
 0x676   :  { %v527_v19 = vpack.c.bf16 %v2400_v17, %v2398_v6  ;;  %v546_v24 = vmul.f32 %v2400_v17, %v2400_v17 }
 0x678   :  { %2322 = vmatmul.msk.bf16.vlgmr.msrb.gmra.mxu3 %vm205_vm2, %v527_v19  ;;  %v548_v22 = vsub.f32 1.0, %v546_v24 }
 0x679   :  { %716 = vmatpush.bf16.msrb.mxu3 %v2645_v0 }
 0x67a   :  { %v550_v31 = vmul.f32 %v2856_v40, %v548_v22 }
 0x67c   :  { %v554_v23 = vsel %vm205_vm2, %v550_v31, 0.0 }
 0x67d   :  { %555 = vadd.xlane.f32.xlu2 %v554_v23  ;;  %717 = vmatpush.bf16.msrb.mxu3 %v2651_v1 }
 0x681   :  { %718 = vmatpush.bf16.msrb.mxu3 %v2658_v4 }
 0x685   :  { %719 = vmatpush.bf16.msrb.mxu3 %v2665_v8 }
 0x689   :  { %720 = vmatpush.bf16.msrb.mxu3 %v2672_v13 }
 0x68d   :  { %721 = vmatpush.bf16.msrb.mxu3 %v2679_v18 }
 0x691   :  { %722 = vmatpush.bf16.msrb.mxu3 %v2686_v20 }
 0x695   :  { %723 = vmatpush.bf16.msrb.mxu3 %v2693_v21 }
 0x6fb   :  { %v540_v33 = vpop.f32.mrf.mxu3 }
 0x6fc   :  { %v541_v34 = vadd.f32 %v2872_v52, %v540_v33 }
 0x6fe   :  { %v559_v36 = vmul.f32 %v541_v34, %v2878_v54 }
 0x700   :  { %v561_v53 = vadd.f32 %v559_v36, %v2977_v15 }
 0x703   :  { %v542_v35 = vpop.f32.mrf.mxu3 }
 0x704   :  { %v543_v37 = vadd.f32 %v2872_v52, %v542_v35 }
 0x706   :  { %v560_v38 = vmul.f32 %v543_v37, %v2878_v54  ;;  %v666_v7 = vmul.f32 2.0, %v543_v37 }
 0x708   :  { %v562_v39 = vadd.f32 %v560_v38, %v2980_v16  ;;  %v668_v17 = vadd.f32 %v666_v7, %v3006_v50  ;;  %v451_v50 = vstv %s4114_s15 }
 0x709   :  { %v452_v33 = vmul.f32 %v451_v50, %v2832_v29 }
 0x70a   :  { %v563_v41 = vpack.c.bf16 %v562_v39, %v561_v53 }
 0x70c   :  { %572 = vmatmul.bf16.vlgmr.msrb.gmra.mxu1 %v563_v41 }
 0x70d   :  { %822 = vmatpush.bf16.msrb.mxu1 %v2645_v0 }
 0x711   :  { %823 = vmatpush.bf16.msrb.mxu1 %v2651_v1 }
 0x715   :  { %824 = vmatpush.bf16.msrb.mxu1 %v2658_v4 }
 0x719   :  { %825 = vmatpush.bf16.msrb.mxu1 %v2665_v8 }
 0x71d   :  { %826 = vmatpush.bf16.msrb.mxu1 %v2672_v13 }
 0x721   :  { %827 = vmatpush.bf16.msrb.mxu1 %v2679_v18 }
 0x725   :  { %828 = vmatpush.bf16.msrb.mxu1 %v2686_v20 }
 0x729   :  { %829 = vmatpush.bf16.msrb.mxu1 %v2693_v21 }
 0x789   :  { %v573_v57 = vpop.f32.mrf.mxu1 }
 0x78a   :  { %v574_v42 = vadd.f32 %v573_v57, %v448_v62 }
 0x78c   :  { %2401 = vtanh.f32 %v574_v42 }
 0x791   :  { %v575_v43 = vpop.f32.mrf.mxu1 }
 0x792   :  { %v2402_v44 = vpop.eup %2401  ;;  %v576_v45 = vadd.f32 %v575_v43, %v448_v62  ;;  %v665_v62 = vmul.f32 2.0, %v541_v34 }
 0x793   :  { %v598_v46 = vmul.f32 %v2402_v44, %v2402_v44 }
 0x794   :  { %2403 = vtanh.f32 %v576_v45  ;;  %v667_v5 = vadd.f32 %v665_v62, %v3001_v47 }
 0x795   :  { %v600_v48 = vsub.f32 1.0, %v598_v46 }
 0x797   :  { %v602_v49 = vmul.f32 %v2856_v40, %v600_v48 }
 0x799   :  { %v604_v51 = vsel %vm205_vm2, %v602_v49, 0.0 }
 0x79a   :  { %v2404_v55 = vpop.eup %2403  ;;  %605 = vadd.xlane.f32.xlu0 %v604_v51 }
 0x79b   :  { %v580_v56 = vpack.c.bf16 %v2404_v55, %v2402_v44  ;;  %v599_v58 = vmul.f32 %v2404_v55, %v2404_v55 }
 0x79d   :  { %2323 = vmatmul.msk.bf16.vlgmr.msra.gmra.mxu3 %vm205_vm2, %v580_v56  ;;  %v601_v59 = vsub.f32 1.0, %v599_v58 }
 0x79e   :  { %846 = vmatpush.bf16.msra.mxu3 %v2801_v25 }
 0x79f   :  { %v603_v60 = vmul.f32 %v2856_v40, %v601_v59 }
 0x7a1   :  { %v607_v61 = vsel %vm205_vm2, %v603_v60, 0.0 }
 0x7a2   :  { %608 = vadd.xlane.f32.xlu1 %v607_v61  ;;  %847 = vmatpush.bf16.msra.mxu3 %v2809_v26 }
 0x7a6   :  { %848 = vmatpush.bf16.msra.mxu3 %v2817_v27 }
 0x7aa   :  { %849 = vmatpush.bf16.msra.mxu3 %v2823_v28 }
 0x820   :  { %v593_v63 = vpop.f32.mrf.mxu3 }
 0x821   :  { %v594_v2 = vadd.f32 %v2872_v52, %v593_v63 }
 0x823   :  { %v669_v6 = vmul.f32 2.0, %v594_v2  ;;  %v612_v12 = vmul.f32 %v594_v2, %v2943_v30  ;;  %v3106_v2 = vld [vmem:[%s4104_s3 + $0x38] sm:$0xff] }
 0x825   :  { %v671_v3 = vadd.f32 %v669_v6, %v667_v5  ;;  %v614_v22 = vadd.f32 %v612_v12, %v2977_v15  ;;  %v3112_v5 = vld [vmem:[%s4104_s3 + $0x30] sm:$0xff] }
 0x828   :  { %v595_v10 = vpop.f32.mrf.mxu3 }
 0x829   :  { %v596_v14 = vadd.f32 %v2872_v52, %v595_v10 }
 0x82b   :  { %v613_v19 = vmul.f32 %v596_v14, %v2943_v30  ;;  %v670_v24 = vmul.f32 2.0, %v596_v14 }
 0x82d   :  { %v615_v31 = vadd.f32 %v613_v19, %v2980_v16  ;;  %v672_v47 = vadd.f32 %v670_v24, %v668_v17 }
 0x82f   :  { %v616_v23 = vpack.c.bf16 %v615_v31, %v614_v22 }
 0x831   :  { %625 = vmatmul.bf16.vlgmr.msra.gmra.mxu0 %v616_v23 }
 0x832   :  { %875 = vmatpush.bf16.msra.mxu0 %v2645_v0  ;;  %v453_v0 = vadd.f32 %v452_v33, %v2842_v32 }
 0x834   :  { %v455_v34 = vperm.slane %v453_v0, 0 }
 0x836   :  { %876 = vmatpush.bf16.msra.mxu0 %v2651_v1 }
 0x83a   :  { %877 = vmatpush.bf16.msra.mxu0 %v2658_v4 }
 0x83e   :  { %878 = vmatpush.bf16.msra.mxu0 %v2665_v8 }
 0x842   :  { %879 = vmatpush.bf16.msra.mxu0 %v2672_v13 }
 0x846   :  { %880 = vmatpush.bf16.msra.mxu0 %v2679_v18 }
 0x84a   :  { %881 = vmatpush.bf16.msra.mxu0 %v2686_v20 }
 0x84e   :  { %882 = vmatpush.bf16.msra.mxu0 %v2693_v21 }
 0x8ae   :  { %v626_v1 = vpop.f32.mrf.mxu0 }
 0x8af   :  { %v627_v35 = vadd.f32 %v626_v1, %v455_v34 }
 0x8b1   :  { %2405 = vtanh.f32 %v627_v35 }
 0x8b6   :  { %v628_v4 = vpop.f32.mrf.mxu0 }
 0x8b7   :  { %v2406_v36 = vpop.eup %2405  ;;  %v629_v37 = vadd.f32 %v628_v4, %v455_v34 }
 0x8b8   :  { %v651_v38 = vmul.f32 %v2406_v36, %v2406_v36 }
 0x8b9   :  { %2407 = vtanh.f32 %v629_v37 }
 0x8ba   :  { %v653_v53 = vsub.f32 1.0, %v651_v38  ;;  %v3156_v38 = vld [vmem:[%s4104_s3 + $0x20] sm:$0xff] }
 0x8bc   :  { %v655_v39 = vmul.f32 %v2856_v40, %v653_v53  ;;  %v3162_v53 = vld [vmem:[%s4104_s3 + $0x18] sm:$0xff] }
 0x8be   :  { %v657_v41 = vsel %vm205_vm2, %v655_v39, 0.0  ;;  %v3168_v39 = vld [vmem:[%s4104_s3 + $0x10] sm:$0xff] }
 0x8bf   :  { %v2408_v57 = vpop.eup %2407  ;;  %658 = vadd.xlane.f32.xlu2 %v657_v41  ;;  %v3174_v41 = vld [vmem:[%s4104_s3 + $0x8] sm:$0xff] }
 0x8c0   :  { %v633_v42 = vpack.c.bf16 %v2408_v57, %v2406_v36  ;;  %v652_v43 = vmul.f32 %v2408_v57, %v2408_v57  ;;  %v3180_v57 = vld [vmem:[%s4104_s3] sm:$0xff] }
 0x8c2   :  { %2324 = vmatmul.msk.bf16.vlgmr.msrb.gmra.mxu2 %vm205_vm2, %v633_v42  ;;  %v654_v44 = vsub.f32 1.0, %v652_v43  ;;  %v702_v42 = vstv %s4115_s29  ;;  %s4116_s29 = sadd.f32 %s2744_s26, %s2723_s19 }
 0x8c3   :  { %899 = vmatpush.bf16.msrb.mxu2 %v2801_v25  ;;  %v703_v43 = vmul.f32 %v702_v42, %v2832_v29 }
 0x8c4   :  { %v656_v45 = vmul.f32 %v2856_v40, %v654_v44 }
 0x8c5   :  { %v704_v44 = vadd.f32 %v703_v43, %v2842_v32 }
 0x8c6   :  { %v660_v46 = vsel %vm205_vm2, %v656_v45, 0.0 }
 0x8c7   :  { %661 = vadd.xlane.f32.xlu0 %v660_v46  ;;  %900 = vmatpush.bf16.msrb.mxu2 %v2809_v26  ;;  %v706_v45 = vperm.slane %v704_v44, 0 }
 0x8cb   :  { %901 = vmatpush.bf16.msrb.mxu2 %v2817_v27 }
 0x8cf   :  { %902 = vmatpush.bf16.msrb.mxu2 %v2823_v28 }
 0x945   :  { %v646_v48 = vpop.f32.mrf.mxu2 }
 0x946   :  { %v647_v49 = vadd.f32 %v2872_v52, %v646_v48 }
 0x948   :  { %v673_v51 = vadd.f32 %v671_v3, %v647_v49 }
 0x94a   :  { %v675_v58 = vmul.f32 %v673_v51, %v2972_v9 }
 0x94c   :  { %v3096_v61 = vadd.f32 %v675_v58, %v2977_v15  ;;  %v3118_v15 = vld [vmem:[%s4104_s3 + $0x28] sm:$0xff] }
 0x94d   :  { %v648_v55 = vpop.f32.mrf.mxu2 }
 0x94e   :  { %v649_v56 = vadd.f32 %v2872_v52, %v648_v55 }
 0x950   :  { %v674_v59 = vadd.f32 %v672_v47, %v649_v56 }
 0x952   :  { %v676_v60 = vmul.f32 %v674_v59, %v2972_v9 }
 0x954   :  { %v3099_v62 = vadd.f32 %v676_v60, %v2980_v16  ;;  %v695_v16 = vstv %s2744_s26 }
 0x955   :  { %v696_v6 = vmul.f32 %v695_v16, %v2832_v29 }
 0x956   :  { %v715_v63 = vpack.c.bf16 %v3099_v62, %v3096_v61 }
 0x957   :  { %v697_v3 = vadd.f32 %v696_v6, %v2842_v32 }
 0x958   :  { %724 = vmatmul.bf16.vlgmr.msrb.gmra.mxu3 %v715_v63 }
 0x959   :  { %974 = vmatpush.bf16.msrb.mxu3 %v3106_v2  ;;  %v699_v7 = vperm.slane %v697_v3, 0 }
 0x95d   :  { %975 = vmatpush.bf16.msrb.mxu3 %v3112_v5 }
 0x961   :  { %976 = vmatpush.bf16.msrb.mxu3 %v3118_v15 }
 0x965   :  { %977 = vmatpush.bf16.msrb.mxu3 %v2665_v8 }
 0x969   :  { %978 = vmatpush.bf16.msrb.mxu3 %v2672_v13 }
 0x96d   :  { %979 = vmatpush.bf16.msrb.mxu3 %v2679_v18 }
 0x971   :  { %980 = vmatpush.bf16.msrb.mxu3 %v2686_v20 }
 0x975   :  { %981 = vmatpush.bf16.msrb.mxu3 %v2693_v21 }
 0x9db   :  { %v725_v10 = vpop.f32.mrf.mxu3 }
 0x9dc   :  { %v726_v12 = vadd.f32 %v725_v10, %v699_v7 }
 0x9de   :  { %2409 = vtanh.f32 %v726_v12 }
 0x9e3   :  { %v727_v14 = vpop.f32.mrf.mxu3 }
 0x9e4   :  { %v2410_v17 = vpop.eup %2409  ;;  %v728_v8 = vadd.f32 %v727_v14, %v699_v7 }
 0x9e5   :  { %v750_v19 = vmul.f32 %v2410_v17, %v2410_v17 }
 0x9e6   :  { %2411 = vtanh.f32 %v728_v8 }
 0x9e7   :  { %v752_v13 = vsub.f32 1.0, %v750_v19 }
 0x9e9   :  { %v754_v18 = vmul.f32 %v2856_v40, %v752_v13 }
 0x9eb   :  { %v756_v20 = vsel %vm205_vm2, %v754_v18, 0.0 }
 0x9ec   :  { %v2412_v21 = vpop.eup %2411  ;;  %757 = vadd.xlane.f32.xlu1 %v756_v20 }
 0x9ed   :  { %v732_v24 = vpack.c.bf16 %v2412_v21, %v2410_v17  ;;  %v751_v22 = vmul.f32 %v2412_v21, %v2412_v21 }
 0x9ef   :  { %2325 = vmatmul.msk.bf16.vlgmr.msra.gmra.mxu1 %vm205_vm2, %v732_v24  ;;  %v753_v31 = vsub.f32 1.0, %v751_v22 }
 0x9f0   :  { %998 = vmatpush.bf16.msra.mxu1 %v2801_v25 }
 0x9f1   :  { %v755_v47 = vmul.f32 %v2856_v40, %v753_v31 }
 0x9f3   :  { %v759_v23 = vsel %vm205_vm2, %v755_v47, 0.0 }
 0x9f4   :  { %760 = vadd.xlane.f32.xlu2 %v759_v23  ;;  %999 = vmatpush.bf16.msra.mxu1 %v2809_v26 }
 0x9f8   :  { %1000 = vmatpush.bf16.msra.mxu1 %v2817_v27 }
 0x9fc   :  { %1001 = vmatpush.bf16.msra.mxu1 %v2823_v28 }
 0xa6c   :  { %v745_v50 = vpop.f32.mrf.mxu1 }
 0xa6d   :  { %v3139_v33 = vadd.f32 %v2872_v52, %v745_v50 }
 0xa6f   :  { %v764_v34 = vmul.f32 %v3139_v33, %v2878_v54 }
 0xa71   :  { %v766_v4 = vadd.f32 %v764_v34, %v3096_v61  ;;  %v3217_v34 = vld [vmem:[%s4107_s6 + $0x18] sm:$0xff] }
 0xa74   :  { %v747_v0 = vpop.f32.mrf.mxu1 }
 0xa75   :  { %v3144_v1 = vadd.f32 %v2872_v52, %v747_v0 }
 0xa77   :  { %v765_v35 = vmul.f32 %v3144_v1, %v2878_v54 }
 0xa79   :  { %v767_v36 = vadd.f32 %v765_v35, %v3099_v62 }
 0xa7b   :  { %v768_v37 = vpack.c.bf16 %v767_v36, %v766_v4  ;;  %v3225_v36 = vld [vmem:[%s4107_s6 + $0x10] sm:$0xff] }
 0xa7d   :  { %777 = vmatmul.bf16.vlgmr.msra.gmra.mxu2 %v768_v37  ;;  %v3231_v37 = vld [vmem:[%s4107_s6 + $0x8] sm:$0xff] }
 0xa7e   :  { %1027 = vmatpush.bf16.msra.mxu2 %v3106_v2 }
 0xa82   :  { %1028 = vmatpush.bf16.msra.mxu2 %v3112_v5 }
 0xa86   :  { %1029 = vmatpush.bf16.msra.mxu2 %v3118_v15 }
 0xa8a   :  { %1030 = vmatpush.bf16.msra.mxu2 %v3156_v38 }
 0xa8e   :  { %1031 = vmatpush.bf16.msra.mxu2 %v3162_v53 }
 0xa92   :  { %1032 = vmatpush.bf16.msra.mxu2 %v3168_v39 }
 0xa96   :  { %1033 = vmatpush.bf16.msra.mxu2 %v3174_v41 }
 0xa9a   :  { %1034 = vmatpush.bf16.msra.mxu2 %v3180_v57 }
 0xb00   :  { %v778_v46 = vpop.f32.mrf.mxu2 }
 0xb01   :  { %v779_v48 = vadd.f32 %v778_v46, %v706_v45 }
 0xb03   :  { %2413 = vtanh.f32 %v779_v48 }
 0xb08   :  { %v780_v49 = vpop.f32.mrf.mxu2 }
 0xb09   :  { %v2414_v51 = vpop.eup %2413  ;;  %v781_v55 = vadd.f32 %v780_v49, %v706_v45 }
 0xb0a   :  { %v803_v56 = vmul.f32 %v2414_v51, %v2414_v51 }
 0xb0b   :  { %2415 = vtanh.f32 %v781_v55 }
 0xb0c   :  { %v805_v58 = vsub.f32 1.0, %v803_v56 }
 0xb0e   :  { %v807_v59 = vmul.f32 %v2856_v40, %v805_v58 }
 0xb10   :  { %v809_v60 = vsel %vm205_vm2, %v807_v59, 0.0 }
 0xb11   :  { %v2416_v63 = vpop.eup %2415  ;;  %810 = vadd.xlane.f32.xlu0 %v809_v60 }
 0xb12   :  { %v785_v16 = vpack.c.bf16 %v2416_v63, %v2414_v51  ;;  %v804_v29 = vmul.f32 %v2416_v63, %v2416_v63 }
 0xb14   :  { %2326 = vmatmul.msk.bf16.vlgmr.msrb.gmra.mxu0 %vm205_vm2, %v785_v16  ;;  %v806_v32 = vsub.f32 1.0, %v804_v29 }
 0xb15   :  { %1051 = vmatpush.bf16.msrb.mxu0 %v2801_v25 }
 0xb16   :  { %v808_v6 = vmul.f32 %v2856_v40, %v806_v32 }
 0xb18   :  { %v812_v3 = vsel %vm205_vm2, %v808_v6, 0.0  ;;  %v3268_v6 = vld [vmem:[%s4105_s4] sm:$0x1] }
 0xb19   :  { %813 = vadd.xlane.f32.xlu1 %v812_v3  ;;  %1052 = vmatpush.bf16.msrb.mxu0 %v2809_v26 }
 0xb1d   :  { %1053 = vmatpush.bf16.msrb.mxu0 %v2817_v27 }
 0xb21   :  { %1054 = vmatpush.bf16.msrb.mxu0 %v2823_v28 }
 0xb91   :  { %v798_v7 = vpop.f32.mrf.mxu0 }
 0xb92   :  { %v799_v10 = vadd.f32 %v2872_v52, %v798_v7 }
 0xb94   :  { %v817_v14 = vmul.f32 %v799_v10, %v2878_v54  ;;  %v923_v42 = vmul.f32 2.0, %v799_v10 }
 0xb96   :  { %v819_v8 = vadd.f32 %v817_v14, %v3096_v61 }
 0xb99   :  { %v800_v12 = vpop.f32.mrf.mxu0 }
 0xb9a   :  { %v801_v17 = vadd.f32 %v2872_v52, %v800_v12 }
 0xb9c   :  { %v818_v25 = vmul.f32 %v801_v17, %v2878_v54  ;;  %v924_v49 = vmul.f32 2.0, %v801_v17 }
 0xb9e   :  { %v820_v19 = vadd.f32 %v818_v25, %v3099_v62  ;;  %v926_v58 = vadd.f32 %v924_v49, %v3144_v1  ;;  %v3262_v1 = vld [vmem:[%s4106_s5] sm:$0x1] }
 0xba0   :  { %v821_v13 = vpack.c.bf16 %v820_v19, %v819_v8 }
 0xba2   :  { %830 = vmatmul.bf16.vlgmr.msrb.gmra.mxu1 %v821_v13  ;;  %v3274_v13 = vld [vmem:[%s4109_s8] ss:$0 sm:$0xff] }
 0xba3   :  { %1080 = vmatpush.bf16.msrb.mxu1 %v3106_v2 }
 0xba7   :  { %1081 = vmatpush.bf16.msrb.mxu1 %v3112_v5 }
 0xbab   :  { %1082 = vmatpush.bf16.msrb.mxu1 %v3118_v15 }
 0xbaf   :  { %1083 = vmatpush.bf16.msrb.mxu1 %v3156_v38 }
 0xbb3   :  { %1084 = vmatpush.bf16.msrb.mxu1 %v3162_v53 }
 0xbb7   :  { %1085 = vmatpush.bf16.msrb.mxu1 %v3168_v39 }
 0xbbb   :  { %1086 = vmatpush.bf16.msrb.mxu1 %v3174_v41 }
 0xbbf   :  { %1087 = vmatpush.bf16.msrb.mxu1 %v3180_v57 }
 0xc1f   :  { %v831_v26 = vpop.f32.mrf.mxu1 }
 0xc20   :  { %v832_v27 = vadd.f32 %v831_v26, %v706_v45 }
 0xc22   :  { %2417 = vtanh.f32 %v832_v27 }
 0xc27   :  { %v833_v28 = vpop.f32.mrf.mxu1 }
 0xc28   :  { %v2418_v18 = vpop.eup %2417  ;;  %v834_v20 = vadd.f32 %v833_v28, %v706_v45  ;;  %v925_v45 = vadd.f32 %v923_v42, %v3139_v33 }
 0xc29   :  { %v856_v21 = vmul.f32 %v2418_v18, %v2418_v18 }
 0xc2a   :  { %2419 = vtanh.f32 %v834_v20 }
 0xc2b   :  { %v858_v24 = vsub.f32 1.0, %v856_v21 }
 0xc2d   :  { %v860_v22 = vmul.f32 %v2856_v40, %v858_v24 }
 0xc2f   :  { %v862_v31 = vsel %vm205_vm2, %v860_v22, 0.0 }
 0xc30   :  { %v2420_v47 = vpop.eup %2419  ;;  %863 = vadd.xlane.f32.xlu2 %v862_v31 }
 0xc31   :  { %v838_v23 = vpack.c.bf16 %v2420_v47, %v2418_v18  ;;  %v857_v50 = vmul.f32 %v2420_v47, %v2420_v47  ;;  %v3288_v47 = vld [vmem:[%s4108_s7] ss:$0 sm:$0xff] }
 0xc33   :  { %2327 = vmatmul.msk.bf16.vlgmr.msra.gmra.mxu3 %vm205_vm2, %v838_v23  ;;  %v859_v0 = vsub.f32 1.0, %v857_v50 }
 0xc34   :  { %1104 = vmatpush.bf16.msra.mxu3 %v3217_v34 }
 0xc35   :  { %v861_v35 = vmul.f32 %v2856_v40, %v859_v0  ;;  %v3237_v40 = vld [vmem:[%s4107_s6] sm:$0xff] }
 0xc37   :  { %v865_v4 = vsel %vm205_vm2, %v861_v35, 0.0 }
 0xc38   :  { %866 = vadd.xlane.f32.xlu0 %v865_v4  ;;  %1105 = vmatpush.bf16.msra.mxu3 %v3225_v36 }
 0xc3c   :  { %1106 = vmatpush.bf16.msra.mxu3 %v3231_v37 }
 0xc40   :  { %1107 = vmatpush.bf16.msra.mxu3 %v3237_v40 }
 0xcb6   :  { %v851_v43 = vpop.f32.mrf.mxu3 }
 0xcb7   :  { %v852_v44 = vadd.f32 %v2872_v52, %v851_v43 }
 0xcb9   :  { %v927_v46 = vmul.f32 2.0, %v852_v44  ;;  %v870_v55 = vmul.f32 %v852_v44, %v2943_v30 }
 0xcbb   :  { %v929_v48 = vadd.f32 %v927_v46, %v925_v45  ;;  %v872_v63 = vadd.f32 %v870_v55, %v3096_v61 }
 0xcbe   :  { %v853_v51 = vpop.f32.mrf.mxu3 }
 0xcbf   :  { %v854_v56 = vadd.f32 %v2872_v52, %v853_v51  ;;  %v709_v52 = vstv %s4116_s29  ;;  %s4118_s29 = sadd.f32 %s2759_s13, %s2723_s19 }
 0xcc0   :  { %v710_v32 = vmul.f32 %v3262_v1, %v709_v52 }
 0xcc1   :  { %v871_v59 = vmul.f32 %v854_v56, %v2943_v30  ;;  %v928_v60 = vmul.f32 2.0, %v854_v56 }
 0xcc2   :  { %v711_v3 = vadd.f32 %v3268_v6, %v710_v32 }
 0xcc3   :  { %v873_v16 = vadd.f32 %v871_v59, %v3099_v62  ;;  %v930_v33 = vadd.f32 %v928_v60, %v926_v58 }
 0xcc4   :  { %v713_v7 = vperm.slane %v711_v3, 0 }
 0xcc5   :  { %v874_v29 = vpack.c.bf16 %v873_v16, %v872_v63 }
 0xcc7   :  { %883 = vmatmul.bf16.vlgmr.msra.gmra.mxu0 %v874_v29 }
 0xcc8   :  { %1133 = vmatpush.bf16.msra.mxu0 %v3106_v2 }
 0xccc   :  { %1134 = vmatpush.bf16.msra.mxu0 %v3112_v5 }
 0xcd0   :  { %1135 = vmatpush.bf16.msra.mxu0 %v3118_v15 }
 0xcd4   :  { %1136 = vmatpush.bf16.msra.mxu0 %v3156_v38 }
 0xcd8   :  { %1137 = vmatpush.bf16.msra.mxu0 %v3162_v53 }
 0xcdc   :  { %1138 = vmatpush.bf16.msra.mxu0 %v3168_v39 }
 0xce0   :  { %1139 = vmatpush.bf16.msra.mxu0 %v3174_v41 }
 0xce4   :  { %1140 = vmatpush.bf16.msra.mxu0 %v3180_v57 }
 0xd44   :  { %v884_v10 = vpop.f32.mrf.mxu0 }
 0xd45   :  { %v885_v12 = vadd.f32 %v884_v10, %v713_v7 }
 0xd47   :  { %2421 = vtanh.f32 %v885_v12 }
 0xd4c   :  { %v886_v14 = vpop.f32.mrf.mxu0 }
 0xd4d   :  { %v2422_v17 = vpop.eup %2421  ;;  %v887_v25 = vadd.f32 %v886_v14, %v713_v7 }
 0xd4e   :  { %v909_v8 = vmul.f32 %v2422_v17, %v2422_v17 }
 0xd4f   :  { %2423 = vtanh.f32 %v887_v25 }
 0xd50   :  { %v911_v19 = vsub.f32 1.0, %v909_v8 }
 0xd52   :  { %v913_v26 = vmul.f32 %v3274_v13, %v911_v19 }
 0xd54   :  { %v915_v27 = vsel %vm205_vm2, %v913_v26, 0.0 }
 0xd55   :  { %v2424_v28 = vpop.eup %2423  ;;  %916 = vadd.xlane.f32.xlu1 %v915_v27 }
 0xd56   :  { %v891_v18 = vpack.c.bf16 %v2424_v28, %v2422_v17  ;;  %v910_v20 = vmul.f32 %v2424_v28, %v2424_v28 }
 0xd58   :  { %2328 = vmatmul.msk.bf16.vlgmr.msrb.gmra.mxu2 %vm205_vm2, %v891_v18  ;;  %v912_v21 = vsub.f32 1.0, %v910_v20  ;;  %v960_v18 = vstv %s4117_s1 }
 0xd59   :  { %1157 = vmatpush.bf16.msrb.mxu2 %v3217_v34  ;;  %v961_v20 = vmul.f32 %v3262_v1, %v960_v18 }
 0xd5a   :  { %v914_v24 = vmul.f32 %v3274_v13, %v912_v21 }
 0xd5b   :  { %v962_v21 = vadd.f32 %v3268_v6, %v961_v20 }
 0xd5c   :  { %v918_v22 = vsel %vm205_vm2, %v914_v24, 0.0 }
 0xd5d   :  { %919 = vadd.xlane.f32.xlu2 %v918_v22  ;;  %1158 = vmatpush.bf16.msrb.mxu2 %v3225_v36  ;;  %v964_v24 = vperm.slane %v962_v21, 0 }
 0xd61   :  { %1159 = vmatpush.bf16.msrb.mxu2 %v3231_v37 }
 0xd65   :  { %1160 = vmatpush.bf16.msrb.mxu2 %v3237_v40 }
 0xddb   :  { %v904_v31 = vpop.f32.mrf.mxu2 }
 0xddc   :  { %v905_v23 = vadd.f32 %v3288_v47, %v904_v31 }
 0xdde   :  { %v931_v50 = vadd.f32 %v929_v48, %v905_v23 }
 0xde0   :  { %v933_v4 = vmul.f32 %v931_v50, %v2972_v9 }
 0xde2   :  { %v3295_v44 = vadd.f32 %v933_v4, %v3096_v61  ;;  %v953_v61 = vstv %s2759_s13  ;;  %s4119_s13 = sadd.f32 %s2762_s14, %s2727_s20 }
 0xde3   :  { %v906_v0 = vpop.f32.mrf.mxu2 }
 0xde4   :  { %v907_v35 = vadd.f32 %v3288_v47, %v906_v0 }
 0xde6   :  { %v932_v42 = vadd.f32 %v930_v33, %v907_v35 }
 0xde8   :  { %v934_v43 = vmul.f32 %v932_v42, %v2972_v9 }
 0xdea   :  { %v3298_v45 = vadd.f32 %v934_v43, %v3099_v62  ;;  %v954_v62 = vmul.f32 %v3262_v1, %v953_v61 }
 0xdec   :  { %v973_v46 = vpack.c.bf16 %v3298_v45, %v3295_v44  ;;  %v955_v48 = vadd.f32 %v3268_v6, %v954_v62 }
 0xdee   :  { %982 = vmatmul.bf16.vlgmr.msrb.gmra.mxu3 %v973_v46  ;;  %v957_v49 = vperm.slane %v955_v48, 0 }
 0xdef   :  { %1232 = vmatpush.bf16.msrb.mxu3 %v3106_v2 }
 0xdf3   :  { %1233 = vmatpush.bf16.msrb.mxu3 %v3112_v5 }
 0xdf7   :  { %1234 = vmatpush.bf16.msrb.mxu3 %v3118_v15 }
 0xdfb   :  { %1235 = vmatpush.bf16.msrb.mxu3 %v3156_v38 }
 0xdff   :  { %1236 = vmatpush.bf16.msrb.mxu3 %v3162_v53 }
 0xe03   :  { %1237 = vmatpush.bf16.msrb.mxu3 %v3168_v39 }
 0xe07   :  { %1238 = vmatpush.bf16.msrb.mxu3 %v3174_v41 }
 0xe0b   :  { %1239 = vmatpush.bf16.msrb.mxu3 %v3180_v57 }
 0xe71   :  { %v983_v51 = vpop.f32.mrf.mxu3 }
 0xe72   :  { %v984_v55 = vadd.f32 %v983_v51, %v957_v49 }
 0xe74   :  { %2425 = vtanh.f32 %v984_v55 }
 0xe79   :  { %v985_v56 = vpop.f32.mrf.mxu3 }
 0xe7a   :  { %v2426_v58 = vpop.eup %2425  ;;  %v986_v59 = vadd.f32 %v985_v56, %v957_v49 }
 0xe7b   :  { %v1008_v60 = vmul.f32 %v2426_v58, %v2426_v58 }
 0xe7c   :  { %2427 = vtanh.f32 %v986_v59 }
 0xe7d   :  { %v1010_v63 = vsub.f32 1.0, %v1008_v60 }
 0xe7f   :  { %v1012_v16 = vmul.f32 %v3274_v13, %v1010_v63 }
 0xe81   :  { %v1014_v33 = vsel %vm205_vm2, %v1012_v16, 0.0 }
 0xe82   :  { %v2428_v29 = vpop.eup %2427  ;;  %1015 = vadd.xlane.f32.xlu0 %v1014_v33 }
 0xe83   :  { %v990_v52 = vpack.c.bf16 %v2428_v29, %v2426_v58  ;;  %v1009_v32 = vmul.f32 %v2428_v29, %v2428_v29 }
 0xe85   :  { %2329 = vmatmul.msk.bf16.vlgmr.msra.gmra.mxu1 %vm205_vm2, %v990_v52  ;;  %v1011_v3 = vsub.f32 1.0, %v1009_v32 }
 0xe86   :  { %1256 = vmatpush.bf16.msra.mxu1 %v3217_v34 }
 0xe87   :  { %v1013_v7 = vmul.f32 %v3274_v13, %v1011_v3 }
 0xe89   :  { %v1017_v10 = vsel %vm205_vm2, %v1013_v7, 0.0 }
 0xe8a   :  { %1018 = vadd.xlane.f32.xlu1 %v1017_v10  ;;  %1257 = vmatpush.bf16.msra.mxu1 %v3225_v36 }
 0xe8e   :  { %1258 = vmatpush.bf16.msra.mxu1 %v3231_v37 }
 0xe92   :  { %1259 = vmatpush.bf16.msra.mxu1 %v3237_v40 }
 0xf02   :  { %v1003_v12 = vpop.f32.mrf.mxu1 }
 0xf03   :  { %v3323_v14 = vadd.f32 %v3288_v47, %v1003_v12 }
 0xf05   :  { %v1022_v25 = vmul.f32 %v3323_v14, %v2878_v54 }
 0xf07   :  { %v1024_v26 = vadd.f32 %v1022_v25, %v3295_v44 }
 0xf0a   :  { %v1005_v17 = vpop.f32.mrf.mxu1 }
 0xf0b   :  { %v3328_v8 = vadd.f32 %v3288_v47, %v1005_v17 }
 0xf0d   :  { %v1023_v19 = vmul.f32 %v3328_v8, %v2878_v54 }
 0xf0f   :  { %v1025_v27 = vadd.f32 %v1023_v19, %v3298_v45 }
 0xf11   :  { %v1026_v28 = vpack.c.bf16 %v1025_v27, %v1024_v26 }
 0xf13   :  { %1035 = vmatmul.bf16.vlgmr.msra.gmra.mxu2 %v1026_v28 }
 0xf14   :  { %1285 = vmatpush.bf16.msra.mxu2 %v3106_v2 }
 0xf18   :  { %1286 = vmatpush.bf16.msra.mxu2 %v3112_v5 }
 0xf1c   :  { %1287 = vmatpush.bf16.msra.mxu2 %v3118_v15 }
 0xf20   :  { %1288 = vmatpush.bf16.msra.mxu2 %v3156_v38 }
 0xf24   :  { %1289 = vmatpush.bf16.msra.mxu2 %v3162_v53 }
 0xf28   :  { %1290 = vmatpush.bf16.msra.mxu2 %v3168_v39 }
 0xf2c   :  { %1291 = vmatpush.bf16.msra.mxu2 %v3174_v41 }
 0xf30   :  { %1292 = vmatpush.bf16.msra.mxu2 %v3180_v57 }
 0xf96   :  { %v1036_v22 = vpop.f32.mrf.mxu2 }
 0xf97   :  { %v1037_v31 = vadd.f32 %v1036_v22, %v964_v24 }
 0xf99   :  { %2429 = vtanh.f32 %v1037_v31 }
 0xf9e   :  { %v1038_v23 = vpop.f32.mrf.mxu2 }
 0xf9f   :  { %v2430_v50 = vpop.eup %2429  ;;  %v1039_v0 = vadd.f32 %v1038_v23, %v964_v24 }
 0xfa0   :  { %v1061_v35 = vmul.f32 %v2430_v50, %v2430_v50 }
 0xfa1   :  { %2431 = vtanh.f32 %v1039_v0 }
 0xfa2   :  { %v1063_v4 = vsub.f32 1.0, %v1061_v35 }
 0xfa4   :  { %v1065_v42 = vmul.f32 %v3274_v13, %v1063_v4 }
 0xfa6   :  { %v1067_v43 = vsel %vm205_vm2, %v1065_v42, 0.0 }
 0xfa7   :  { %v2432_v46 = vpop.eup %2431  ;;  %1068 = vadd.xlane.f32.xlu2 %v1067_v43 }
 0xfa8   :  { %v1043_v61 = vpack.c.bf16 %v2432_v46, %v2430_v50  ;;  %v1062_v62 = vmul.f32 %v2432_v46, %v2432_v46 }
 0xfaa   :  { %2330 = vmatmul.msk.bf16.vlgmr.msrb.gmra.mxu0 %vm205_vm2, %v1043_v61  ;;  %v1064_v48 = vsub.f32 1.0, %v1062_v62 }
 0xfab   :  { %1309 = vmatpush.bf16.msrb.mxu0 %v3217_v34 }
 0xfac   :  { %v1066_v49 = vmul.f32 %v3274_v13, %v1064_v48 }
 0xfae   :  { %v1070_v51 = vsel %vm205_vm2, %v1066_v49, 0.0 }
 0xfaf   :  { %1071 = vadd.xlane.f32.xlu0 %v1070_v51  ;;  %1310 = vmatpush.bf16.msrb.mxu0 %v3225_v36 }
 0xfb3   :  { %1311 = vmatpush.bf16.msrb.mxu0 %v3231_v37 }
 0xfb7   :  { %1312 = vmatpush.bf16.msrb.mxu0 %v3237_v40 }
0x1027   :  { %v1056_v55 = vpop.f32.mrf.mxu0 }
0x1028   :  { %v1057_v56 = vadd.f32 %v3288_v47, %v1056_v55 }
0x102a   :  { %v1075_v59 = vmul.f32 %v1057_v56, %v2878_v54 }
0x102c   :  { %v1077_v16 = vadd.f32 %v1075_v59, %v3295_v44 }
0x102f   :  { %v1058_v58 = vpop.f32.mrf.mxu0 }
0x1030   :  { %v1059_v60 = vadd.f32 %v3288_v47, %v1058_v58 }
0x1032   :  { %v1076_v63 = vmul.f32 %v1059_v60, %v2878_v54  ;;  %v1182_v35 = vmul.f32 2.0, %v1059_v60 }
0x1034   :  { %v1078_v33 = vadd.f32 %v1076_v63, %v3298_v45  ;;  %v1184_v46 = vadd.f32 %v1182_v35, %v3328_v8  ;;  %v967_v8 = vstv %s4118_s29 }
0x1035   :  { %v968_v55 = vmul.f32 %v3262_v1, %v967_v8 }
0x1036   :  { %v1079_v29 = vpack.c.bf16 %v1078_v33, %v1077_v16 }
0x1038   :  { %1088 = vmatmul.bf16.vlgmr.msrb.gmra.mxu1 %v1079_v29 }
0x1039   :  { %1338 = vmatpush.bf16.msrb.mxu1 %v3106_v2 }
0x103d   :  { %1339 = vmatpush.bf16.msrb.mxu1 %v3112_v5 }
0x1041   :  { %1340 = vmatpush.bf16.msrb.mxu1 %v3118_v15 }
0x1045   :  { %1341 = vmatpush.bf16.msrb.mxu1 %v3156_v38 }
0x1049   :  { %1342 = vmatpush.bf16.msrb.mxu1 %v3162_v53 }
0x104d   :  { %1343 = vmatpush.bf16.msrb.mxu1 %v3168_v39 }
0x1051   :  { %1344 = vmatpush.bf16.msrb.mxu1 %v3174_v41 }
0x1055   :  { %1345 = vmatpush.bf16.msrb.mxu1 %v3180_v57 }
0x10b5   :  { %v1089_v52 = vpop.f32.mrf.mxu1 }
0x10b6   :  { %v1090_v32 = vadd.f32 %v1089_v52, %v964_v24 }
0x10b8   :  { %2433 = vtanh.f32 %v1090_v32 }
0x10bd   :  { %v1091_v3 = vpop.f32.mrf.mxu1 }
0x10be   :  { %v2434_v7 = vpop.eup %2433  ;;  %v1092_v10 = vadd.f32 %v1091_v3, %v964_v24  ;;  %v1181_v24 = vmul.f32 2.0, %v1057_v56  ;;  %v969_v56 = vadd.f32 %v3268_v6, %v968_v55 }
0x10bf   :  { %v1114_v12 = vmul.f32 %v2434_v7, %v2434_v7 }
0x10c0   :  { %2435 = vtanh.f32 %v1092_v10  ;;  %v1183_v23 = vadd.f32 %v1181_v24, %v3323_v14  ;;  %v971_v58 = vperm.slane %v969_v56, 0 }
0x10c1   :  { %v1116_v17 = vsub.f32 1.0, %v1114_v12 }
0x10c3   :  { %v1118_v25 = vmul.f32 %v3274_v13, %v1116_v17 }
0x10c5   :  { %v1120_v19 = vsel %vm205_vm2, %v1118_v25, 0.0 }
0x10c6   :  { %v2436_v26 = vpop.eup %2435  ;;  %1121 = vadd.xlane.f32.xlu1 %v1120_v19 }
0x10c7   :  { %v1096_v27 = vpack.c.bf16 %v2436_v26, %v2434_v7  ;;  %v1115_v28 = vmul.f32 %v2436_v26, %v2436_v26 }
0x10c9   :  { %2331 = vmatmul.msk.bf16.vlgmr.msra.gmra.mxu3 %vm205_vm2, %v1096_v27  ;;  %v1117_v18 = vsub.f32 1.0, %v1115_v28 }
0x10ca   :  { %1362 = vmatpush.bf16.msra.mxu3 %v3217_v34 }
0x10cb   :  { %v1119_v20 = vmul.f32 %v3274_v13, %v1117_v18 }
0x10cd   :  { %v1123_v21 = vsel %vm205_vm2, %v1119_v20, 0.0 }
0x10ce   :  { %1124 = vadd.xlane.f32.xlu2 %v1123_v21  ;;  %1363 = vmatpush.bf16.msra.mxu3 %v3225_v36 }
0x10d2   :  { %1364 = vmatpush.bf16.msra.mxu3 %v3231_v37 }
0x10d6   :  { %1365 = vmatpush.bf16.msra.mxu3 %v3237_v40 }
0x114c   :  { %v1109_v22 = vpop.f32.mrf.mxu3 }
0x114d   :  { %v1110_v31 = vadd.f32 %v3288_v47, %v1109_v22 }
0x114f   :  { %v1185_v50 = vmul.f32 2.0, %v1110_v31  ;;  %v1128_v42 = vmul.f32 %v1110_v31, %v2943_v30 }
0x1151   :  { %v1187_v0 = vadd.f32 %v1185_v50, %v1183_v23  ;;  %v1130_v48 = vadd.f32 %v1128_v42, %v3295_v44 }
0x1154   :  { %v1111_v4 = vpop.f32.mrf.mxu3 }
0x1155   :  { %v1112_v43 = vadd.f32 %v3288_v47, %v1111_v4 }
0x1157   :  { %v1129_v61 = vmul.f32 %v1112_v43, %v2943_v30  ;;  %v1186_v62 = vmul.f32 2.0, %v1112_v43 }
0x1159   :  { %v1131_v49 = vadd.f32 %v1129_v61, %v3298_v45  ;;  %v1188_v14 = vadd.f32 %v1186_v62, %v1184_v46 }
0x115b   :  { %v1132_v51 = vpack.c.bf16 %v1131_v49, %v1130_v48 }
0x115d   :  { %1141 = vmatmul.bf16.vlgmr.msra.gmra.mxu0 %v1132_v51 }
0x115e   :  { %1391 = vmatpush.bf16.msra.mxu0 %v3106_v2 }
0x1162   :  { %1392 = vmatpush.bf16.msra.mxu0 %v3112_v5 }
0x1166   :  { %1393 = vmatpush.bf16.msra.mxu0 %v3118_v15 }
0x116a   :  { %1394 = vmatpush.bf16.msra.mxu0 %v3156_v38 }
0x116e   :  { %1395 = vmatpush.bf16.msra.mxu0 %v3162_v53 }
0x1172   :  { %1396 = vmatpush.bf16.msra.mxu0 %v3168_v39 }
0x1176   :  { %1397 = vmatpush.bf16.msra.mxu0 %v3174_v41 }
0x117a   :  { %1398 = vmatpush.bf16.msra.mxu0 %v3180_v57 }
0x11da   :  { %v1142_v59 = vpop.f32.mrf.mxu0 }
0x11db   :  { %v1143_v60 = vadd.f32 %v1142_v59, %v971_v58 }
0x11dd   :  { %2437 = vtanh.f32 %v1143_v60 }
0x11e2   :  { %v1144_v63 = vpop.f32.mrf.mxu0 }
0x11e3   :  { %v2438_v16 = vpop.eup %2437  ;;  %v1145_v33 = vadd.f32 %v1144_v63, %v971_v58 }
0x11e4   :  { %v1167_v29 = vmul.f32 %v2438_v16, %v2438_v16 }
0x11e5   :  { %2439 = vtanh.f32 %v1145_v33 }
0x11e6   :  { %v1169_v52 = vsub.f32 1.0, %v1167_v29 }
0x11e8   :  { %v1171_v32 = vmul.f32 %v3274_v13, %v1169_v52 }
0x11ea   :  { %v1173_v3 = vsel %vm205_vm2, %v1171_v32, 0.0 }
0x11eb   :  { %v2440_v7 = vpop.eup %2439  ;;  %1174 = vadd.xlane.f32.xlu0 %v1173_v3 }
0x11ec   :  { %v1149_v10 = vpack.c.bf16 %v2440_v7, %v2438_v16  ;;  %v1168_v12 = vmul.f32 %v2440_v7, %v2440_v7 }
0x11ee   :  { %2332 = vmatmul.msk.bf16.vlgmr.msrb.gmra.mxu2 %vm205_vm2, %v1149_v10  ;;  %v1170_v17 = vsub.f32 1.0, %v1168_v12  ;;  %v1218_v10 = vstv %s4119_s13 }
0x11ef   :  { %1415 = vmatpush.bf16.msrb.mxu2 %v3217_v34  ;;  %v1219_v12 = vmul.f32 %v3262_v1, %v1218_v10 }
0x11f0   :  { %v1172_v25 = vmul.f32 %v3274_v13, %v1170_v17 }
0x11f1   :  { %v1220_v17 = vadd.f32 %v3268_v6, %v1219_v12 }
0x11f2   :  { %v1176_v19 = vsel %vm205_vm2, %v1172_v25, 0.0 }
0x11f3   :  { %1177 = vadd.xlane.f32.xlu1 %v1176_v19  ;;  %1416 = vmatpush.bf16.msrb.mxu2 %v3225_v36  ;;  %v3466_v25 = vperm.slane %v1220_v17, 0 }
0x11f7   :  { %1417 = vmatpush.bf16.msrb.mxu2 %v3231_v37 }
0x11fb   :  { %1418 = vmatpush.bf16.msrb.mxu2 %v3237_v40 }
0x1271   :  { %v1162_v26 = vpop.f32.mrf.mxu2 }
0x1272   :  { %v1163_v27 = vadd.f32 %v3288_v47, %v1162_v26 }
0x1274   :  { %v1189_v28 = vadd.f32 %v1187_v0, %v1163_v27 }
0x1276   :  { %v1191_v21 = vmul.f32 %v1189_v28, %v2972_v9 }
0x1278   :  { %v3414_v31 = vadd.f32 %v1191_v21, %v3295_v44  ;;  %v1211_v44 = vstv %s2762_s14  ;;  %s2252_s14 = sshll.u32 %s4110_s9, 4  ;;  %s2253_s14 = int_to_ptr.hbm [resolvable:$true] %s2252_s14 }
0x1279   :  { %v1164_v18 = vpop.f32.mrf.mxu2 }
0x127a   :  { %v1165_v20 = vadd.f32 %v3288_v47, %v1164_v18 }
0x127c   :  { %v1190_v24 = vadd.f32 %v1188_v14, %v1165_v20 }
0x127e   :  { %v1192_v22 = vmul.f32 %v1190_v24, %v2972_v9 }
0x1280   :  { %v3417_v23 = vadd.f32 %v1192_v22, %v3298_v45  ;;  %v1212_v45 = vmul.f32 %v3262_v1, %v1211_v44 }
0x1282   :  { %v1231_v50 = vpack.c.bf16 %v3417_v23, %v3414_v31  ;;  %v1213_v0 = vadd.f32 %v3268_v6, %v1212_v45 }
0x1284   :  { %1240 = vmatmul.bf16.vlgmr.msrb.gmra.mxu3 %v1231_v50  ;;  %v1215_v35 = vperm.slane %v1213_v0, 0 }
0x1285   :  { %1490 = vmatpush.bf16.msrb.mxu3 %v3106_v2 }
0x1289   :  { %1491 = vmatpush.bf16.msrb.mxu3 %v3112_v5 }
0x128d   :  { %1492 = vmatpush.bf16.msrb.mxu3 %v3118_v15 }
0x1291   :  { %1493 = vmatpush.bf16.msrb.mxu3 %v3156_v38 }
0x1295   :  { %1494 = vmatpush.bf16.msrb.mxu3 %v3162_v53 }
0x1299   :  { %1495 = vmatpush.bf16.msrb.mxu3 %v3168_v39 }
0x129d   :  { %1496 = vmatpush.bf16.msrb.mxu3 %v3174_v41 }
0x12a1   :  { %1497 = vmatpush.bf16.msrb.mxu3 %v3180_v57 }
0x1307   :  { %v1241_v4 = vpop.f32.mrf.mxu3 }
0x1308   :  { %v1242_v42 = vadd.f32 %v1241_v4, %v1215_v35 }
0x130a   :  { %2441 = vtanh.f32 %v1242_v42  ;;  %v3479_v42 = vpop.xlane.xlu0 %233 }
0x130f   :  { %v1243_v43 = vpop.f32.mrf.mxu3 }
0x1310   :  { %v2442_v46 = vpop.eup %2441  ;;  %v1244_v61 = vadd.f32 %v1243_v43, %v1215_v35  ;;  %v3481_v43 = vpop.xlane.xlu2 %340 }
0x1311   :  { %v1266_v62 = vmul.f32 %v2442_v46, %v2442_v46 }
0x1312   :  { %2443 = vtanh.f32 %v1244_v61 }
0x1313   :  { %v1268_v48 = vsub.f32 1.0, %v1266_v62 }
0x1315   :  { %v1270_v49 = vmul.f32 %v3274_v13, %v1268_v48 }
0x1317   :  { %v1272_v14 = vsel %vm205_vm2, %v1270_v49, 0.0 }
0x1318   :  { %v2444_v51 = vpop.eup %2443  ;;  %1273 = vadd.xlane.f32.xlu2 %v1272_v14  ;;  %v3485_v61 = vpop.xlane.xlu2 %499 }
0x1319   :  { %v1248_v8 = vpack.c.bf16 %v2444_v51, %v2442_v46  ;;  %v1267_v55 = vmul.f32 %v2444_v51, %v2444_v51  ;;  %v3483_v46 = vpop.xlane.xlu0 %391 }
0x131b   :  { %2333 = vmatmul.msk.bf16.vlgmr.msra.gmra.mxu1 %vm205_vm2, %v1248_v8  ;;  %v1269_v56 = vsub.f32 1.0, %v1267_v55 }
0x131c   :  { %1514 = vmatpush.bf16.msra.mxu1 %v3217_v34 }
0x131d   :  { %v1271_v58 = vmul.f32 %v3274_v13, %v1269_v56 }
0x131f   :  { %v1275_v59 = vsel %vm205_vm2, %v1271_v58, 0.0 }
0x1320   :  { %1276 = vadd.xlane.f32.xlu0 %v1275_v59  ;;  %1515 = vmatpush.bf16.msra.mxu1 %v3225_v36  ;;  %v3489_v48 = vpop.xlane.xlu2 %555 }
0x1321   :  { %v3487_v62 = vpop.xlane.xlu0 %502 }
0x1324   :  { %1516 = vmatpush.bf16.msra.mxu1 %v3231_v37 }
0x1328   :  { %1517 = vmatpush.bf16.msra.mxu1 %v3237_v40  ;;  %v3493_v14 = vpop.xlane.xlu2 %658 }
0x1329   :  { %v3491_v49 = vpop.xlane.xlu0 %605 }
0x1330   :  { %v3497_v8 = vpop.xlane.xlu2 %760 }
0x1331   :  { %v3495_v51 = vpop.xlane.xlu0 %661 }
0x1338   :  { %v3501_v56 = vpop.xlane.xlu2 %863 }
0x1339   :  { %v3499_v55 = vpop.xlane.xlu0 %810 }
0x1340   :  { %v3505_v59 = vpop.xlane.xlu2 %919 }
0x1341   :  { %v3503_v58 = vpop.xlane.xlu0 %866 }
0x1398   :  { %v1261_v60 = vpop.f32.mrf.mxu1 }
0x1399   :  { %v3442_v63 = vadd.f32 %v3288_v47, %v1261_v60  ;;  %v3507_v60 = vpop.xlane.xlu0 %1015 }
0x139b   :  { %v1280_v33 = vmul.f32 %v3442_v63, %v2878_v54 }
0x139d   :  { %v1282_v32 = vadd.f32 %v1280_v33, %v3414_v31 }
0x13a0   :  { %v1263_v16 = vpop.f32.mrf.mxu1 }
0x13a1   :  { %v3447_v29 = vadd.f32 %v3288_v47, %v1263_v16  ;;  %v3509_v16 = vpop.xlane.xlu2 %1068  ;;  %v3511_v33 = vpop.xlane.xlu0 %1071 }
0x13a3   :  { %v1281_v52 = vmul.f32 %v3447_v29, %v2878_v54 }
0x13a5   :  { %v1283_v3 = vadd.f32 %v1281_v52, %v3417_v23 }
0x13a7   :  { %v1284_v7 = vpack.c.bf16 %v1283_v3, %v1282_v32 }
0x13a9   :  { %1293 = vmatmul.bf16.vlgmr.msra.gmra.mxu2 %v1284_v7  ;;  %v3513_v52 = vpop.xlane.xlu2 %1124  ;;  %v3515_v32 = vpop.xlane.xlu0 %1174 }
0x13aa   :  { %1543 = vmatpush.bf16.msra.mxu2 %v3106_v2 }
0x13ae   :  { %1544 = vmatpush.bf16.msra.mxu2 %v3112_v5 }
0x13b1   :  { %v3517_v3 = vpop.xlane.xlu2 %1273  ;;  %v1277_v7 = vpop.xlane.xlu0 %1276 }
0x13b2   :  { %1545 = vmatpush.bf16.msra.mxu2 %v3118_v15  ;;  %v1279_v17 = vsub.f32 0.0, %v1277_v7 }
0x13b6   :  { %1546 = vmatpush.bf16.msra.mxu2 %v3156_v38 }
0x13ba   :  { %1547 = vmatpush.bf16.msra.mxu2 %v3162_v53 }
0x13be   :  { %1548 = vmatpush.bf16.msra.mxu2 %v3168_v39 }
0x13c2   :  { %1549 = vmatpush.bf16.msra.mxu2 %v3174_v41 }
0x13c6   :  { %1550 = vmatpush.bf16.msra.mxu2 %v3180_v57 }
0x142c   :  { %v1294_v19 = vpop.f32.mrf.mxu2 }
0x142d   :  { %v1295_v26 = vadd.f32 %v1294_v19, %v3466_v25 }
0x142f   :  { %2445 = vtanh.f32 %v1295_v26 }
0x1434   :  { %v1296_v27 = vpop.f32.mrf.mxu2 }
0x1435   :  { %v2446_v28 = vpop.eup %2445  ;;  %v1297_v18 = vadd.f32 %v1296_v27, %v3466_v25 }
0x1436   :  { %v1319_v20 = vmul.f32 %v2446_v28, %v2446_v28 }
0x1437   :  { %2447 = vtanh.f32 %v1297_v18 }
0x1438   :  { %v1321_v21 = vsub.f32 1.0, %v1319_v20 }
0x143a   :  { %v1323_v24 = vmul.f32 %v3274_v13, %v1321_v21 }
0x143c   :  { %v1325_v22 = vsel %vm205_vm2, %v1323_v24, 0.0 }
0x143d   :  { %v2448_v50 = vpop.eup %2447  ;;  %1326 = vadd.xlane.f32.xlu1 %v1325_v22 }
0x143e   :  { %v1301_v44 = vpack.c.bf16 %v2448_v50, %v2446_v28  ;;  %v1320_v45 = vmul.f32 %v2448_v50, %v2448_v50 }
0x1440   :  { %2334 = vmatmul.msk.bf16.vlgmr.msrb.gmra.mxu0 %vm205_vm2, %v1301_v44  ;;  %v1322_v0 = vsub.f32 1.0, %v1320_v45 }
0x1441   :  { %1567 = vmatpush.bf16.msrb.mxu0 %v3217_v34 }
0x1442   :  { %v1324_v35 = vmul.f32 %v3274_v13, %v1322_v0 }
0x1444   :  { %v1328_v4 = vsel %vm205_vm2, %v1324_v35, 0.0 }
0x1445   :  { %1329 = vadd.xlane.f32.xlu2 %v1328_v4  ;;  %1568 = vmatpush.bf16.msrb.mxu0 %v3225_v36 }
0x1449   :  { %1569 = vmatpush.bf16.msrb.mxu0 %v3231_v37 }
0x144d   :  { %1570 = vmatpush.bf16.msrb.mxu0 %v3237_v40 }
0x14b8   :  { %v1330_v10 = vpop.xlane.xlu2 %1329 }
0x14b9   :  { %v1332_v12 = vsub.f32 0.0, %v1330_v10 }
0x14bb   :  { %v1454_v19 = vmul.f32 2.0, %v1332_v12 }
0x14bd   :  { %v3519_v26 = vadd.f32 %v1454_v19, %v1279_v17  ;;  %v1314_v27 = vpop.f32.mrf.mxu0 }
0x14be   :  { %v1315_v28 = vadd.f32 %v3288_v47, %v1314_v27 }
0x14c0   :  { %v1333_v20 = vmul.f32 %v1315_v28, %v2878_v54 }
0x14c2   :  { %v1335_v22 = vadd.f32 %v1333_v20, %v3414_v31  ;;  %v1439_v20 = vmul.f32 2.0, %v1315_v28 }
0x14c5   :  { %v1316_v18 = vpop.f32.mrf.mxu0 }
0x14c6   :  { %v1317_v21 = vadd.f32 %v3288_v47, %v1316_v18 }
0x14c8   :  { %v1334_v24 = vmul.f32 %v1317_v21, %v2878_v54 }
0x14ca   :  { %v1336_v50 = vadd.f32 %v1334_v24, %v3417_v23 }
0x14cc   :  { %v1337_v44 = vpack.c.bf16 %v1336_v50, %v1335_v22  ;;  %v1441_v50 = vadd.f32 %v1439_v20, %v3442_v63 }
0x14ce   :  { %1346 = vmatmul.bf16.vlgmr.msrb.gmra.mxu1 %v1337_v44 }
0x14cf   :  { %1596 = vmatpush.bf16.msrb.mxu1 %v3106_v2 }
0x14d3   :  { %1597 = vmatpush.bf16.msrb.mxu1 %v3112_v5 }
0x14d7   :  { %1598 = vmatpush.bf16.msrb.mxu1 %v3118_v15 }
0x14db   :  { %1599 = vmatpush.bf16.msrb.mxu1 %v3156_v38 }
0x14df   :  { %1600 = vmatpush.bf16.msrb.mxu1 %v3162_v53 }
0x14e3   :  { %1601 = vmatpush.bf16.msrb.mxu1 %v3168_v39 }
0x14e7   :  { %1602 = vmatpush.bf16.msrb.mxu1 %v3174_v41 }
0x14eb   :  { %1603 = vmatpush.bf16.msrb.mxu1 %v3180_v57 }
0x154b   :  { %v1347_v45 = vpop.f32.mrf.mxu1 }
0x154c   :  { %v1348_v0 = vadd.f32 %v1347_v45, %v3466_v25 }
0x154e   :  { %2449 = vtanh.f32 %v1348_v0  ;;  %v1440_v0 = vmul.f32 2.0, %v1317_v21  ;;  %v3561_v21 = vld [vmem:[%s4104_s3 + $0x38] sm:$0xff] }
0x1553   :  { %v1349_v35 = vpop.f32.mrf.mxu1 }
0x1554   :  { %v2450_v2 = vpop.eup %2449  ;;  %v1350_v5 = vadd.f32 %v1349_v35, %v3466_v25 }
0x1555   :  { %v1372_v4 = vmul.f32 %v2450_v2, %v2450_v2 }
0x1556   :  { %2451 = vtanh.f32 %v1350_v5 }
0x1557   :  { %v1374_v15 = vsub.f32 1.0, %v1372_v4  ;;  %v1442_v4 = vadd.f32 %v1440_v0, %v3447_v29  ;;  %v3567_v29 = vld [vmem:[%s4104_s3 + $0x30] sm:$0xff] }
0x1559   :  { %v1376_v7 = vmul.f32 %v3274_v13, %v1374_v15 }
0x155b   :  { %v1378_v10 = vsel %vm205_vm2, %v1376_v7, 0.0 }
0x155c   :  { %v2452_v12 = vpop.eup %2451  ;;  %1379 = vadd.xlane.f32.xlu0 %v1378_v10 }
0x155d   :  { %v1354_v17 = vpack.c.bf16 %v2452_v12, %v2450_v2  ;;  %v1373_v19 = vmul.f32 %v2452_v12, %v2452_v12 }
0x155f   :  { %2335 = vmatmul.msk.bf16.vlgmr.msra.gmra.mxu3 %vm205_vm2, %v1354_v17  ;;  %v1375_v27 = vsub.f32 1.0, %v1373_v19  ;;  %v3573_v17 = vld [vmem:[%s4104_s3 + $0x28] sm:$0xff]  ;;  %v1225_v19 = vstv %s4120_s27 }
0x1560   :  { %1620 = vmatpush.bf16.msra.mxu3 %v3217_v34 }
0x1561   :  { %v1377_v18 = vmul.f32 %v3274_v13, %v1375_v27  ;;  %v1226_v27 = vmul.f32 %v3262_v1, %v1225_v19 }
0x1563   :  { %v1381_v25 = vsel %vm205_vm2, %v1377_v18, 0.0  ;;  %v1227_v18 = vadd.f32 %v3268_v6, %v1226_v27 }
0x1564   :  { %1382 = vadd.xlane.f32.xlu1 %v1381_v25  ;;  %1621 = vmatpush.bf16.msra.mxu3 %v3225_v36 }
0x1565   :  { %v1229_v25 = vperm.slane %v1227_v18, 0  ;;  %v868_v18 = vsub.f32 0.0, %v3501_v56 }
0x1568   :  { %1622 = vmatpush.bf16.msra.mxu3 %v3231_v37 }
0x156c   :  { %1623 = vmatpush.bf16.msra.mxu3 %v3237_v40 }
0x15e2   :  { %v1367_v24 = vpop.f32.mrf.mxu3 }
0x15e3   :  { %v1368_v22 = vadd.f32 %v3288_v47, %v1367_v24 }
0x15e5   :  { %v1443_v44 = vmul.f32 2.0, %v1368_v22  ;;  %v1386_v2 = vmul.f32 %v1368_v22, %v2943_v30 }
0x15e7   :  { %v3548_v45 = vadd.f32 %v1443_v44, %v1441_v50  ;;  %v1388_v28 = vadd.f32 %v1386_v2, %v3414_v31 }
0x15ea   :  { %v1369_v35 = vpop.f32.mrf.mxu3 }
0x15eb   :  { %v1370_v5 = vadd.f32 %v3288_v47, %v1369_v35 }
0x15ed   :  { %v1387_v15 = vmul.f32 %v1370_v5, %v2943_v30  ;;  %v1444_v7 = vmul.f32 2.0, %v1370_v5  ;;  %v3595_v5 = vpop.xlane.xlu1 %287 }
0x15ef   :  { %v1389_v63 = vadd.f32 %v1387_v15, %v3417_v23  ;;  %v3556_v10 = vadd.f32 %v1444_v7, %v1442_v4 }
0x15f1   :  { %v1390_v12 = vpack.c.bf16 %v1389_v63, %v1388_v28 }
0x15f3   :  { %1399 = vmatmul.bf16.vlgmr.msra.gmra.mxu0 %v1390_v12 }
0x15f4   :  { %1649 = vmatpush.bf16.msra.mxu0 %v3561_v21 }
0x15f5   :  { %v3597_v4 = vpop.xlane.xlu1 %394 }
0x15f8   :  { %1650 = vmatpush.bf16.msra.mxu0 %v3567_v29 }
0x15fc   :  { %1651 = vmatpush.bf16.msra.mxu0 %v3573_v17 }
0x15fd   :  { %v553_v15 = vpop.xlane.xlu1 %552 }
0x15fe   :  { %v557_v19 = vsub.f32 0.0, %v553_v15 }
0x1600   :  { %1652 = vmatpush.bf16.msra.mxu0 %v3156_v38  ;;  %v679_v27 = vmul.f32 2.0, %v557_v19 }
0x1604   :  { %1653 = vmatpush.bf16.msra.mxu0 %v3162_v53 }
0x1605   :  { %v3599_v7 = vpop.xlane.xlu1 %608 }
0x1608   :  { %1654 = vmatpush.bf16.msra.mxu0 %v3168_v39 }
0x160c   :  { %1655 = vmatpush.bf16.msra.mxu0 %v3174_v41 }
0x160d   :  { %v758_v28 = vpop.xlane.xlu1 %757 }
0x1610   :  { %1656 = vmatpush.bf16.msra.mxu0 %v3180_v57 }
0x1670   :  { %v1400_v20 = vpop.f32.mrf.mxu0 }
0x1671   :  { %v1401_v24 = vadd.f32 %v1400_v20, %v1229_v25  ;;  %v396_v20 = vsub.f32 0.0, %v3483_v46  ;;  %v1020_v46 = vsub.f32 0.0, %v3507_v60 }
0x1673   :  { %2453 = vtanh.f32 %v1401_v24  ;;  %v504_v24 = vsub.f32 0.0, %v3485_v61 }
0x1678   :  { %v1402_v22 = vpop.f32.mrf.mxu0 }
0x1679   :  { %v2454_v38 = vpop.eup %2453  ;;  %v1403_v50 = vadd.f32 %v1402_v22, %v1229_v25  ;;  %v1073_v25 = vsub.f32 0.0, %v3509_v16 }
0x167a   :  { %v1425_v53 = vmul.f32 %v2454_v38, %v2454_v38 }
0x167b   :  { %2455 = vtanh.f32 %v1403_v50 }
0x167c   :  { %v1427_v39 = vsub.f32 1.0, %v1425_v53  ;;  %v681_v53 = vadd.f32 %v679_v27, %v504_v24  ;;  %v1278_v27 = vsub.f32 0.0, %v3517_v3 }
0x167e   :  { %v1429_v41 = vmul.f32 %v3274_v13, %v1427_v39  ;;  %v663_v39 = vsub.f32 0.0, %v3493_v14 }
0x1680   :  { %v1431_v57 = vsel %vm205_vm2, %v1429_v41, 0.0  ;;  %v762_v41 = vsub.f32 0.0, %v758_v28 }
0x1681   :  { %v2456_v44 = vpop.eup %2455  ;;  %1432 = vadd.xlane.f32.xlu2 %v1431_v57 }
0x1682   :  { %v1407_v0 = vpack.c.bf16 %v2456_v44, %v2454_v38  ;;  %v1426_v1 = vmul.f32 %v2456_v44, %v2456_v44  ;;  %v1195_v44 = vmul.f32 2.0, %v1073_v25 }
0x1684   :  { %2336 = vmatmul.msk.bf16.vlgmr.msrb.gmra.mxu2 %vm205_vm2, %v1407_v0  ;;  %v1428_v6 = vsub.f32 1.0, %v1426_v1  ;;  %v1380_v1 = vpop.xlane.xlu0 %1379  ;;  %v1197_v15 = vadd.f32 %v1195_v44, %v1020_v46 }
0x1685   :  { %1673 = vmatpush.bf16.msrb.mxu2 %v3217_v34  ;;  %v3601_v34 = vpop.xlane.xlu1 %813  ;;  %v1384_v14 = vsub.f32 0.0, %v1380_v1 }
0x1686   :  { %v1430_v35 = vmul.f32 %v3274_v13, %v1428_v6 }
0x1688   :  { %v1434_v2 = vsel %vm205_vm2, %v1430_v35, 0.0 }
0x1689   :  { %1435 = vadd.xlane.f32.xlu0 %v1434_v2  ;;  %1674 = vmatpush.bf16.msrb.mxu2 %v3225_v36 }
0x168d   :  { %1675 = vmatpush.bf16.msrb.mxu2 %v3231_v37  ;;  %v917_v13 = vpop.xlane.xlu1 %916  ;;  %v610_v37 = vsub.f32 0.0, %v3491_v49  ;;  %v941_v49 = vmul.f32 2.0, %v868_v18  ;;  %v1457_v18 = vmul.f32 2.0, %v1384_v14 }
0x168e   :  { %v921_v16 = vsub.f32 0.0, %v917_v13 }
0x168f   :  { %v683_v22 = vmul.f32 2.0, %v610_v37 }
0x1691   :  { %1676 = vmatpush.bf16.msrb.mxu2 %v3237_v40  ;;  %v815_v40 = vsub.f32 0.0, %v3499_v55  ;;  %v430_v55 = vadd.f32 %v2938_v11, %v396_v20  ;;  %v685_v0 = vadd.f32 %v683_v22, %v681_v53  ;;  %v90_v11 = vld [vmem:[%s4103_s2] sm:$0xff] }
0x1693   :  { %v937_v38 = vmul.f32 2.0, %v815_v40  ;;  %v687_v35 = vadd.f32 %v685_v0, %v663_v39  ;;  %v432_v28 = vmul.f32 %v430_v55, %v2972_v9 }
0x1695   :  { %v3603_v63 = vpop.xlane.xlu1 %1018  ;;  %v939_v56 = vadd.f32 %v937_v38, %v762_v41  ;;  %v689_v13 = vmul.f32 %v687_v35, %v2972_v9  ;;  %v434_v25 = vadd.f32 %v432_v28, %v90_v11  ;;  %v3685_v28 = vld [vmem:[%s4105_s4] sm:$0x1] }
0x1697   :  { %v943_v2 = vadd.f32 %v941_v49, %v939_v56  ;;  %v691_v22 = vadd.f32 %v689_v13, %v434_v25 }
0x1699   :  { %v945_v19 = vadd.f32 %v943_v2, %v921_v16 }
0x169b   :  { %v947_v20 = vmul.f32 %v945_v19, %v2972_v9 }
0x169d   :  { %v1122_v12 = vpop.xlane.xlu1 %1121  ;;  %v949_v39 = vadd.f32 %v947_v20, %v691_v22  ;;  %v3691_v20 = vld [vmem:[%s4109_s8] ss:$0 sm:$0xff] }
0x169e   :  { %v1126_v50 = vsub.f32 0.0, %v1122_v12  ;;  %v1179_v12 = vsub.f32 0.0, %v3515_v32 }
0x16a0   :  { %v1199_v6 = vmul.f32 2.0, %v1126_v50 }
0x16a2   :  { %v1201_v37 = vadd.f32 %v1199_v6, %v1197_v15  ;;  %v1469_v15 = vstv %s2776_s28  ;;  %s2581_s28 = smov [#allocation4]  }
0x16a4   :  { %v1203_v60 = vadd.f32 %v1201_v37, %v1179_v12  ;;  %v3679_v12 = vld [vmem:[%s4106_s5] sm:$0x1] }
0x16a5   :  { %v3605_v36 = vpop.xlane.xlu1 %1177  ;;  %v1470_v14 = vmul.f32 %v3679_v12, %v1469_v15 }
0x16a6   :  { %v1205_v38 = vmul.f32 %v1203_v60, %v2972_v9 }
0x16a7   :  { %v1471_v19 = vadd.f32 %v3685_v28, %v1470_v14 }
0x16a9   :  { %v1473_v37 = vperm.slane %v1471_v19, 0 }
0x16ad   :  { %v1327_v57 = vpop.xlane.xlu1 %1326 }
0x16ae   :  { %v1331_v61 = vsub.f32 0.0, %v1327_v57  ;;  %v1207_v57 = vadd.f32 %v1205_v38, %v949_v39  ;;  %v3699_v39 = vld [vmem:[%s4107_s6 + $0x18] sm:$0xff] }
0x16b0   :  { %v1453_v40 = vmul.f32 2.0, %v1331_v61 }
0x16b2   :  { %v1455_v32 = vadd.f32 %v1453_v40, %v1278_v27 }
0x16b4   :  { %v1459_v50 = vadd.f32 %v1457_v18, %v1455_v32 }
0x16f4   :  { %v1433_v24 = vpop.xlane.xlu2 %1432 }
0x16f5   :  { %v1437_v53 = vsub.f32 0.0, %v1433_v24 }
0x16f7   :  { %v1461_v41 = vadd.f32 %v1459_v50, %v1437_v53 }
0x16f9   :  { %v1463_v49 = vmul.f32 %v1461_v41, %v2972_v9 }
0x16fb   :  { %v3626_v44 = vadd.f32 %v1463_v49, %v1207_v57  ;;  %v3707_v49 = vld [vmem:[%s4107_s6 + $0x10] sm:$0xff] }
0x1707   :  { %v1420_v55 = vpop.f32.mrf.mxu2 }
0x1708   :  { %v1421_v3 = vadd.f32 %v3288_v47, %v1420_v55  ;;  %v3713_v55 = vld [vmem:[%s4107_s6 + $0x8] sm:$0xff] }
0x170a   :  { %v1447_v0 = vadd.f32 %v3548_v45, %v1421_v3  ;;  %v3666_v45 = vld [vmem:[%s4104_s3 + $0x8] sm:$0xff]  ;;  %v3719_v3 = vld [vmem:[%s4107_s6] sm:$0xff]  ;;  %s4121_s6 = sadd.f32 %s2779_s12, %s2723_s19 }
0x170c   :  { %v1449_v16 = vmul.f32 %v1447_v0, %v2972_v9 }
0x170e   :  { %v3635_v61 = vadd.f32 %v1449_v16, %v3414_v31  ;;  %v3654_v31 = vld [vmem:[%s4104_s3 + $0x18] sm:$0xff] }
0x170f   :  { %v1422_v56 = vpop.f32.mrf.mxu2 }
0x1710   :  { %v1423_v1 = vadd.f32 %v3288_v47, %v1422_v56  ;;  %v3648_v47 = vld [vmem:[%s4104_s3 + $0x20] sm:$0xff] }
0x1711   :  { %v3725_v56 = vld [vmem:[%s4108_s7] ss:$0 sm:$0xff] }
0x1712   :  { %v1448_v46 = vadd.f32 %v3556_v10, %v1423_v1  ;;  %v3672_v10 = vld [vmem:[%s4104_s3] sm:$0xff] }
0x1714   :  { %v1450_v6 = vmul.f32 %v1448_v46, %v2972_v9 }
0x1716   :  { %v3638_v35 = vadd.f32 %v1450_v6, %v3417_v23  ;;  %v3660_v23 = vld [vmem:[%s4104_s3 + $0x10] sm:$0xff] }
0x1718   :  { %v1489_v2 = vpack.c.bf16 %v3638_v35, %v3635_v61 }
0x171a   :  { %1498 = vmatmul.bf16.vlgmr.msrb.gmra.mxu3 %v1489_v2 }
0x171b   :  { %1748 = vmatpush.bf16.msrb.mxu3 %v3561_v21 }
0x171f   :  { %1749 = vmatpush.bf16.msrb.mxu3 %v3567_v29 }
0x1723   :  { %1750 = vmatpush.bf16.msrb.mxu3 %v3573_v17 }
0x1727   :  { %1751 = vmatpush.bf16.msrb.mxu3 %v3648_v47 }
0x172b   :  { %1752 = vmatpush.bf16.msrb.mxu3 %v3654_v31 }
0x172f   :  { %1753 = vmatpush.bf16.msrb.mxu3 %v3660_v23 }
0x1733   :  { %1754 = vmatpush.bf16.msrb.mxu3 %v3666_v45 }
0x1737   :  { %1755 = vmatpush.bf16.msrb.mxu3 %v3672_v10 }
0x179d   :  { %v1499_v40 = vpop.f32.mrf.mxu3 }
0x179e   :  { %v1500_v11 = vadd.f32 %v1499_v40, %v1473_v37 }
0x17a0   :  { %2457 = vtanh.f32 %v1500_v11 }
0x17a5   :  { %v1501_v13 = vpop.f32.mrf.mxu3 }
0x17a6   :  { %v2458_v60 = vpop.eup %2457  ;;  %v1502_v27 = vadd.f32 %v1501_v13, %v1473_v37  ;;  %v1476_v37 = vstv %s1475_s30  ;;  %s2250_s30 = sshll.u32 %s2581_s28, 4  ;;  %s2251_s30 = int_to_ptr.vmem [resolvable:$true] %s2250_s30 }
0x17a7   :  { %v1524_v18 = vmul.f32 %v2458_v60, %v2458_v60  ;;  %v1477_v40 = vmul.f32 %v3679_v12, %v1476_v37 }
0x17a8   :  { %2459 = vtanh.f32 %v1502_v27 }
0x17a9   :  { %v1526_v25 = vsub.f32 1.0, %v1524_v18  ;;  %v1478_v11 = vadd.f32 %v3685_v28, %v1477_v40 }
0x17ab   :  { %v1528_v32 = vmul.f32 %v3691_v20, %v1526_v25  ;;  %v1480_v13 = vperm.slane %v1478_v11, 0 }
0x17ad   :  { %v1530_v24 = vsel %vm205_vm2, %v1528_v32, 0.0 }
0x17ae   :  { %v2460_v22 = vpop.eup %2459  ;;  %1531 = vadd.xlane.f32.xlu1 %v1530_v24 }
0x17af   :  { %v1506_v38 = vpack.c.bf16 %v2460_v22, %v2458_v60  ;;  %v1525_v50 = vmul.f32 %v2460_v22, %v2460_v22 }
0x17b1   :  { %2337 = vmatmul.msk.bf16.vlgmr.msra.gmra.mxu1 %vm205_vm2, %v1506_v38  ;;  %v1527_v53 = vsub.f32 1.0, %v1525_v50 }
0x17b2   :  { %1772 = vmatpush.bf16.msra.mxu1 %v3699_v39 }
0x17b3   :  { %v1529_v41 = vmul.f32 %v3691_v20, %v1527_v53 }
0x17b5   :  { %v1533_v57 = vsel %vm205_vm2, %v1529_v41, 0.0 }
0x17b6   :  { %1534 = vadd.xlane.f32.xlu2 %v1533_v57  ;;  %1773 = vmatpush.bf16.msra.mxu1 %v3707_v49 }
0x17ba   :  { %1774 = vmatpush.bf16.msra.mxu1 %v3713_v55 }
0x17be   :  { %1775 = vmatpush.bf16.msra.mxu1 %v3719_v3 }
0x182e   :  { %v1519_v0 = vpop.f32.mrf.mxu1 }
0x182f   :  { %v3728_v1 = vadd.f32 %v3725_v56, %v1519_v0 }
0x1831   :  { %v1538_v46 = vmul.f32 %v3728_v1, %v2878_v54 }
0x1833   :  { %v1540_v15 = vadd.f32 %v1538_v46, %v3635_v61 }
0x1836   :  { %v1521_v16 = vpop.f32.mrf.mxu1 }
0x1837   :  { %v3733_v6 = vadd.f32 %v3725_v56, %v1521_v16 }
0x1839   :  { %v1539_v2 = vmul.f32 %v3733_v6, %v2878_v54 }
0x183b   :  { %v1541_v14 = vadd.f32 %v1539_v2, %v3638_v35 }
0x183d   :  { %v1542_v19 = vpack.c.bf16 %v1541_v14, %v1540_v15 }
0x183f   :  { %1551 = vmatmul.bf16.vlgmr.msra.gmra.mxu2 %v1542_v19 }
0x1840   :  { %1801 = vmatpush.bf16.msra.mxu2 %v3561_v21 }
0x1844   :  { %1802 = vmatpush.bf16.msra.mxu2 %v3567_v29 }
0x1848   :  { %1803 = vmatpush.bf16.msra.mxu2 %v3573_v17 }
0x184c   :  { %1804 = vmatpush.bf16.msra.mxu2 %v3648_v47 }
0x1850   :  { %1805 = vmatpush.bf16.msra.mxu2 %v3654_v31 }
0x1854   :  { %1806 = vmatpush.bf16.msra.mxu2 %v3660_v23 }
0x1858   :  { %1807 = vmatpush.bf16.msra.mxu2 %v3666_v45 }
0x185c   :  { %1808 = vmatpush.bf16.msra.mxu2 %v3672_v10 }
0x18c2   :  { %v1552_v60 = vpop.f32.mrf.mxu2 }
0x18c3   :  { %v1553_v27 = vadd.f32 %v1552_v60, %v1480_v13 }
0x18c5   :  { %2461 = vtanh.f32 %v1553_v27 }
0x18ca   :  { %v1554_v18 = vpop.f32.mrf.mxu2 }
0x18cb   :  { %v2462_v25 = vpop.eup %2461  ;;  %v1555_v32 = vadd.f32 %v1554_v18, %v1480_v13 }
0x18cc   :  { %v1577_v24 = vmul.f32 %v2462_v25, %v2462_v25 }
0x18cd   :  { %2463 = vtanh.f32 %v1555_v32 }
0x18ce   :  { %v1579_v22 = vsub.f32 1.0, %v1577_v24 }
0x18d0   :  { %v1581_v38 = vmul.f32 %v3691_v20, %v1579_v22 }
0x18d2   :  { %v1583_v50 = vsel %vm205_vm2, %v1581_v38, 0.0 }
0x18d3   :  { %v2464_v53 = vpop.eup %2463  ;;  %1584 = vadd.xlane.f32.xlu0 %v1583_v50 }
0x18d4   :  { %v1559_v41 = vpack.c.bf16 %v2464_v53, %v2462_v25  ;;  %v1578_v57 = vmul.f32 %v2464_v53, %v2464_v53 }
0x18d6   :  { %2338 = vmatmul.msk.bf16.vlgmr.msrb.gmra.mxu0 %vm205_vm2, %v1559_v41  ;;  %v1580_v0 = vsub.f32 1.0, %v1578_v57 }
0x18d7   :  { %1825 = vmatpush.bf16.msrb.mxu0 %v3699_v39 }
0x18d8   :  { %v1582_v16 = vmul.f32 %v3691_v20, %v1580_v0 }
0x18da   :  { %v1586_v46 = vsel %vm205_vm2, %v1582_v16, 0.0 }
0x18db   :  { %1587 = vadd.xlane.f32.xlu1 %v1586_v46  ;;  %1826 = vmatpush.bf16.msrb.mxu0 %v3707_v49 }
0x18df   :  { %1827 = vmatpush.bf16.msrb.mxu0 %v3713_v55 }
0x18e3   :  { %1828 = vmatpush.bf16.msrb.mxu0 %v3719_v3 }
0x1953   :  { %v1572_v2 = vpop.f32.mrf.mxu0 }
0x1954   :  { %v1573_v15 = vadd.f32 %v3725_v56, %v1572_v2 }
0x1956   :  { %v1591_v19 = vmul.f32 %v1573_v15, %v2878_v54 }
0x1958   :  { %v1593_v11 = vadd.f32 %v1591_v19, %v3635_v61 }
0x195b   :  { %v1574_v14 = vpop.f32.mrf.mxu0 }
0x195c   :  { %v1575_v37 = vadd.f32 %v3725_v56, %v1574_v14  ;;  %v1697_v14 = vmul.f32 2.0, %v1573_v15 }
0x195e   :  { %v1592_v40 = vmul.f32 %v1575_v37, %v2878_v54 }
0x1960   :  { %v1594_v60 = vadd.f32 %v1592_v40, %v3638_v35 }
0x1962   :  { %v1595_v27 = vpack.c.bf16 %v1594_v60, %v1593_v11  ;;  %v1699_v11 = vadd.f32 %v1697_v14, %v3728_v1 }
0x1964   :  { %1604 = vmatmul.bf16.vlgmr.msrb.gmra.mxu1 %v1595_v27 }
0x1965   :  { %1854 = vmatpush.bf16.msrb.mxu1 %v3561_v21 }
0x1969   :  { %1855 = vmatpush.bf16.msrb.mxu1 %v3567_v29 }
0x196d   :  { %1856 = vmatpush.bf16.msrb.mxu1 %v3573_v17 }
0x1971   :  { %1857 = vmatpush.bf16.msrb.mxu1 %v3648_v47 }
0x1975   :  { %1858 = vmatpush.bf16.msrb.mxu1 %v3654_v31 }
0x1979   :  { %1859 = vmatpush.bf16.msrb.mxu1 %v3660_v23 }
0x197d   :  { %1860 = vmatpush.bf16.msrb.mxu1 %v3666_v45 }
0x1981   :  { %1861 = vmatpush.bf16.msrb.mxu1 %v3672_v10 }
0x19e1   :  { %v1605_v18 = vpop.f32.mrf.mxu1 }
0x19e2   :  { %v1606_v25 = vadd.f32 %v1605_v18, %v1480_v13  ;;  %v1698_v18 = vmul.f32 2.0, %v1575_v37 }
0x19e4   :  { %2465 = vtanh.f32 %v1606_v25 }
0x19e9   :  { %v1607_v32 = vpop.f32.mrf.mxu1 }
0x19ea   :  { %v2466_v24 = vpop.eup %2465  ;;  %v1608_v22 = vadd.f32 %v1607_v32, %v1480_v13 }
0x19eb   :  { %v1630_v38 = vmul.f32 %v2466_v24, %v2466_v24 }
0x19ec   :  { %2467 = vtanh.f32 %v1608_v22  ;;  %v1700_v22 = vadd.f32 %v1698_v18, %v3733_v6  ;;  %v1483_v6 = vstv %s1482_s11 }
0x19ed   :  { %v1632_v50 = vsub.f32 1.0, %v1630_v38  ;;  %v1484_v37 = vmul.f32 %v3679_v12, %v1483_v6 }
0x19ef   :  { %v1634_v53 = vmul.f32 %v3691_v20, %v1632_v50 }
0x19f1   :  { %v1636_v41 = vsel %vm205_vm2, %v1634_v53, 0.0 }
0x19f2   :  { %v2468_v57 = vpop.eup %2467  ;;  %1637 = vadd.xlane.f32.xlu2 %v1636_v41 }
0x19f3   :  { %v1612_v0 = vpack.c.bf16 %v2468_v57, %v2466_v24  ;;  %v1631_v16 = vmul.f32 %v2468_v57, %v2468_v57  ;;  %v1485_v57 = vadd.f32 %v3685_v28, %v1484_v37 }
0x19f5   :  { %2339 = vmatmul.msk.bf16.vlgmr.msra.gmra.mxu3 %vm205_vm2, %v1612_v0  ;;  %v1633_v46 = vsub.f32 1.0, %v1631_v16  ;;  %v1487_v0 = vperm.slane %v1485_v57, 0 }
0x19f6   :  { %1878 = vmatpush.bf16.msra.mxu3 %v3699_v39 }
0x19f7   :  { %v1635_v2 = vmul.f32 %v3691_v20, %v1633_v46 }
0x19f9   :  { %v1639_v13 = vsel %vm205_vm2, %v1635_v2, 0.0 }
0x19fa   :  { %1640 = vadd.xlane.f32.xlu0 %v1639_v13  ;;  %1879 = vmatpush.bf16.msra.mxu3 %v3707_v49 }
0x19fe   :  { %1880 = vmatpush.bf16.msra.mxu3 %v3713_v55 }
0x1a02   :  { %1881 = vmatpush.bf16.msra.mxu3 %v3719_v3 }
0x1a78   :  { %v1625_v19 = vpop.f32.mrf.mxu3 }
0x1a79   :  { %v1626_v40 = vadd.f32 %v3725_v56, %v1625_v19 }
0x1a7b   :  { %v1701_v60 = vmul.f32 2.0, %v1626_v40  ;;  %v1644_v32 = vmul.f32 %v1626_v40, %v2943_v30 }
0x1a7d   :  { %v1703_v27 = vadd.f32 %v1701_v60, %v1699_v11  ;;  %v1646_v50 = vadd.f32 %v1644_v32, %v3635_v61 }
0x1a80   :  { %v1627_v25 = vpop.f32.mrf.mxu3 }
0x1a81   :  { %v1628_v24 = vadd.f32 %v3725_v56, %v1627_v25 }
0x1a83   :  { %v1645_v38 = vmul.f32 %v1628_v24, %v2943_v30  ;;  %v1702_v15 = vmul.f32 2.0, %v1628_v24 }
0x1a85   :  { %v1647_v53 = vadd.f32 %v1645_v38, %v3638_v35  ;;  %v1704_v1 = vadd.f32 %v1702_v15, %v1700_v22 }
0x1a87   :  { %v1648_v41 = vpack.c.bf16 %v1647_v53, %v1646_v50 }
0x1a89   :  { %1657 = vmatmul.bf16.vlgmr.msra.gmra.mxu0 %v1648_v41 }
0x1a8a   :  { %1907 = vmatpush.bf16.msra.mxu0 %v3561_v21 }
0x1a8e   :  { %1908 = vmatpush.bf16.msra.mxu0 %v3567_v29 }
0x1a92   :  { %1909 = vmatpush.bf16.msra.mxu0 %v3573_v17 }
0x1a96   :  { %1910 = vmatpush.bf16.msra.mxu0 %v3648_v47 }
0x1a9a   :  { %1911 = vmatpush.bf16.msra.mxu0 %v3654_v31 }
0x1a9e   :  { %1912 = vmatpush.bf16.msra.mxu0 %v3660_v23 }
0x1aa2   :  { %1913 = vmatpush.bf16.msra.mxu0 %v3666_v45 }
0x1aa6   :  { %1914 = vmatpush.bf16.msra.mxu0 %v3672_v10 }
0x1b06   :  { %v1658_v16 = vpop.f32.mrf.mxu0 }
0x1b07   :  { %v1659_v46 = vadd.f32 %v1658_v16, %v1487_v0 }
0x1b09   :  { %2469 = vtanh.f32 %v1659_v46 }
0x1b0e   :  { %v1660_v2 = vpop.f32.mrf.mxu0 }
0x1b0f   :  { %v2470_v13 = vpop.eup %2469  ;;  %v1661_v14 = vadd.f32 %v1660_v2, %v1487_v0 }
0x1b10   :  { %v1683_v19 = vmul.f32 %v2470_v13, %v2470_v13 }
0x1b11   :  { %2471 = vtanh.f32 %v1661_v14 }
0x1b12   :  { %v1685_v40 = vsub.f32 1.0, %v1683_v19 }
0x1b14   :  { %v1687_v11 = vmul.f32 %v3691_v20, %v1685_v40 }
0x1b16   :  { %v1689_v60 = vsel %vm205_vm2, %v1687_v11, 0.0 }
0x1b17   :  { %v2472_v18 = vpop.eup %2471  ;;  %1690 = vadd.xlane.f32.xlu0 %v1689_v60 }
0x1b18   :  { %v1665_v25 = vpack.c.bf16 %v2472_v18, %v2470_v13  ;;  %v1684_v32 = vmul.f32 %v2472_v18, %v2472_v18 }
0x1b1a   :  { %2340 = vmatmul.msk.bf16.vlgmr.msrb.gmra.mxu2 %vm205_vm2, %v1665_v25  ;;  %v1686_v24 = vsub.f32 1.0, %v1684_v32 }
0x1b1b   :  { %1931 = vmatpush.bf16.msrb.mxu2 %v3699_v39 }
0x1b1c   :  { %v1688_v22 = vmul.f32 %v3691_v20, %v1686_v24 }
0x1b1e   :  { %v1692_v38 = vsel %vm205_vm2, %v1688_v22, 0.0 }
0x1b1f   :  { %1693 = vadd.xlane.f32.xlu1 %v1692_v38  ;;  %1932 = vmatpush.bf16.msrb.mxu2 %v3707_v49 }
0x1b23   :  { %1933 = vmatpush.bf16.msrb.mxu2 %v3713_v55 }
0x1b27   :  { %1934 = vmatpush.bf16.msrb.mxu2 %v3719_v3 }
0x1b9d   :  { %v1678_v15 = vpop.f32.mrf.mxu2 }
0x1b9e   :  { %v1679_v50 = vadd.f32 %v3725_v56, %v1678_v15 }
0x1ba0   :  { %v1705_v53 = vadd.f32 %v1703_v27, %v1679_v50 }
0x1ba2   :  { %v1707_v37 = vmul.f32 %v1705_v53, %v2972_v9 }
0x1ba4   :  { %v3819_v16 = vadd.f32 %v1707_v37, %v3635_v61  ;;  %v1727_v61 = vstv %s2779_s12 }
0x1ba5   :  { %v1680_v41 = vpop.f32.mrf.mxu2 }
0x1ba6   :  { %v1681_v6 = vadd.f32 %v3725_v56, %v1680_v41 }
0x1ba8   :  { %v1706_v57 = vadd.f32 %v1704_v1, %v1681_v6 }
0x1baa   :  { %v1708_v0 = vmul.f32 %v1706_v57, %v2972_v9 }
0x1bac   :  { %v3822_v46 = vadd.f32 %v1708_v0, %v3638_v35  ;;  %v1728_v35 = vmul.f32 %v3679_v12, %v1727_v61 }
0x1bae   :  { %v1747_v2 = vpack.c.bf16 %v3822_v46, %v3819_v16  ;;  %v1729_v27 = vadd.f32 %v3685_v28, %v1728_v35 }
0x1bb0   :  { %1756 = vmatmul.bf16.vlgmr.msrb.gmra.mxu3 %v1747_v2  ;;  %v1731_v1 = vperm.slane %v1729_v27, 0 }
0x1bb1   :  { %2006 = vmatpush.bf16.msrb.mxu3 %v3561_v21 }
0x1bb5   :  { %2007 = vmatpush.bf16.msrb.mxu3 %v3567_v29 }
0x1bb9   :  { %2008 = vmatpush.bf16.msrb.mxu3 %v3573_v17 }
0x1bbd   :  { %2009 = vmatpush.bf16.msrb.mxu3 %v3648_v47 }
0x1bc1   :  { %2010 = vmatpush.bf16.msrb.mxu3 %v3654_v31 }
0x1bc5   :  { %2011 = vmatpush.bf16.msrb.mxu3 %v3660_v23 }
0x1bc9   :  { %2012 = vmatpush.bf16.msrb.mxu3 %v3666_v45 }
0x1bcd   :  { %2013 = vmatpush.bf16.msrb.mxu3 %v3672_v10 }
0x1c33   :  { %v1757_v13 = vpop.f32.mrf.mxu3 }
0x1c34   :  { %v1758_v14 = vadd.f32 %v1757_v13, %v1731_v1 }
0x1c36   :  { %2473 = vtanh.f32 %v1758_v14 }
0x1c3b   :  { %v1759_v19 = vpop.f32.mrf.mxu3 }
0x1c3c   :  { %v2474_v40 = vpop.eup %2473  ;;  %v1760_v11 = vadd.f32 %v1759_v19, %v1731_v1  ;;  %v1734_v1 = vstv %s1733_s23 }
0x1c3d   :  { %v1782_v60 = vmul.f32 %v2474_v40, %v2474_v40  ;;  %v1735_v13 = vmul.f32 %v3679_v12, %v1734_v1 }
0x1c3e   :  { %2475 = vtanh.f32 %v1760_v11 }
0x1c3f   :  { %v1784_v18 = vsub.f32 1.0, %v1782_v60  ;;  %v1736_v14 = vadd.f32 %v3685_v28, %v1735_v13 }
0x1c41   :  { %v1786_v25 = vmul.f32 %v3691_v20, %v1784_v18  ;;  %v1738_v19 = vperm.slane %v1736_v14, 0 }
0x1c43   :  { %v1788_v32 = vsel %vm205_vm2, %v1786_v25, 0.0 }
0x1c44   :  { %v2476_v24 = vpop.eup %2475  ;;  %1789 = vadd.xlane.f32.xlu0 %v1788_v32 }
0x1c45   :  { %v1764_v22 = vpack.c.bf16 %v2476_v24, %v2474_v40  ;;  %v1783_v38 = vmul.f32 %v2476_v24, %v2476_v24 }
0x1c47   :  { %2341 = vmatmul.msk.bf16.vlgmr.msra.gmra.mxu1 %vm205_vm2, %v1764_v22  ;;  %v1785_v15 = vsub.f32 1.0, %v1783_v38 }
0x1c48   :  { %2030 = vmatpush.bf16.msra.mxu1 %v3699_v39 }
0x1c49   :  { %v1787_v50 = vmul.f32 %v3691_v20, %v1785_v15 }
0x1c4b   :  { %v1791_v53 = vsel %vm205_vm2, %v1787_v50, 0.0 }
0x1c4c   :  { %1792 = vadd.xlane.f32.xlu1 %v1791_v53  ;;  %2031 = vmatpush.bf16.msra.mxu1 %v3707_v49 }
0x1c50   :  { %2032 = vmatpush.bf16.msra.mxu1 %v3713_v55 }
0x1c54   :  { %2033 = vmatpush.bf16.msra.mxu1 %v3719_v3 }
0x1cc4   :  { %v1777_v41 = vpop.f32.mrf.mxu1 }
0x1cc5   :  { %v3847_v6 = vadd.f32 %v3725_v56, %v1777_v41 }
0x1cc7   :  { %v1796_v57 = vmul.f32 %v3847_v6, %v2878_v54 }
0x1cc9   :  { %v1798_v61 = vadd.f32 %v1796_v57, %v3819_v16 }
0x1ccc   :  { %v1779_v37 = vpop.f32.mrf.mxu1 }
0x1ccd   :  { %v3852_v0 = vadd.f32 %v3725_v56, %v1779_v37 }
0x1ccf   :  { %v1797_v2 = vmul.f32 %v3852_v0, %v2878_v54 }
0x1cd1   :  { %v1799_v35 = vadd.f32 %v1797_v2, %v3822_v46 }
0x1cd3   :  { %v1800_v27 = vpack.c.bf16 %v1799_v35, %v1798_v61 }
0x1cd5   :  { %1809 = vmatmul.bf16.vlgmr.msra.gmra.mxu2 %v1800_v27 }
0x1cd6   :  { %2059 = vmatpush.bf16.msra.mxu2 %v3561_v21 }
0x1cda   :  { %2060 = vmatpush.bf16.msra.mxu2 %v3567_v29 }
0x1cde   :  { %2061 = vmatpush.bf16.msra.mxu2 %v3573_v17 }
0x1ce2   :  { %2062 = vmatpush.bf16.msra.mxu2 %v3648_v47 }
0x1ce6   :  { %2063 = vmatpush.bf16.msra.mxu2 %v3654_v31 }
0x1cea   :  { %2064 = vmatpush.bf16.msra.mxu2 %v3660_v23 }
0x1cee   :  { %2065 = vmatpush.bf16.msra.mxu2 %v3666_v45 }
0x1cf2   :  { %2066 = vmatpush.bf16.msra.mxu2 %v3672_v10 }
0x1d58   :  { %v1810_v40 = vpop.f32.mrf.mxu2 }
0x1d59   :  { %v1811_v11 = vadd.f32 %v1810_v40, %v1738_v19 }
0x1d5b   :  { %2477 = vtanh.f32 %v1811_v11 }
0x1d60   :  { %v1812_v60 = vpop.f32.mrf.mxu2 }
0x1d61   :  { %v2478_v18 = vpop.eup %2477  ;;  %v1813_v25 = vadd.f32 %v1812_v60, %v1738_v19 }
0x1d62   :  { %v1835_v32 = vmul.f32 %v2478_v18, %v2478_v18 }
0x1d63   :  { %2479 = vtanh.f32 %v1813_v25 }
0x1d64   :  { %v1837_v24 = vsub.f32 1.0, %v1835_v32 }
0x1d66   :  { %v1839_v22 = vmul.f32 %v3691_v20, %v1837_v24 }
0x1d68   :  { %v1841_v38 = vsel %vm205_vm2, %v1839_v22, 0.0 }
0x1d69   :  { %v2480_v15 = vpop.eup %2479  ;;  %1842 = vadd.xlane.f32.xlu1 %v1841_v38 }
0x1d6a   :  { %v1817_v50 = vpack.c.bf16 %v2480_v15, %v2478_v18  ;;  %v1836_v53 = vmul.f32 %v2480_v15, %v2480_v15 }
0x1d6c   :  { %2342 = vmatmul.msk.bf16.vlgmr.msrb.gmra.mxu0 %vm205_vm2, %v1817_v50  ;;  %v1838_v41 = vsub.f32 1.0, %v1836_v53 }
0x1d6d   :  { %2083 = vmatpush.bf16.msrb.mxu0 %v3699_v39 }
0x1d6e   :  { %v1840_v37 = vmul.f32 %v3691_v20, %v1838_v41 }
0x1d70   :  { %v1844_v57 = vsel %vm205_vm2, %v1840_v37, 0.0 }
0x1d71   :  { %1845 = vadd.xlane.f32.xlu2 %v1844_v57  ;;  %2084 = vmatpush.bf16.msrb.mxu0 %v3707_v49 }
0x1d75   :  { %2085 = vmatpush.bf16.msrb.mxu0 %v3713_v55 }
0x1d79   :  { %2086 = vmatpush.bf16.msrb.mxu0 %v3719_v3 }
0x1de9   :  { %v1830_v2 = vpop.f32.mrf.mxu0 }
0x1dea   :  { %v1831_v61 = vadd.f32 %v3725_v56, %v1830_v2 }
0x1dec   :  { %v1849_v27 = vmul.f32 %v1831_v61, %v2878_v54 }
0x1dee   :  { %v1851_v14 = vadd.f32 %v1849_v27, %v3819_v16 }
0x1df1   :  { %v1832_v35 = vpop.f32.mrf.mxu0 }
0x1df2   :  { %v1833_v1 = vadd.f32 %v3725_v56, %v1832_v35  ;;  %v1955_v35 = vmul.f32 2.0, %v1831_v61 }
0x1df4   :  { %v1850_v13 = vmul.f32 %v1833_v1, %v2878_v54 }
0x1df6   :  { %v1852_v40 = vadd.f32 %v1850_v13, %v3822_v46 }
0x1df8   :  { %v1853_v11 = vpack.c.bf16 %v1852_v40, %v1851_v14  ;;  %v1957_v14 = vadd.f32 %v1955_v35, %v3847_v6 }
0x1dfa   :  { %1862 = vmatmul.bf16.vlgmr.msrb.gmra.mxu1 %v1853_v11 }
0x1dfb   :  { %2112 = vmatpush.bf16.msrb.mxu1 %v3561_v21 }
0x1dff   :  { %2113 = vmatpush.bf16.msrb.mxu1 %v3567_v29 }
0x1e03   :  { %2114 = vmatpush.bf16.msrb.mxu1 %v3573_v17 }
0x1e07   :  { %2115 = vmatpush.bf16.msrb.mxu1 %v3648_v47 }
0x1e0b   :  { %2116 = vmatpush.bf16.msrb.mxu1 %v3654_v31 }
0x1e0f   :  { %2117 = vmatpush.bf16.msrb.mxu1 %v3660_v23 }
0x1e13   :  { %2118 = vmatpush.bf16.msrb.mxu1 %v3666_v45 }
0x1e17   :  { %2119 = vmatpush.bf16.msrb.mxu1 %v3672_v10 }
0x1e77   :  { %v1863_v60 = vpop.f32.mrf.mxu1 }
0x1e78   :  { %v1864_v18 = vadd.f32 %v1863_v60, %v1738_v19  ;;  %v1956_v60 = vmul.f32 2.0, %v1833_v1 }
0x1e7a   :  { %2481 = vtanh.f32 %v1864_v18 }
0x1e7f   :  { %v1865_v25 = vpop.f32.mrf.mxu1 }
0x1e80   :  { %v2482_v32 = vpop.eup %2481  ;;  %v1866_v24 = vadd.f32 %v1865_v25, %v1738_v19 }
0x1e81   :  { %v1888_v22 = vmul.f32 %v2482_v32, %v2482_v32 }
0x1e82   :  { %2483 = vtanh.f32 %v1866_v24  ;;  %v1958_v24 = vadd.f32 %v1956_v60, %v3852_v0  ;;  %v1741_v0 = vstv %s4121_s6 }
0x1e83   :  { %v1890_v38 = vsub.f32 1.0, %v1888_v22  ;;  %v1742_v1 = vmul.f32 %v3679_v12, %v1741_v0 }
0x1e85   :  { %v1892_v15 = vmul.f32 %v3691_v20, %v1890_v38 }
0x1e87   :  { %v1894_v50 = vsel %vm205_vm2, %v1892_v15, 0.0 }
0x1e88   :  { %v2484_v53 = vpop.eup %2483  ;;  %1895 = vadd.xlane.f32.xlu2 %v1894_v50 }
0x1e89   :  { %v1870_v41 = vpack.c.bf16 %v2484_v53, %v2482_v32  ;;  %v1889_v37 = vmul.f32 %v2484_v53, %v2484_v53 }
0x1e8b   :  { %2343 = vmatmul.msk.bf16.vlgmr.msra.gmra.mxu3 %vm205_vm2, %v1870_v41  ;;  %v1891_v57 = vsub.f32 1.0, %v1889_v37 }
0x1e8c   :  { %2136 = vmatpush.bf16.msra.mxu3 %v3699_v39 }
0x1e8d   :  { %v1893_v2 = vmul.f32 %v3691_v20, %v1891_v57 }
0x1e8f   :  { %v1897_v19 = vsel %vm205_vm2, %v1893_v2, 0.0 }
0x1e90   :  { %1898 = vadd.xlane.f32.xlu0 %v1897_v19  ;;  %2137 = vmatpush.bf16.msra.mxu3 %v3707_v49 }
0x1e94   :  { %2138 = vmatpush.bf16.msra.mxu3 %v3713_v55 }
0x1e98   :  { %2139 = vmatpush.bf16.msra.mxu3 %v3719_v3 }
0x1f0e   :  { %v1883_v27 = vpop.f32.mrf.mxu3 }
0x1f0f   :  { %v1884_v13 = vadd.f32 %v3725_v56, %v1883_v27 }
0x1f11   :  { %v1959_v40 = vmul.f32 2.0, %v1884_v13  ;;  %v1902_v25 = vmul.f32 %v1884_v13, %v2943_v30 }
0x1f13   :  { %v1961_v11 = vadd.f32 %v1959_v40, %v1957_v14  ;;  %v1904_v38 = vadd.f32 %v1902_v25, %v3819_v16 }
0x1f16   :  { %v1885_v18 = vpop.f32.mrf.mxu3 }
0x1f17   :  { %v1886_v32 = vadd.f32 %v3725_v56, %v1885_v18 }
0x1f19   :  { %v1903_v22 = vmul.f32 %v1886_v32, %v2943_v30  ;;  %v1960_v61 = vmul.f32 2.0, %v1886_v32 }
0x1f1b   :  { %v1905_v15 = vadd.f32 %v1903_v22, %v3822_v46  ;;  %v1962_v6 = vadd.f32 %v1960_v61, %v1958_v24 }
0x1f1d   :  { %v1906_v50 = vpack.c.bf16 %v1905_v15, %v1904_v38 }
0x1f1f   :  { %1915 = vmatmul.bf16.vlgmr.msra.gmra.mxu0 %v1906_v50 }
0x1f20   :  { %2165 = vmatpush.bf16.msra.mxu0 %v3561_v21  ;;  %v1743_v21 = vadd.f32 %v3685_v28, %v1742_v1 }
0x1f22   :  { %v1745_v53 = vperm.slane %v1743_v21, 0 }
0x1f24   :  { %2166 = vmatpush.bf16.msra.mxu0 %v3567_v29 }
0x1f28   :  { %2167 = vmatpush.bf16.msra.mxu0 %v3573_v17 }
0x1f2c   :  { %2168 = vmatpush.bf16.msra.mxu0 %v3648_v47 }
0x1f30   :  { %2169 = vmatpush.bf16.msra.mxu0 %v3654_v31 }
0x1f34   :  { %2170 = vmatpush.bf16.msra.mxu0 %v3660_v23 }
0x1f38   :  { %2171 = vmatpush.bf16.msra.mxu0 %v3666_v45 }
0x1f3c   :  { %2172 = vmatpush.bf16.msra.mxu0 %v3672_v10 }
0x1f9c   :  { %v1916_v29 = vpop.f32.mrf.mxu0 }
0x1f9d   :  { %v1917_v41 = vadd.f32 %v1916_v29, %v1745_v53 }
0x1f9f   :  { %2485 = vtanh.f32 %v1917_v41 }
0x1fa4   :  { %v1918_v17 = vpop.f32.mrf.mxu0 }
0x1fa5   :  { %v2486_v47 = vpop.eup %2485  ;;  %v1919_v37 = vadd.f32 %v1918_v17, %v1745_v53 }
0x1fa6   :  { %v1941_v31 = vmul.f32 %v2486_v47, %v2486_v47 }
0x1fa7   :  { %2487 = vtanh.f32 %v1919_v37 }
0x1fa8   :  { %v1943_v23 = vsub.f32 1.0, %v1941_v31 }
0x1faa   :  { %v1945_v45 = vmul.f32 %v3691_v20, %v1943_v23 }
0x1fac   :  { %v1947_v10 = vsel %vm205_vm2, %v1945_v45, 0.0 }
0x1fad   :  { %v3926_v57 = vpop.eup %2487  ;;  %1948 = vadd.xlane.f32.xlu0 %v1947_v10 }
0x1fae   :  { %v1923_v2 = vpack.c.bf16 %v3926_v57, %v2486_v47 }
0x1fb0   :  { %2344 = vmatmul.msk.bf16.vlgmr.msrb.gmra.mxu2 %vm205_vm2, %v1923_v2 }
0x1fb1   :  { %2189 = vmatpush.bf16.msrb.mxu2 %v3699_v39 }
0x1fb5   :  { %2190 = vmatpush.bf16.msrb.mxu2 %v3707_v49 }
0x1fb9   :  { %2191 = vmatpush.bf16.msrb.mxu2 %v3713_v55 }
0x1fbd   :  { %2192 = vmatpush.bf16.msrb.mxu2 %v3719_v3  ;;  %v1985_v3 = vstv %s2792_s22 }
0x2033   :  { %v1936_v19 = vpop.f32.mrf.mxu2 }
0x2034   :  { %v1937_v35 = vadd.f32 %v3725_v56, %v1936_v19 }
0x2036   :  { %v1963_v27 = vadd.f32 %v1961_v11, %v1937_v35  ;;  %v1986_v11 = vmul.f32 %v3679_v12, %v1985_v3  ;;  %v1992_v35 = vstv %s1991_s24 }
0x2038   :  { %v1965_v40 = vmul.f32 %v1963_v27, %v2972_v9  ;;  %v1987_v25 = vadd.f32 %v3685_v28, %v1986_v11  ;;  %v1993_v27 = vmul.f32 %v3679_v12, %v1992_v35 }
0x203a   :  { %v3939_v39 = vadd.f32 %v1965_v40, %v3819_v16  ;;  %v1989_v32 = vperm.slane %v1987_v25, 0 }
0x203b   :  { %v1938_v13 = vpop.f32.mrf.mxu2 }
0x203c   :  { %v1939_v14 = vadd.f32 %v3725_v56, %v1938_v13  ;;  %v1994_v13 = vadd.f32 %v3685_v28, %v1993_v27  ;;  %v1942_v27 = vmul.f32 %v3926_v57, %v3926_v57 }
0x203e   :  { %v1964_v60 = vadd.f32 %v1962_v6, %v1939_v14  ;;  %v1996_v14 = vperm.slane %v1994_v13, 0 }
0x2040   :  { %v1966_v18 = vmul.f32 %v1964_v60, %v2972_v9 }
0x2042   :  { %v3942_v49 = vadd.f32 %v1966_v18, %v3822_v46 }
0x2044   :  { %v2005_v55 = vpack.c.bf16 %v3942_v49, %v3939_v39 }
0x2046   :  { %2014 = vmatmul.bf16.vlgmr.msrb.gmra.mxu3 %v2005_v55 }
0x20c9   :  { %v2015_v24 = vpop.f32.mrf.mxu3 }
0x20ca   :  { %v2016_v22 = vadd.f32 %v2015_v24, %v1989_v32 }
0x20cc   :  { %2489 = vtanh.f32 %v2016_v22 }
0x20d1   :  { %v2017_v61 = vpop.f32.mrf.mxu3 }
0x20d2   :  { %v2490_v38 = vpop.eup %2489  ;;  %v2018_v16 = vadd.f32 %v2017_v61, %v1989_v32 }
0x20d3   :  { %v2040_v15 = vmul.f32 %v2490_v38, %v2490_v38 }
0x20d4   :  { %2491 = vtanh.f32 %v2018_v16 }
0x20d5   :  { %v2042_v46 = vsub.f32 1.0, %v2040_v15 }
0x20d7   :  { %v2044_v6 = vmul.f32 %v3691_v20, %v2042_v46 }
0x20d9   :  { %v2046_v50 = vsel %vm205_vm2, %v2044_v6, 0.0 }
0x20da   :  { %v2492_v0 = vpop.eup %2491  ;;  %2047 = vadd.xlane.f32.xlu2 %v2046_v50 }
0x20db   :  { %v2022_v1 = vpack.c.bf16 %v2492_v0, %v2490_v38  ;;  %v2041_v21 = vmul.f32 %v2492_v0, %v2492_v0 }
0x20dd   :  { %2345 = vmatmul.msk.bf16.vlgmr.msra.gmra.mxu1 %vm205_vm2, %v2022_v1  ;;  %v2043_v53 = vsub.f32 1.0, %v2041_v21 }
0x20df   :  { %v2045_v29 = vmul.f32 %v3691_v20, %v2043_v53 }
0x20e1   :  { %v2049_v41 = vsel %vm205_vm2, %v2045_v29, 0.0 }
0x20e2   :  { %2050 = vadd.xlane.f32.xlu0 %v2049_v41 }
0x215a   :  { %v2035_v17 = vpop.f32.mrf.mxu1 }
0x215b   :  { %v3955_v47 = vadd.f32 %v3725_v56, %v2035_v17 }
0x215d   :  { %v2054_v31 = vmul.f32 %v3955_v47, %v2878_v54 }
0x215f   :  { %v2056_v10 = vadd.f32 %v2054_v31, %v3939_v39 }
0x2162   :  { %v2037_v37 = vpop.f32.mrf.mxu1 }
0x2163   :  { %v3960_v23 = vadd.f32 %v3725_v56, %v2037_v37 }
0x2165   :  { %v2055_v45 = vmul.f32 %v3960_v23, %v2878_v54 }
0x2167   :  { %v2057_v2 = vadd.f32 %v2055_v45, %v3942_v49 }
0x2169   :  { %v2058_v19 = vpack.c.bf16 %v2057_v2, %v2056_v10 }
0x216b   :  { %2067 = vmatmul.bf16.vlgmr.msra.gmra.mxu2 %v2058_v19 }
0x21ee   :  { %v2068_v40 = vpop.f32.mrf.mxu2 }
0x21ef   :  { %v2069_v60 = vadd.f32 %v2068_v40, %v1996_v14  ;;  %v1944_v40 = vsub.f32 1.0, %v1942_v27 }
0x21f1   :  { %2493 = vtanh.f32 %v2069_v60 }
0x21f6   :  { %v2070_v18 = vpop.f32.mrf.mxu2 }
0x21f7   :  { %v2494_v55 = vpop.eup %2493  ;;  %v2071_v3 = vadd.f32 %v2070_v18, %v1996_v14 }
0x21f8   :  { %v2093_v11 = vmul.f32 %v2494_v55, %v2494_v55 }
0x21f9   :  { %2495 = vtanh.f32 %v2071_v3 }
0x21fa   :  { %v2095_v25 = vsub.f32 1.0, %v2093_v11 }
0x21fc   :  { %v2097_v32 = vmul.f32 %v3691_v20, %v2095_v25 }
0x21fe   :  { %v2099_v24 = vsel %vm205_vm2, %v2097_v32, 0.0 }
0x21ff   :  { %v2496_v22 = vpop.eup %2495  ;;  %2100 = vadd.xlane.f32.xlu1 %v2099_v24 }
0x2200   :  { %v2075_v61 = vpack.c.bf16 %v2496_v22, %v2494_v55  ;;  %v2094_v38 = vmul.f32 %v2496_v22, %v2496_v22 }
0x2202   :  { %2346 = vmatmul.msk.bf16.vlgmr.msrb.gmra.mxu0 %vm205_vm2, %v2075_v61  ;;  %v2096_v16 = vsub.f32 1.0, %v2094_v38 }
0x2204   :  { %v2098_v15 = vmul.f32 %v3691_v20, %v2096_v16 }
0x2206   :  { %v2102_v46 = vsel %vm205_vm2, %v2098_v15, 0.0 }
0x2207   :  { %2103 = vadd.xlane.f32.xlu2 %v2102_v46 }
0x227f   :  { %v2088_v6 = vpop.f32.mrf.mxu0 }
0x2280   :  { %v2089_v50 = vadd.f32 %v3725_v56, %v2088_v6 }
0x2282   :  { %v2107_v1 = vmul.f32 %v2089_v50, %v2878_v54  ;;  %v2213_v32 = vmul.f32 2.0, %v2089_v50 }
0x2284   :  { %v2109_v29 = vadd.f32 %v2107_v1, %v3939_v39  ;;  %v2215_v61 = vadd.f32 %v2213_v32, %v3955_v47 }
0x2287   :  { %v2090_v0 = vpop.f32.mrf.mxu0 }
0x2288   :  { %v2091_v21 = vadd.f32 %v3725_v56, %v2090_v0 }
0x228a   :  { %v2108_v53 = vmul.f32 %v2091_v21, %v2878_v54  ;;  %v2214_v15 = vmul.f32 2.0, %v2091_v21  ;;  %v1999_v21 = vstv %s1998_s16 }
0x228c   :  { %v2110_v41 = vadd.f32 %v2108_v53, %v3942_v49  ;;  %v2216_v1 = vadd.f32 %v2214_v15, %v3960_v23  ;;  %v290_v15 = vsub.f32 0.0, %v3595_v5 }
0x228e   :  { %v2111_v17 = vpack.c.bf16 %v2110_v41, %v2109_v29 }
0x2290   :  { %2120 = vmatmul.bf16.vlgmr.msrb.gmra.mxu1 %v2111_v17 }
0x230d   :  { %v2121_v37 = vpop.f32.mrf.mxu1 }
0x230e   :  { %v2122_v31 = vadd.f32 %v2121_v37, %v1996_v14  ;;  %v2000_v37 = vmul.f32 %v3679_v12, %v1999_v21 }
0x2310   :  { %2497 = vtanh.f32 %v2122_v31  ;;  %v2001_v31 = vadd.f32 %v3685_v28, %v2000_v37  ;;  %v397_v37 = vsub.f32 0.0, %v3597_v4 }
0x2315   :  { %v2123_v45 = vpop.f32.mrf.mxu1 }
0x2316   :  { %v2498_v10 = vpop.eup %2497  ;;  %v2124_v2 = vadd.f32 %v2123_v45, %v1996_v14  ;;  %v1946_v14 = vmul.f32 %v3691_v20, %v1944_v40 }
0x2317   :  { %v2146_v19 = vmul.f32 %v2498_v10, %v2498_v10 }
0x2318   :  { %2499 = vtanh.f32 %v2124_v2  ;;  %v1950_v57 = vsel %vm205_vm2, %v1946_v14, 0.0  ;;  %v4015_v14 = vpop.xlane.xlu0 %1435 }
0x2319   :  { %v2148_v35 = vsub.f32 1.0, %v2146_v19 }
0x231b   :  { %v2150_v54 = vmul.f32 %v3691_v20, %v2148_v35 }
0x231d   :  { %v2152_v13 = vsel %vm205_vm2, %v2150_v54, 0.0 }
0x231e   :  { %v2500_v60 = vpop.eup %2499  ;;  %2153 = vadd.xlane.f32.xlu1 %v2152_v13 }
0x231f   :  { %v2128_v18 = vpack.c.bf16 %v2500_v60, %v2498_v10  ;;  %v2147_v55 = vmul.f32 %v2500_v60, %v2500_v60 }
0x2321   :  { %2347 = vmatmul.msk.bf16.vlgmr.msra.gmra.mxu3 %vm205_vm2, %v2128_v18  ;;  %v2149_v3 = vsub.f32 1.0, %v2147_v55  ;;  %v4013_v55 = vpop.xlane.xlu1 %1382 }
0x2323   :  { %v2151_v11 = vmul.f32 %v3691_v20, %v2149_v3 }
0x2325   :  { %v2155_v25 = vsel %vm205_vm2, %v2151_v11, 0.0  ;;  %v4017_v11 = vpop.xlane.xlu2 %1534 }
0x2326   :  { %2156 = vadd.xlane.f32.xlu2 %v2155_v25  ;;  %1951 = vadd.xlane.f32.xlu1 %v1950_v57  ;;  %v1585_v57 = vpop.xlane.xlu0 %1584 }
0x2329   :  { %v1532_v3 = vpop.xlane.xlu1 %1531 }
0x232d   :  { %v1638_v32 = vpop.xlane.xlu2 %1637 }
0x2331   :  { %v4019_v25 = vpop.xlane.xlu1 %1587 }
0x23a4   :  { %v2141_v24 = vpop.f32.mrf.mxu3 }
0x23a5   :  { %v2142_v22 = vadd.f32 %v3725_v56, %v2141_v24  ;;  %v4021_v24 = vpop.xlane.xlu1 %1693 }
0x23a7   :  { %v2217_v38 = vmul.f32 2.0, %v2142_v22  ;;  %v2160_v6 = vmul.f32 %v2142_v22, %v2943_v30  ;;  %v4023_v22 = vpop.xlane.xlu0 %1640 }
0x23a9   :  { %v3993_v16 = vadd.f32 %v2217_v38, %v2215_v61  ;;  %v2162_v29 = vadd.f32 %v2160_v6, %v3939_v39  ;;  %v4025_v61 = vpop.xlane.xlu2 %1845  ;;  %v343_v6 = vsub.f32 0.0, %v3481_v43 }
0x23ac   :  { %v2143_v46 = vpop.f32.mrf.mxu3 }
0x23ad   :  { %v2144_v0 = vadd.f32 %v3725_v56, %v2143_v46  ;;  %v2003_v56 = vperm.slane %v2001_v31, 0 }
0x23af   :  { %v2161_v50 = vmul.f32 %v2144_v0, %v2943_v30  ;;  %v2218_v53 = vmul.f32 2.0, %v2144_v0  ;;  %v4029_v38 = vpop.xlane.xlu0 %1690  ;;  %v423_v0 = vmul.f32 2.0, %v290_v15  ;;  %v1536_v15 = vsub.f32 0.0, %v1532_v3 }
0x23b1   :  { %v2163_v41 = vadd.f32 %v2161_v50, %v3942_v49  ;;  %v4001_v17 = vadd.f32 %v2218_v53, %v2216_v1  ;;  %v1896_v46 = vpop.xlane.xlu2 %1895  ;;  %v558_v1 = vsub.f32 0.0, %v3489_v48  ;;  %v236_v53 = vsub.f32 0.0, %v3479_v42 }
0x23b2   :  { %v664_v42 = vsub.f32 0.0, %v3495_v51  ;;  %v91_v51 = vld [vmem:[%s4103_s2 + $0x8] sm:$0xff] }
0x23b3   :  { %v2164_v47 = vpack.c.bf16 %v2163_v41, %v2162_v29  ;;  %v427_v29 = vmul.f32 2.0, %v343_v6  ;;  %v425_v21 = vadd.f32 %v423_v0, %v236_v53  ;;  %v680_v31 = vmul.f32 2.0, %v558_v1 }
0x23b4   :  { %v922_v53 = vsub.f32 0.0, %v3505_v59  ;;  %v1848_v59 = vsub.f32 0.0, %v4025_v61 }
0x23b5   :  { %2173 = vmatmul.bf16.vlgmr.msra.gmra.mxu0 %v2164_v47  ;;  %v611_v47 = vsub.f32 0.0, %v3599_v7  ;;  %v429_v5 = vadd.f32 %v427_v29, %v425_v21  ;;  %v1589_v7 = vsub.f32 0.0, %v1585_v57  ;;  %v1127_v57 = vsub.f32 0.0, %v3513_v52 }
0x23b7   :  { %v1790_v41 = vpop.xlane.xlu0 %1789  ;;  %v684_v43 = vmul.f32 2.0, %v611_v47  ;;  %v431_v48 = vadd.f32 %v429_v5, %v397_v37  ;;  %v1385_v47 = vsub.f32 0.0, %v4013_v55  ;;  %v1590_v37 = vsub.f32 0.0, %v4019_v25 }
0x23b8   :  { %v1794_v52 = vsub.f32 0.0, %v1790_v41  ;;  %v1200_v5 = vmul.f32 2.0, %v1127_v57  ;;  %v1180_v25 = vsub.f32 0.0, %v3605_v36 }
0x23b9   :  { %v1712_v41 = vmul.f32 2.0, %v1590_v37 }
0x2432   :  { %v2174_v45 = vpop.f32.mrf.mxu0 }
0x2433   :  { %v2175_v23 = vadd.f32 %v2174_v45, %v2003_v56  ;;  %v505_v45 = vsub.f32 0.0, %v3487_v62  ;;  %v763_v62 = vsub.f32 0.0, %v3497_v8 }
0x2435   :  { %2501 = vtanh.f32 %v2175_v23  ;;  %v816_v23 = vsub.f32 0.0, %v3601_v34 }
0x243a   :  { %v2176_v30 = vpop.f32.mrf.mxu0 }
0x243b   :  { %v2502_v10 = vpop.eup %2501  ;;  %v2177_v2 = vadd.f32 %v2176_v30, %v2003_v56  ;;  %v4037_v56 = vpop.xlane.xlu2 %2047  ;;  %v682_v30 = vadd.f32 %v680_v31, %v505_v45  ;;  %v1021_v31 = vsub.f32 0.0, %v3603_v63 }
0x243c   :  { %v2199_v19 = vmul.f32 %v2502_v10, %v2502_v10  ;;  %v2052_v36 = vsub.f32 0.0, %v4037_v56 }
0x243d   :  { %2503 = vtanh.f32 %v2177_v2  ;;  %v686_v4 = vadd.f32 %v684_v43, %v682_v30 }
0x243e   :  { %v2201_v35 = vsub.f32 1.0, %v2199_v19  ;;  %v4043_v19 = vpop.xlane.xlu0 %1898 }
0x2440   :  { %v2203_v27 = vmul.f32 %v3691_v20, %v2201_v35  ;;  %v938_v35 = vmul.f32 2.0, %v816_v23  ;;  %v1643_v23 = vsub.f32 0.0, %v4023_v22 }
0x2442   :  { %v2205_v54 = vsel %vm205_vm2, %v2203_v27, 0.0  ;;  %v433_v27 = vmul.f32 %v431_v48, %v2972_v9  ;;  %v1716_v61 = vmul.f32 2.0, %v1643_v23 }
0x2443   :  { %v2504_v13 = vpop.eup %2503  ;;  %2206 = vadd.xlane.f32.xlu2 %v2205_v54  ;;  %v1642_v54 = vsub.f32 0.0, %v1638_v32 }
0x2444   :  { %v2181_v40 = vpack.c.bf16 %v2504_v13, %v2502_v10  ;;  %v2200_v12 = vmul.f32 %v2504_v13, %v2504_v13  ;;  %v869_v10 = vsub.f32 0.0, %v3503_v58  ;;  %v688_v13 = vadd.f32 %v686_v4, %v664_v42 }
0x2445   :  { %v1074_v58 = vsub.f32 0.0, %v3511_v33  ;;  %v1715_v32 = vmul.f32 2.0, %v1642_v54  ;;  %v435_v6 = vadd.f32 %v433_v27, %v91_v51  ;;  %v1438_v27 = vsub.f32 0.0, %v4015_v14 }
0x2446   :  { %2348 = vmatmul.msk.bf16.vlgmr.msrb.gmra.mxu2 %vm205_vm2, %v2181_v40  ;;  %v2202_v28 = vsub.f32 1.0, %v2200_v12  ;;  %v942_v40 = vmul.f32 2.0, %v869_v10  ;;  %v4047_v12 = vpop.xlane.xlu2 %2103  ;;  %v690_v8 = vmul.f32 %v688_v13, %v2972_v9  ;;  %v1949_v33 = vpop.xlane.xlu0 %1948  ;;  %v1537_v54 = vsub.f32 0.0, %v4017_v11 }
0x2447   :  { %v1196_v29 = vmul.f32 2.0, %v1074_v58  ;;  %v1953_v30 = vsub.f32 0.0, %v1949_v33  ;;  %v1970_v13 = vmul.f32 2.0, %v1848_v59 }
0x2448   :  { %v2204_v60 = vmul.f32 %v3691_v20, %v2202_v28  ;;  %v4027_v20 = vpop.xlane.xlu1 %1792  ;;  %v1711_v28 = vmul.f32 2.0, %v1589_v7  ;;  %v692_v33 = vadd.f32 %v690_v8, %v435_v6 }
0x2449   :  { %v1198_v10 = vadd.f32 %v1196_v29, %v1021_v31  ;;  %v1795_v14 = vsub.f32 0.0, %v4027_v20 }
0x244a   :  { %v2208_v18 = vsel %vm205_vm2, %v2204_v60, 0.0  ;;  %v940_v60 = vadd.f32 %v938_v35, %v763_v62  ;;  %v1713_v21 = vadd.f32 %v1711_v28, %v1536_v15  ;;  %v1714_v28 = vadd.f32 %v1712_v41, %v1537_v54 }
0x244b   :  { %2209 = vadd.xlane.f32.xlu0 %v2208_v18  ;;  %v1900_v18 = vsub.f32 0.0, %v1896_v46  ;;  %v1695_v46 = vsub.f32 0.0, %v4029_v38  ;;  %v1458_v38 = vmul.f32 2.0, %v1385_v47  ;;  %v1202_v63 = vadd.f32 %v1200_v5, %v1198_v10 }
0x244c   :  { %v944_v0 = vadd.f32 %v942_v40, %v940_v60  ;;  %v1717_v45 = vadd.f32 %v1715_v32, %v1713_v21  ;;  %v2106_v15 = vsub.f32 0.0, %v4047_v12 }
0x244d   :  { %v1973_v3 = vmul.f32 2.0, %v1900_v18  ;;  %v1460_v58 = vadd.f32 %v1458_v38, %v3519_v26  ;;  %v1696_v18 = vsub.f32 0.0, %v4021_v24 }
0x244e   :  { %v2157_v55 = vpop.xlane.xlu2 %2156  ;;  %v946_v42 = vadd.f32 %v944_v0, %v922_v53  ;;  %v1719_v4 = vadd.f32 %v1717_v45, %v1695_v46  ;;  %v1718_v0 = vadd.f32 %v1716_v61, %v1714_v28 }
0x244f   :  { %v1462_v32 = vadd.f32 %v1460_v58, %v1438_v27  ;;  %v2159_v29 = vsub.f32 0.0, %v2157_v55  ;;  %v2537_v27 = vld [vmem:[%s4108_s7] ss:$0 sm:$0xff]  ;;  %s2582_s7 = smov 128  }
0x2450   :  { %v1843_v50 = vpop.xlane.xlu1 %1842  ;;  %v948_v40 = vmul.f32 %v946_v42, %v2972_v9  ;;  %v1721_v60 = vmul.f32 %v1719_v4, %v2972_v9  ;;  %v1720_v37 = vadd.f32 %v1718_v0, %v1696_v18 }
0x2451   :  { %v1847_v34 = vsub.f32 0.0, %v1843_v50  ;;  %v1464_v31 = vmul.f32 %v1462_v32, %v2972_v9 }
0x2452   :  { %v1723_v24 = vadd.f32 %v1721_v60, %v3626_v44  ;;  %v1722_v6 = vmul.f32 %v1720_v37, %v2972_v9 }
0x2453   :  { %v1969_v1 = vmul.f32 2.0, %v1847_v34  ;;  %v1204_v34 = vadd.f32 %v1202_v63, %v1180_v25 }
0x2455   :  { %v1971_v48 = vadd.f32 %v1969_v1, %v1794_v52  ;;  %v1972_v1 = vadd.f32 %v1970_v13, %v1795_v14  ;;  %v1206_v20 = vmul.f32 %v1204_v34, %v2972_v9  ;;  %v2228_v52 = vmul.f32 2.0, %v2106_v15 }
0x2457   :  { %v1975_v35 = vadd.f32 %v1973_v3, %v1971_v48  ;;  %v950_v3 = vadd.f32 %v948_v40, %v692_v33 }
0x2458   :  { %v2101_v2 = vpop.xlane.xlu1 %2100 }
0x2459   :  { %v2105_v43 = vsub.f32 0.0, %v2101_v2  ;;  %v1901_v2 = vsub.f32 0.0, %v4043_v19  ;;  %v1977_v62 = vadd.f32 %v1975_v35, %v1953_v30  ;;  %v1208_v59 = vadd.f32 %v1206_v20, %v950_v3 }
0x245b   :  { %v2227_v22 = vmul.f32 2.0, %v2105_v43  ;;  %v1974_v11 = vmul.f32 2.0, %v1901_v2  ;;  %v1979_v56 = vmul.f32 %v1977_v62, %v2972_v9  ;;  %v2232_v43 = vmul.f32 2.0, %v2159_v29 }
0x245c   :  { %v1466_v55 = vadd.f32 %v1464_v31, %v1208_v59 }
0x245d   :  { %v2229_v57 = vadd.f32 %v2227_v22, %v2052_v36  ;;  %v1976_v46 = vadd.f32 %v1974_v11, %v1972_v1  ;;  %v1981_v5 = vadd.f32 %v1979_v56, %v1723_v24 }
0x2460   :  { %v2154_v50 = vpop.xlane.xlu1 %2153 }
0x2461   :  { %v2158_v7 = vsub.f32 0.0, %v2154_v50  ;;  %v2051_v50 = vpop.xlane.xlu0 %2050 }
0x2462   :  { %v2053_v45 = vsub.f32 0.0, %v2051_v50 }
0x2463   :  { %v2231_v51 = vmul.f32 2.0, %v2158_v7  ;;  %v1724_v7 = vadd.f32 %v1722_v6, %v1466_v55 }
0x2464   :  { %v2230_v8 = vadd.f32 %v2228_v52, %v2053_v45 }
0x2465   :  { %v2233_v26 = vadd.f32 %v2231_v51, %v2229_v57 }
0x2466   :  { %v2234_v42 = vadd.f32 %v2232_v43, %v2230_v8 }
0x2468   :  { %v1952_v19 = vpop.xlane.xlu1 %1951 }
0x2469   :  { %v1954_v47 = vsub.f32 0.0, %v1952_v19 }
0x246b   :  { %v1978_v23 = vadd.f32 %v1976_v46, %v1954_v47 }
0x246d   :  { %v1980_v10 = vmul.f32 %v1978_v23, %v2972_v9 }
0x246f   :  { %v1982_v41 = vadd.f32 %v1980_v10, %v1724_v7 }
0x24b6   :  { %v2207_v53 = vpop.xlane.xlu2 %2206 }
0x24b7   :  { %v2211_v21 = vsub.f32 0.0, %v2207_v53 }
0x24b9   :  { %v2235_v12 = vadd.f32 %v2233_v26, %v2211_v21 }
0x24bb   :  { %v2237_v48 = vmul.f32 %v2235_v12, %v2972_v9 }
0x24bd   :  { %v2239_v30 = vadd.f32 %v2237_v48, %v1981_v5 }
0x24be   :  { %v2210_v44 = vpop.xlane.xlu0 %2209 }
0x24bf   :  { %2244 = vst.msk [vmem:[%s4111_s10] sm:$0xff] %vm2243_vm3, %v2239_v30  ;;  %v2212_v25 = vsub.f32 0.0, %v2210_v44 }
0x24c1   :  { %v2236_v38 = vadd.f32 %v2234_v42, %v2212_v25 }
0x24c3   :  { %v2238_v4 = vmul.f32 %v2236_v38, %v2972_v9 }
0x24c5   :  { %v2240_v35 = vadd.f32 %v2238_v4, %v1982_v41 }
0x24c7   :  { %2245 = vst.msk [vmem:[%s4111_s10 + $0x8] sm:$0xff] %vm2243_vm3, %v2240_v35 }
0x24c9   :  { %v2194_v63 = vpop.f32.mrf.mxu2 }
0x24ca   :  { %v2195_v2 = vadd.f32 %v2537_v27, %v2194_v63 }
0x24cc   :  { %v2221_v22 = vadd.f32 %v3993_v16, %v2195_v2 }
0x24ce   :  { %v2223_v54 = vmul.f32 %v2221_v22, %v2972_v9 }
0x24d0   :  { %v2225_v61 = vadd.f32 %v2223_v54, %v3939_v39 }
0x24d1   :  { %v2196_v13 = vpop.f32.mrf.mxu2 }
0x24d2   :  { %2241 = vst [vmem:[#allocation4] sm:$0xff] %v2225_v61  ;;  %v2197_v62 = vadd.f32 %v2537_v27, %v2196_v13 }
0x24d4   :  { %v2222_v40 = vadd.f32 %v4001_v17, %v2197_v62 }
0x24d6   :  { %v2224_v34 = vmul.f32 %v2222_v40, %v2972_v9 }
0x24d8   :  { %v2226_v16 = vadd.f32 %v2224_v34, %v3942_v49 }
0x24da   :  { %2242 = vst [vmem:[#allocation4 + $0x8] sm:$0xff] %v2226_v16 }
0x24db   :  { %2258 = dma.vmem_to_hbm [thread:$0]  %s2251_s30, 256, %s2253_s14, [#allocation5], %s2582_s7, %s2582_s7, %s2583_s25  }
0x24dc   :  { %2576 = dma.done.wait [#allocation5], 256  }
0x24dd   :  { %2577 = vsyncadd [#allocation5], 4294967040 }
0x24de   :  { %2267 = vsyncpa [#allocation5], 1 }

</bundles_post_ra>
